<compile_context>
chip_gen: v7x
topology: tpu7x:2x2x1
jax: 0.10.0
libtpu: 0.0.40
codegen_flags: <defaults>
</compile_context>

<pallas_src>
import functools

import jax
import jax.numpy as jnp
from jax.experimental import pallas as pl
from jax.experimental.pallas import tpu as pltpu

NEG_INF = -1e9
LN_EPS = 1e-5
COMPUTE_DT = jnp.bfloat16  # MXU input dtype (accumulation stays f32)

PARAM_ORDER = [
    "wq1", "bq1", "wk1", "bk1", "wv1", "bv1", "wo1", "bo1",
    "wq2", "bq2", "wk2", "bk2", "wv2", "bv2", "wo2", "bo2",
    "g1", "be1", "g2", "be2", "g3", "be3",
    "wf1", "bf1", "wf2", "bf2",
]
_MATMUL_WEIGHTS = {"wq1", "wk1", "wv1", "wo1", "wq2", "wk2", "wv2", "wo2",
                   "wf1", "wf2"}


# ---------------------------------------------------------------------------
# Pallas kernel: one (batch, query-tile) block of the decoder layer per step.
# ---------------------------------------------------------------------------
def decoder_layer_kernel(num_heads, q_tile,
                         xfull_ref, xq_ref, enc_ref, amask_ref, kpm_ref,
                         wq1, bq1, wk1, bk1, wv1, bv1, wo1, bo1,
                         wq2, bq2, wk2, bk2, wv2, bv2, wo2, bo2,
                         g1, be1, g2, be2, g3, be3,
                         wf1, bf1, wf2, bf2,
                         o_ref,
                         k1_ref, v1_ref, k2_ref, v2_ref, ctx_ref):
    H = num_heads
    TQ = q_tile
    cdt = COMPUTE_DT

    qi = pl.program_id(1)

    x_q = xq_ref[0].astype(jnp.float32)            # (TQ, D) f32 queries + residual
    amask = amask_ref[...].astype(jnp.float32)     # (TQ, S)  additive attn_mask tile
    kmask = kpm_ref[0]                             # (1, Se)  additive key-pad mask

    D = x_q.shape[-1]
    Dh = D // H

    # --- K/V projection caches: computed once per batch element (qi == 0) and
    # reused for every query tile of that batch (qi axis is "arbitrary").
    @pl.when(qi == 0)
    def _():
        x_full = xfull_ref[0]                      # (S, D)  bf16 self-attn K/V source
        enc = enc_ref[0]                           # (Se, D) bf16 cross-attn K/V source
        k1_ref[...] = (jnp.dot(x_full, wk1[...],
                               preferred_element_type=jnp.float32)
                       + bk1[...]).astype(cdt)
        v1_ref[...] = (jnp.dot(x_full, wv1[...],
                               preferred_element_type=jnp.float32)
                       + bv1[...]).astype(cdt)
        k2_ref[...] = (jnp.dot(enc, wk2[...],
                               preferred_element_type=jnp.float32)
                       + bk2[...]).astype(cdt)
        v2_ref[...] = (jnp.dot(enc, wv2[...],
                               preferred_element_type=jnp.float32)
                       + bv2[...]).astype(cdt)

    def layernorm(v, g, b):
        mu = jnp.mean(v, axis=-1, keepdims=True)
        var = jnp.mean((v - mu) ** 2, axis=-1, keepdims=True)
        return (v - mu) * jax.lax.rsqrt(var + LN_EPS) * g[...] + b[...]

    def mha(q_in, k_ref, v_ref, wq, bq, wo, bo, add_mask):
        # query projection: bf16 MXU inputs, f32 accum; 1/sqrt(Dh) pre-folded
        q = jnp.dot(q_in.astype(cdt), wq[...],
                    preferred_element_type=jnp.float32) + bq[...]
        # TODO(synk): convert to lax.fori_loop(..., unroll=True) with pl.ds once
        # Dh is a multiple of 128 so dynamic lane slices lower cleanly.
        for h in range(H):                         # statically unrolled head loop
            sl = slice(h * Dh, (h + 1) * Dh)
            qh = q[:, sl].astype(cdt)
            kh = k_ref[:, sl]                      # bf16 slice straight from cache
            vh = v_ref[:, sl]
            # Q @ K^T: transpose absorbed by the contraction (no explicit kh.T)
            s = jax.lax.dot_general(qh, kh, (((1,), (1,)), ((), ())),
                                    preferred_element_type=jnp.float32)
            s = s + add_mask                       # f32 additive mask (broadcasts)
            m = jnp.max(s, axis=-1, keepdims=True)
            p = jnp.exp(s - m)
            denom = jnp.sum(p, axis=-1, keepdims=True)
            ctx = jnp.dot(p.astype(cdt), vh, preferred_element_type=jnp.float32)
            # deferred softmax normalization: scale (TQ, Dh), not (TQ, S)
            ctx = ctx * pl.reciprocal(denom, approx=True)
            ctx_ref[:, sl] = ctx.astype(cdt)
        # one full-contraction (K = D) output projection instead of H K=Dh dots
        return jnp.dot(ctx_ref[...], wo[...],
                       preferred_element_type=jnp.float32) + bo[...]

    # --- self attention (attn_mask) + residual + layernorm --------------------
    attn1 = mha(x_q, k1_ref, v1_ref, wq1, bq1, wo1, bo1, amask)
    out1 = layernorm(x_q + attn1, g1, be1)

    # --- cross attention (key_padding_mask) + residual + layernorm ------------
    attn2 = mha(out1, k2_ref, v2_ref, wq2, bq2, wo2, bo2, kmask)
    out2 = layernorm(out1 + attn2, g2, be2)

    # --- feed-forward (hidden dim chunked) + residual + layernorm --------------
    F = wf1.shape[1]
    FC = 1024 if F % 1024 == 0 else F              # chunk size (static)
    out2_c = out2.astype(cdt)
    acc = jnp.zeros((TQ, D), jnp.float32)
    for c in range(F // FC):                       # statically unrolled
        lo, hi = c * FC, (c + 1) * FC
        h1 = jnp.dot(out2_c, wf1[:, lo:hi],
                     preferred_element_type=jnp.float32) + bf1[:, lo:hi]
        h1 = jnp.maximum(h1, 0.0).astype(cdt)
        acc = acc + jnp.dot(h1, wf2[lo:hi, :], preferred_element_type=jnp.float32)
    out3 = layernorm(out2 + acc + bf2[...], g3, be3)

    o_ref[0] = out3.astype(o_ref.dtype)


# ---------------------------------------------------------------------------
# Wrapper: mask compaction, scale folding, bf16 weight cast, BlockSpecs, grid.
# ---------------------------------------------------------------------------
def decoder_layer(x, enc_output, look_ahead_mask, padding_mask, attn_mask,
                  params, num_heads):
    del look_ahead_mask  # not used by the PyTorch forward either
    B, S, D = x.shape
    _, Se, _ = enc_output.shape
    Dh = D // num_heads
    scale = 1.0 / float(Dh) ** 0.5

    # generation-aware VMEM budget / query tile size
    try:
        vmem_cap = getattr(pltpu.get_tpu_info(), "vmem_capacity_bytes",
                           128 * 1024 * 1024)
    except Exception:
        vmem_cap = 128 * 1024 * 1024
    if vmem_cap <= 64 * 1024 * 1024:       # v7x-class: 64 MiB physical, leave headroom
        vmem_limit = 52 * 1024 * 1024
        tq_max = 128
    else:                                  # v5e / v6e: 128 MiB physical
        vmem_limit = 100 * 1024 * 1024
        tq_max = 256

    if S % tq_max == 0:
        TQ = tq_max
    elif S % 128 == 0:
        TQ = 128
    else:
        TQ = S
    n_q = S // TQ

    # compact additive key-padding mask: (B, 1, Se), broadcast inside the kernel
    kpm_add = jnp.where(padding_mask, NEG_INF, 0.0).astype(jnp.float32)[:, None, :]

    # fold the 1/sqrt(Dh) query scale into the query projections (free at runtime)
    pp = dict(params)
    pp["wq1"] = params["wq1"] * scale
    pp["bq1"] = params["bq1"] * scale
    pp["wq2"] = params["wq2"] * scale
    pp["bq2"] = params["bq2"] * scale
    param_args = [pp[n].astype(COMPUTE_DT) if n in _MATMUL_WEIGHTS
                  else pp[n].astype(jnp.float32) for n in PARAM_ORDER]

    def const_spec(shape):
        n = len(shape)
        # Constant block index -> fetched once; single-buffered to halve weight VMEM.
        return pl.BlockSpec(shape, lambda b, qi, n=n: (0,) * n,
                            pipeline_mode=pl.Buffered(1))

    in_specs = [
        pl.BlockSpec((1, S, D), lambda b, qi: (b, 0, 0)),    # x (bf16): self K/V source
        pl.BlockSpec((1, TQ, D), lambda b, qi: (b, qi, 0)),  # x query tile (f32)
        pl.BlockSpec((1, Se, D), lambda b, qi: (b, 0, 0)),   # enc_output (bf16)
        pl.BlockSpec((TQ, S), lambda b, qi: (qi, 0)),        # additive attn_mask tile
        pl.BlockSpec((1, 1, Se), lambda b, qi: (b, 0, 0)),   # compact key-pad mask
    ] + [const_spec(a.shape) for a in param_args]
    out_spec = pl.BlockSpec((1, TQ, D), lambda b, qi: (b, qi, 0))

    scratch_shapes = [
        pltpu.VMEM((S, D), COMPUTE_DT),    # self-attn K cache
        pltpu.VMEM((S, D), COMPUTE_DT),    # self-attn V cache
        pltpu.VMEM((Se, D), COMPUTE_DT),   # cross-attn K cache
        pltpu.VMEM((Se, D), COMPUTE_DT),   # cross-attn V cache
        pltpu.VMEM((TQ, D), COMPUTE_DT),   # per-tile head-context assembly buffer
    ]

    kernel = functools.partial(decoder_layer_kernel, num_heads, TQ)
    fn = pl.pallas_call(
        kernel,
        out_shape=jax.ShapeDtypeStruct((B, S, D), jnp.float32),
        grid=(B, n_q),
        in_specs=in_specs,
        out_specs=out_spec,
        scratch_shapes=scratch_shapes,
        compiler_params=pltpu.CompilerParams(
            # batch stays parallel (megacore sharding on v7x); qi must be
            # arbitrary because the K/V scratch caches are carried across it.
            dimension_semantics=("parallel", "arbitrary"),
            vmem_limit_bytes=vmem_limit),
    )
    args = [x.astype(COMPUTE_DT), x.astype(jnp.float32),
            enc_output.astype(COMPUTE_DT), attn_mask.astype(COMPUTE_DT), kpm_add]
    return fn(*(args + param_args))


# ---------------------------------------------------------------------------
# Deterministic parameter init + pure-JAX f32 reference for verification
# ---------------------------------------------------------------------------
def init_params(key, D, F):
    keys = iter(jax.random.split(key, 64))

    def rnd(shape, scale=0.05):
        return jax.random.normal(next(keys), shape, jnp.float32) * scale

    p = {}
    for i in (1, 2):
        for name in ("q", "k", "v", "o"):
            p[f"w{name}{i}"] = rnd((D, D))
            p[f"b{name}{i}"] = rnd((1, D), 0.01)
    for i in (1, 2, 3):
        p[f"g{i}"] = 1.0 + rnd((1, D), 0.01)
        p[f"be{i}"] = rnd((1, D), 0.01)
    p["wf1"] = rnd((D, F))
    p["bf1"] = rnd((1, F), 0.01)
    p["wf2"] = rnd((F, D))
    p["bf2"] = rnd((1, D), 0.01)
    return p


def reference_decoder_layer(x, enc, padding_mask, attn_mask, p, H):
    def mha(qi, ki, vi, wq, bq, wk, bk, wv, bv, wo, bo, addm):
        q = qi @ wq + bq
        k = ki @ wk + bk
        v = vi @ wv + bv
        B, Lq, D = q.shape
        Lk = k.shape[1]
        Dh = D // H
        q = q.reshape(B, Lq, H, Dh).transpose(0, 2, 1, 3) / jnp.sqrt(float(Dh))
        k = k.reshape(B, Lk, H, Dh).transpose(0, 2, 1, 3)
        v = v.reshape(B, Lk, H, Dh).transpose(0, 2, 1, 3)
        s = jnp.einsum("bhqd,bhkd->bhqk", q, k) + addm
        a = jax.nn.softmax(s, axis=-1)
        o = jnp.einsum("bhqk,bhkd->bhqd", a, v).transpose(0, 2, 1, 3).reshape(B, Lq, D)
        return o @ wo + bo

    def ln(v, g, b):
        mu = v.mean(-1, keepdims=True)
        var = ((v - mu) ** 2).mean(-1, keepdims=True)
        return (v - mu) * jax.lax.rsqrt(var + LN_EPS) * g + b

    amask = attn_mask[None, None]
    kmask = jnp.where(padding_mask, NEG_INF, 0.0)[:, None, None, :]
    attn1 = mha(x, x, x, p["wq1"], p["bq1"], p["wk1"], p["bk1"],
                p["wv1"], p["bv1"], p["wo1"], p["bo1"], amask)
    out1 = ln(x + attn1, p["g1"], p["be1"])
    attn2 = mha(out1, enc, enc, p["wq2"], p["bq2"], p["wk2"], p["bk2"],
                p["wv2"], p["bv2"], p["wo2"], p["bo2"], kmask)
    out2 = ln(out1 + attn2, p["g2"], p["be2"])
    h = jax.nn.relu(out2 @ p["wf1"] + p["bf1"])
    ffn = h @ p["wf2"] + p["bf2"]
    return ln(out2 + ffn, p["g3"], p["be3"])


if __name__ == "__main__":
    B, S, Se, D, H, F = 2, 8, 8, 32, 4, 64
    key = jax.random.PRNGKey(0)
    kx, ke, kp, kparam = jax.random.split(key, 4)

    x = jax.random.normal(kx, (B, S, D), jnp.float32)
    enc = jax.random.normal(ke, (B, Se, D), jnp.float32)

    # causal (look-ahead style) additive float attn_mask, shape (S, S)
    attn_mask = jnp.where(jnp.triu(jnp.ones((S, S), bool), k=1),
                          NEG_INF, 0.0).astype(jnp.float32)
    look_ahead_mask = attn_mask  # unused by forward (mirrors the PyTorch module)

    # boolean key_padding_mask, True = ignore that encoder position
    # (>=1 valid key per row so the additive -1e9 mask never hits an all-masked row)
    padding_mask = jax.random.bernoulli(kp, 0.25, (B, Se))
    padding_mask = padding_mask.at[:, 0].set(False)

    params = init_params(kparam, D, F)

    out = decoder_layer(x, enc, look_ahead_mask, padding_mask, attn_mask, params, H)
    out = jax.block_until_ready(out)

    ref = reference_decoder_layer(x, enc, padding_mask, attn_mask, params, H)
    assert out.shape == (B, S, D)
    # kernel runs bf16 MXU inputs (f32 accumulation); reference is pure f32
    assert float(jnp.max(jnp.abs(out - ref))) < 3e-2

    print("KERNEL_OK")
</pallas_src>

<mosaic_0001>
module attributes {stable_mosaic.version = 11 : i64} {
  func.func @decoder_layer_kernel(%arg0: i32, %arg1: i32, %arg2: memref<1x8x32xbf16, #tpu.memory_space<vmem>>, %arg3: memref<1x8x32xf32, #tpu.memory_space<vmem>>, %arg4: memref<1x8x32xbf16, #tpu.memory_space<vmem>>, %arg5: memref<8x8xbf16, #tpu.memory_space<vmem>>, %arg6: memref<1x1x8xf32, #tpu.memory_space<vmem>>, %arg7: memref<32x32xbf16, #tpu.memory_space<vmem>>, %arg8: memref<1x32xf32, #tpu.memory_space<vmem>>, %arg9: memref<32x32xbf16, #tpu.memory_space<vmem>>, %arg10: memref<1x32xf32, #tpu.memory_space<vmem>>, %arg11: memref<32x32xbf16, #tpu.memory_space<vmem>>, %arg12: memref<1x32xf32, #tpu.memory_space<vmem>>, %arg13: memref<32x32xbf16, #tpu.memory_space<vmem>>, %arg14: memref<1x32xf32, #tpu.memory_space<vmem>>, %arg15: memref<32x32xbf16, #tpu.memory_space<vmem>>, %arg16: memref<1x32xf32, #tpu.memory_space<vmem>>, %arg17: memref<32x32xbf16, #tpu.memory_space<vmem>>, %arg18: memref<1x32xf32, #tpu.memory_space<vmem>>, %arg19: memref<32x32xbf16, #tpu.memory_space<vmem>>, %arg20: memref<1x32xf32, #tpu.memory_space<vmem>>, %arg21: memref<32x32xbf16, #tpu.memory_space<vmem>>, %arg22: memref<1x32xf32, #tpu.memory_space<vmem>>, %arg23: memref<1x32xf32, #tpu.memory_space<vmem>>, %arg24: memref<1x32xf32, #tpu.memory_space<vmem>>, %arg25: memref<1x32xf32, #tpu.memory_space<vmem>>, %arg26: memref<1x32xf32, #tpu.memory_space<vmem>>, %arg27: memref<1x32xf32, #tpu.memory_space<vmem>>, %arg28: memref<1x32xf32, #tpu.memory_space<vmem>>, %arg29: memref<32x64xbf16, #tpu.memory_space<vmem>>, %arg30: memref<1x64xf32, #tpu.memory_space<vmem>>, %arg31: memref<64x32xbf16, #tpu.memory_space<vmem>>, %arg32: memref<1x32xf32, #tpu.memory_space<vmem>>, %arg33: memref<1x8x32xf32, #tpu.memory_space<vmem>>, %arg34: memref<8x32xbf16, #tpu.memory_space<vmem>>, %arg35: memref<8x32xbf16, #tpu.memory_space<vmem>>, %arg36: memref<8x32xbf16, #tpu.memory_space<vmem>>, %arg37: memref<8x32xbf16, #tpu.memory_space<vmem>>, %arg38: memref<8x32xbf16, #tpu.memory_space<vmem>>) attributes {dimension_semantics = [#tpu.dimension_semantics<parallel>, #tpu.dimension_semantics<arbitrary>], iteration_bounds = array<i64: 2, 1>, scalar_prefetch = 0 : i64, scratch_operands = 5 : i64, tpu.core_type = #tpu.core_type<tc>, window_params = [{transform_indices = @transform_0, window_bounds = array<i64: 1, 8, 32>}, {transform_indices = @transform_1, window_bounds = array<i64: 1, 8, 32>}, {transform_indices = @transform_2, window_bounds = array<i64: 1, 8, 32>}, {transform_indices = @transform_3, window_bounds = array<i64: 8, 8>}, {transform_indices = @transform_4, window_bounds = array<i64: 1, 1, 8>}, {pipeline_mode = #tpu.pipeline_mode<synchronous>, transform_indices = @transform_5, window_bounds = array<i64: 32, 32>}, {pipeline_mode = #tpu.pipeline_mode<synchronous>, transform_indices = @transform_6, window_bounds = array<i64: 1, 32>}, {pipeline_mode = #tpu.pipeline_mode<synchronous>, transform_indices = @transform_7, window_bounds = array<i64: 32, 32>}, {pipeline_mode = #tpu.pipeline_mode<synchronous>, transform_indices = @transform_8, window_bounds = array<i64: 1, 32>}, {pipeline_mode = #tpu.pipeline_mode<synchronous>, transform_indices = @transform_9, window_bounds = array<i64: 32, 32>}, {pipeline_mode = #tpu.pipeline_mode<synchronous>, transform_indices = @transform_10, window_bounds = array<i64: 1, 32>}, {pipeline_mode = #tpu.pipeline_mode<synchronous>, transform_indices = @transform_11, window_bounds = array<i64: 32, 32>}, {pipeline_mode = #tpu.pipeline_mode<synchronous>, transform_indices = @transform_12, window_bounds = array<i64: 1, 32>}, {pipeline_mode = #tpu.pipeline_mode<synchronous>, transform_indices = @transform_13, window_bounds = array<i64: 32, 32>}, {pipeline_mode = #tpu.pipeline_mode<synchronous>, transform_indices = @transform_14, window_bounds = array<i64: 1, 32>}, {pipeline_mode = #tpu.pipeline_mode<synchronous>, transform_indices = @transform_15, window_bounds = array<i64: 32, 32>}, {pipeline_mode = #tpu.pipeline_mode<synchronous>, transform_indices = @transform_16, window_bounds = array<i64: 1, 32>}, {pipeline_mode = #tpu.pipeline_mode<synchronous>, transform_indices = @transform_17, window_bounds = array<i64: 32, 32>}, {pipeline_mode = #tpu.pipeline_mode<synchronous>, transform_indices = @transform_18, window_bounds = array<i64: 1, 32>}, {pipeline_mode = #tpu.pipeline_mode<synchronous>, transform_indices = @transform_19, window_bounds = array<i64: 32, 32>}, {pipeline_mode = #tpu.pipeline_mode<synchronous>, transform_indices = @transform_20, window_bounds = array<i64: 1, 32>}, {pipeline_mode = #tpu.pipeline_mode<synchronous>, transform_indices = @transform_21, window_bounds = array<i64: 1, 32>}, {pipeline_mode = #tpu.pipeline_mode<synchronous>, transform_indices = @transform_22, window_bounds = array<i64: 1, 32>}, {pipeline_mode = #tpu.pipeline_mode<synchronous>, transform_indices = @transform_23, window_bounds = array<i64: 1, 32>}, {pipeline_mode = #tpu.pipeline_mode<synchronous>, transform_indices = @transform_24, window_bounds = array<i64: 1, 32>}, {pipeline_mode = #tpu.pipeline_mode<synchronous>, transform_indices = @transform_25, window_bounds = array<i64: 1, 32>}, {pipeline_mode = #tpu.pipeline_mode<synchronous>, transform_indices = @transform_26, window_bounds = array<i64: 1, 32>}, {pipeline_mode = #tpu.pipeline_mode<synchronous>, transform_indices = @transform_27, window_bounds = array<i64: 32, 64>}, {pipeline_mode = #tpu.pipeline_mode<synchronous>, transform_indices = @transform_28, window_bounds = array<i64: 1, 64>}, {pipeline_mode = #tpu.pipeline_mode<synchronous>, transform_indices = @transform_29, window_bounds = array<i64: 64, 32>}, {pipeline_mode = #tpu.pipeline_mode<synchronous>, transform_indices = @transform_30, window_bounds = array<i64: 1, 32>}, {transform_indices = @transform_31, window_bounds = array<i64: 1, 8, 32>}]} {
    %c0 = arith.constant 0 : index
    %c0_0 = arith.constant 0 : index
    %c0_1 = arith.constant 0 : index
    %0 = vector.load %arg3[%c0, %c0_0, %c0_1] : memref<1x8x32xf32, #tpu.memory_space<vmem>>, vector<1x8x32xf32>
    %1 = vector.shape_cast %0 : vector<1x8x32xf32> to vector<8x32xf32>
    %c0_2 = arith.constant 0 : index
    %c0_3 = arith.constant 0 : index
    %2 = vector.load %arg5[%c0_2, %c0_3] : memref<8x8xbf16, #tpu.memory_space<vmem>>, vector<8x8xbf16>
    %3 = arith.extf %2 : vector<8x8xbf16> to vector<8x8xf32>
    %c0_4 = arith.constant 0 : index
    %c0_5 = arith.constant 0 : index
    %c0_6 = arith.constant 0 : index
    %4 = vector.load %arg6[%c0_4, %c0_5, %c0_6] : memref<1x1x8xf32, #tpu.memory_space<vmem>>, vector<1x1x8xf32>
    %5 = vector.shape_cast %4 : vector<1x1x8xf32> to vector<1x8xf32>
    %c0_i32 = arith.constant 0 : i32
    %6 = arith.cmpi eq, %arg1, %c0_i32 : i32
    %7 = arith.extui %6 : i1 to i32
    %c0_i32_7 = arith.constant 0 : i32
    %8 = arith.cmpi ne, %7, %c0_i32_7 : i32
    scf.if %8 {
      %c0_150 = arith.constant 0 : index
      %c0_151 = arith.constant 0 : index
      %c0_152 = arith.constant 0 : index
      %291 = vector.load %arg2[%c0_150, %c0_151, %c0_152] : memref<1x8x32xbf16, #tpu.memory_space<vmem>>, vector<1x8x32xbf16>
      %292 = vector.shape_cast %291 : vector<1x8x32xbf16> to vector<8x32xbf16>
      %c0_153 = arith.constant 0 : index
      %c0_154 = arith.constant 0 : index
      %c0_155 = arith.constant 0 : index
      %293 = vector.load %arg4[%c0_153, %c0_154, %c0_155] : memref<1x8x32xbf16, #tpu.memory_space<vmem>>, vector<1x8x32xbf16>
      %294 = vector.shape_cast %293 : vector<1x8x32xbf16> to vector<8x32xbf16>
      %c0_156 = arith.constant 0 : index
      %c0_157 = arith.constant 0 : index
      %295 = vector.load %arg9[%c0_156, %c0_157] : memref<32x32xbf16, #tpu.memory_space<vmem>>, vector<32x32xbf16>
      %cst_158 = arith.constant dense<0.000000e+00> : vector<8x32xf32>
      %296 = tpu.matmul %292, %295, %cst_158 {dimension_numbers = #tpu.dot_dimension_numbers<[1], [0], [0], [1], [0, 0, 1, 1], [], []>} : vector<8x32xbf16>, vector<32x32xbf16>, vector<8x32xf32> -> vector<8x32xf32>
      %c0_159 = arith.constant 0 : index
      %c0_160 = arith.constant 0 : index
      %297 = vector.load %arg10[%c0_159, %c0_160] : memref<1x32xf32, #tpu.memory_space<vmem>>, vector<1x32xf32>
      %298 = vector.broadcast %297 : vector<1x32xf32> to vector<8x32xf32>
      %299 = arith.addf %296, %298 : vector<8x32xf32>
      %300 = arith.truncf %299 : vector<8x32xf32> to vector<8x32xbf16>
      %c0_161 = arith.constant 0 : index
      %c0_162 = arith.constant 0 : index
      %301 = vector.load %arg34[%c0_161, %c0_162] : memref<8x32xbf16, #tpu.memory_space<vmem>>, vector<8x32xbf16>
      tpu.vector_store %arg34[%c0_161, %c0_162], %300 {strides = array<i32>} : memref<8x32xbf16, #tpu.memory_space<vmem>>, vector<8x32xbf16>,
      %c0_163 = arith.constant 0 : index
      %c0_164 = arith.constant 0 : index
      %302 = vector.load %arg11[%c0_163, %c0_164] : memref<32x32xbf16, #tpu.memory_space<vmem>>, vector<32x32xbf16>
      %cst_165 = arith.constant dense<0.000000e+00> : vector<8x32xf32>
      %303 = tpu.matmul %292, %302, %cst_165 {dimension_numbers = #tpu.dot_dimension_numbers<[1], [0], [0], [1], [0, 0, 1, 1], [], []>} : vector<8x32xbf16>, vector<32x32xbf16>, vector<8x32xf32> -> vector<8x32xf32>
      %c0_166 = arith.constant 0 : index
      %c0_167 = arith.constant 0 : index
      %304 = vector.load %arg12[%c0_166, %c0_167] : memref<1x32xf32, #tpu.memory_space<vmem>>, vector<1x32xf32>
      %305 = vector.broadcast %304 : vector<1x32xf32> to vector<8x32xf32>
      %306 = arith.addf %303, %305 : vector<8x32xf32>
      %307 = arith.truncf %306 : vector<8x32xf32> to vector<8x32xbf16>
      %c0_168 = arith.constant 0 : index
      %c0_169 = arith.constant 0 : index
      %308 = vector.load %arg35[%c0_168, %c0_169] : memref<8x32xbf16, #tpu.memory_space<vmem>>, vector<8x32xbf16>
      tpu.vector_store %arg35[%c0_168, %c0_169], %307 {strides = array<i32>} : memref<8x32xbf16, #tpu.memory_space<vmem>>, vector<8x32xbf16>,
      %c0_170 = arith.constant 0 : index
      %c0_171 = arith.constant 0 : index
      %309 = vector.load %arg17[%c0_170, %c0_171] : memref<32x32xbf16, #tpu.memory_space<vmem>>, vector<32x32xbf16>
      %cst_172 = arith.constant dense<0.000000e+00> : vector<8x32xf32>
      %310 = tpu.matmul %294, %309, %cst_172 {dimension_numbers = #tpu.dot_dimension_numbers<[1], [0], [0], [1], [0, 0, 1, 1], [], []>} : vector<8x32xbf16>, vector<32x32xbf16>, vector<8x32xf32> -> vector<8x32xf32>
      %c0_173 = arith.constant 0 : index
      %c0_174 = arith.constant 0 : index
      %311 = vector.load %arg18[%c0_173, %c0_174] : memref<1x32xf32, #tpu.memory_space<vmem>>, vector<1x32xf32>
      %312 = vector.broadcast %311 : vector<1x32xf32> to vector<8x32xf32>
      %313 = arith.addf %310, %312 : vector<8x32xf32>
      %314 = arith.truncf %313 : vector<8x32xf32> to vector<8x32xbf16>
      %c0_175 = arith.constant 0 : index
      %c0_176 = arith.constant 0 : index
      %315 = vector.load %arg36[%c0_175, %c0_176] : memref<8x32xbf16, #tpu.memory_space<vmem>>, vector<8x32xbf16>
      tpu.vector_store %arg36[%c0_175, %c0_176], %314 {strides = array<i32>} : memref<8x32xbf16, #tpu.memory_space<vmem>>, vector<8x32xbf16>,
      %c0_177 = arith.constant 0 : index
      %c0_178 = arith.constant 0 : index
      %316 = vector.load %arg19[%c0_177, %c0_178] : memref<32x32xbf16, #tpu.memory_space<vmem>>, vector<32x32xbf16>
      %cst_179 = arith.constant dense<0.000000e+00> : vector<8x32xf32>
      %317 = tpu.matmul %294, %316, %cst_179 {dimension_numbers = #tpu.dot_dimension_numbers<[1], [0], [0], [1], [0, 0, 1, 1], [], []>} : vector<8x32xbf16>, vector<32x32xbf16>, vector<8x32xf32> -> vector<8x32xf32>
      %c0_180 = arith.constant 0 : index
      %c0_181 = arith.constant 0 : index
      %318 = vector.load %arg20[%c0_180, %c0_181] : memref<1x32xf32, #tpu.memory_space<vmem>>, vector<1x32xf32>
      %319 = vector.broadcast %318 : vector<1x32xf32> to vector<8x32xf32>
      %320 = arith.addf %317, %319 : vector<8x32xf32>
      %321 = arith.truncf %320 : vector<8x32xf32> to vector<8x32xbf16>
      %c0_182 = arith.constant 0 : index
      %c0_183 = arith.constant 0 : index
      %322 = vector.load %arg37[%c0_182, %c0_183] : memref<8x32xbf16, #tpu.memory_space<vmem>>, vector<8x32xbf16>
      tpu.vector_store %arg37[%c0_182, %c0_183], %321 {strides = array<i32>} : memref<8x32xbf16, #tpu.memory_space<vmem>>, vector<8x32xbf16>,
    } else {
    }
    %9 = arith.truncf %1 : vector<8x32xf32> to vector<8x32xbf16>
    %c0_8 = arith.constant 0 : index
    %c0_9 = arith.constant 0 : index
    %10 = vector.load %arg7[%c0_8, %c0_9] : memref<32x32xbf16, #tpu.memory_space<vmem>>, vector<32x32xbf16>
    %cst = arith.constant dense<0.000000e+00> : vector<8x32xf32>
    %11 = tpu.matmul %9, %10, %cst {dimension_numbers = #tpu.dot_dimension_numbers<[1], [0], [0], [1], [0, 0, 1, 1], [], []>} : vector<8x32xbf16>, vector<32x32xbf16>, vector<8x32xf32> -> vector<8x32xf32>
    %c0_10 = arith.constant 0 : index
    %c0_11 = arith.constant 0 : index
    %12 = vector.load %arg8[%c0_10, %c0_11] : memref<1x32xf32, #tpu.memory_space<vmem>>, vector<1x32xf32>
    %13 = vector.broadcast %12 : vector<1x32xf32> to vector<8x32xf32>
    %14 = arith.addf %11, %13 : vector<8x32xf32>
    %15 = vector.extract_strided_slice %14 {offsets = [0, 0], sizes = [8, 8], strides = [1, 1]} : vector<8x32xf32> to vector<8x8xf32>
    %16 = arith.truncf %15 : vector<8x8xf32> to vector<8x8xbf16>
    %c0_12 = arith.constant 0 : index
    %c0_13 = arith.constant 0 : index
    %17 = vector.load %arg34[%c0_12, %c0_13] : memref<8x32xbf16, #tpu.memory_space<vmem>>, vector<8x8xbf16>
    %c0_14 = arith.constant 0 : index
    %c0_15 = arith.constant 0 : index
    %18 = vector.load %arg35[%c0_14, %c0_15] : memref<8x32xbf16, #tpu.memory_space<vmem>>, vector<8x8xbf16>
    %cst_16 = arith.constant dense<0.000000e+00> : vector<8x8xf32>
    %19 = tpu.matmul %16, %17, %cst_16 {dimension_numbers = #tpu.dot_dimension_numbers<[1], [1], [0], [0], [0, 0, 1, 0], [], []>} : vector<8x8xbf16>, vector<8x8xbf16>, vector<8x8xf32> -> vector<8x8xf32>
    %20 = arith.addf %19, %3 : vector<8x8xf32>
    %cst_17 = arith.constant dense<0xFF800000> : vector<8xf32>
    %21 = vector.multi_reduction <maximumf>, %20, %cst_17 [1] : vector<8x8xf32> to vector<8xf32>
    %22 = vector.shape_cast %21 : vector<8xf32> to vector<8x1xf32>
    %23 = vector.broadcast %22 : vector<8x1xf32> to vector<8x8xf32>
    %24 = arith.subf %20, %23 : vector<8x8xf32>
    %25 = math.exp %24 : vector<8x8xf32>
    %cst_18 = arith.constant dense<0.000000e+00> : vector<8xf32>
    %26 = vector.multi_reduction <add>, %25, %cst_18 [1] : vector<8x8xf32> to vector<8xf32>
    %27 = vector.shape_cast %26 : vector<8xf32> to vector<8x1xf32>
    %28 = arith.truncf %25 : vector<8x8xf32> to vector<8x8xbf16>
    %cst_19 = arith.constant dense<0.000000e+00> : vector<8x8xf32>
    %29 = tpu.matmul %28, %18, %cst_19 {dimension_numbers = #tpu.dot_dimension_numbers<[1], [0], [0], [1], [0, 0, 1, 1], [], []>} : vector<8x8xbf16>, vector<8x8xbf16>, vector<8x8xf32> -> vector<8x8xf32>
    %30 = tpu.reciprocal %27 {approx = true} : vector<8x1xf32> -> vector<8x1xf32>
    %31 = vector.broadcast %30 : vector<8x1xf32> to vector<8x8xf32>
    %32 = arith.mulf %29, %31 : vector<8x8xf32>
    %33 = arith.truncf %32 : vector<8x8xf32> to vector<8x8xbf16>
    %c0_20 = arith.constant 0 : index
    %c0_21 = arith.constant 0 : index
    %34 = vector.load %arg38[%c0_20, %c0_21] : memref<8x32xbf16, #tpu.memory_space<vmem>>, vector<8x8xbf16>
    tpu.vector_store %arg38[%c0_20, %c0_21], %33 {strides = array<i32>} : memref<8x32xbf16, #tpu.memory_space<vmem>>, vector<8x8xbf16>,
    %35 = vector.extract_strided_slice %14 {offsets = [0, 8], sizes = [8, 8], strides = [1, 1]} : vector<8x32xf32> to vector<8x8xf32>
    %36 = arith.truncf %35 : vector<8x8xf32> to vector<8x8xbf16>
    %c0_22 = arith.constant 0 : index
    %c8 = arith.constant 8 : index
    %37 = vector.load %arg34[%c0_22, %c8] : memref<8x32xbf16, #tpu.memory_space<vmem>>, vector<8x8xbf16>
    %c0_23 = arith.constant 0 : index
    %c8_24 = arith.constant 8 : index
    %38 = vector.load %arg35[%c0_23, %c8_24] : memref<8x32xbf16, #tpu.memory_space<vmem>>, vector<8x8xbf16>
    %cst_25 = arith.constant dense<0.000000e+00> : vector<8x8xf32>
    %39 = tpu.matmul %36, %37, %cst_25 {dimension_numbers = #tpu.dot_dimension_numbers<[1], [1], [0], [0], [0, 0, 1, 0], [], []>} : vector<8x8xbf16>, vector<8x8xbf16>, vector<8x8xf32> -> vector<8x8xf32>
    %40 = arith.addf %39, %3 : vector<8x8xf32>
    %cst_26 = arith.constant dense<0xFF800000> : vector<8xf32>
    %41 = vector.multi_reduction <maximumf>, %40, %cst_26 [1] : vector<8x8xf32> to vector<8xf32>
    %42 = vector.shape_cast %41 : vector<8xf32> to vector<8x1xf32>
    %43 = vector.broadcast %42 : vector<8x1xf32> to vector<8x8xf32>
    %44 = arith.subf %40, %43 : vector<8x8xf32>
    %45 = math.exp %44 : vector<8x8xf32>
    %cst_27 = arith.constant dense<0.000000e+00> : vector<8xf32>
    %46 = vector.multi_reduction <add>, %45, %cst_27 [1] : vector<8x8xf32> to vector<8xf32>
    %47 = vector.shape_cast %46 : vector<8xf32> to vector<8x1xf32>
    %48 = arith.truncf %45 : vector<8x8xf32> to vector<8x8xbf16>
    %cst_28 = arith.constant dense<0.000000e+00> : vector<8x8xf32>
    %49 = tpu.matmul %48, %38, %cst_28 {dimension_numbers = #tpu.dot_dimension_numbers<[1], [0], [0], [1], [0, 0, 1, 1], [], []>} : vector<8x8xbf16>, vector<8x8xbf16>, vector<8x8xf32> -> vector<8x8xf32>
    %50 = tpu.reciprocal %47 {approx = true} : vector<8x1xf32> -> vector<8x1xf32>
    %51 = vector.broadcast %50 : vector<8x1xf32> to vector<8x8xf32>
    %52 = arith.mulf %49, %51 : vector<8x8xf32>
    %53 = arith.truncf %52 : vector<8x8xf32> to vector<8x8xbf16>
    %c0_29 = arith.constant 0 : index
    %c8_30 = arith.constant 8 : index
    %54 = vector.load %arg38[%c0_29, %c8_30] : memref<8x32xbf16, #tpu.memory_space<vmem>>, vector<8x8xbf16>
    tpu.vector_store %arg38[%c0_29, %c8_30], %53 {strides = array<i32>} : memref<8x32xbf16, #tpu.memory_space<vmem>>, vector<8x8xbf16>,
    %55 = vector.extract_strided_slice %14 {offsets = [0, 16], sizes = [8, 8], strides = [1, 1]} : vector<8x32xf32> to vector<8x8xf32>
    %56 = arith.truncf %55 : vector<8x8xf32> to vector<8x8xbf16>
    %c0_31 = arith.constant 0 : index
    %c16 = arith.constant 16 : index
    %57 = vector.load %arg34[%c0_31, %c16] : memref<8x32xbf16, #tpu.memory_space<vmem>>, vector<8x8xbf16>
    %c0_32 = arith.constant 0 : index
    %c16_33 = arith.constant 16 : index
    %58 = vector.load %arg35[%c0_32, %c16_33] : memref<8x32xbf16, #tpu.memory_space<vmem>>, vector<8x8xbf16>
    %cst_34 = arith.constant dense<0.000000e+00> : vector<8x8xf32>
    %59 = tpu.matmul %56, %57, %cst_34 {dimension_numbers = #tpu.dot_dimension_numbers<[1], [1], [0], [0], [0, 0, 1, 0], [], []>} : vector<8x8xbf16>, vector<8x8xbf16>, vector<8x8xf32> -> vector<8x8xf32>
    %60 = arith.addf %59, %3 : vector<8x8xf32>
    %cst_35 = arith.constant dense<0xFF800000> : vector<8xf32>
    %61 = vector.multi_reduction <maximumf>, %60, %cst_35 [1] : vector<8x8xf32> to vector<8xf32>
    %62 = vector.shape_cast %61 : vector<8xf32> to vector<8x1xf32>
    %63 = vector.broadcast %62 : vector<8x1xf32> to vector<8x8xf32>
    %64 = arith.subf %60, %63 : vector<8x8xf32>
    %65 = math.exp %64 : vector<8x8xf32>
    %cst_36 = arith.constant dense<0.000000e+00> : vector<8xf32>
    %66 = vector.multi_reduction <add>, %65, %cst_36 [1] : vector<8x8xf32> to vector<8xf32>
    %67 = vector.shape_cast %66 : vector<8xf32> to vector<8x1xf32>
    %68 = arith.truncf %65 : vector<8x8xf32> to vector<8x8xbf16>
    %cst_37 = arith.constant dense<0.000000e+00> : vector<8x8xf32>
    %69 = tpu.matmul %68, %58, %cst_37 {dimension_numbers = #tpu.dot_dimension_numbers<[1], [0], [0], [1], [0, 0, 1, 1], [], []>} : vector<8x8xbf16>, vector<8x8xbf16>, vector<8x8xf32> -> vector<8x8xf32>
    %70 = tpu.reciprocal %67 {approx = true} : vector<8x1xf32> -> vector<8x1xf32>
    %71 = vector.broadcast %70 : vector<8x1xf32> to vector<8x8xf32>
    %72 = arith.mulf %69, %71 : vector<8x8xf32>
    %73 = arith.truncf %72 : vector<8x8xf32> to vector<8x8xbf16>
    %c0_38 = arith.constant 0 : index
    %c16_39 = arith.constant 16 : index
    %74 = vector.load %arg38[%c0_38, %c16_39] : memref<8x32xbf16, #tpu.memory_space<vmem>>, vector<8x8xbf16>
    tpu.vector_store %arg38[%c0_38, %c16_39], %73 {strides = array<i32>} : memref<8x32xbf16, #tpu.memory_space<vmem>>, vector<8x8xbf16>,
    %75 = vector.extract_strided_slice %14 {offsets = [0, 24], sizes = [8, 8], strides = [1, 1]} : vector<8x32xf32> to vector<8x8xf32>
    %76 = arith.truncf %75 : vector<8x8xf32> to vector<8x8xbf16>
    %c0_40 = arith.constant 0 : index
    %c24 = arith.constant 24 : index
    %77 = vector.load %arg34[%c0_40, %c24] : memref<8x32xbf16, #tpu.memory_space<vmem>>, vector<8x8xbf16>
    %c0_41 = arith.constant 0 : index
    %c24_42 = arith.constant 24 : index
    %78 = vector.load %arg35[%c0_41, %c24_42] : memref<8x32xbf16, #tpu.memory_space<vmem>>, vector<8x8xbf16>
    %cst_43 = arith.constant dense<0.000000e+00> : vector<8x8xf32>
    %79 = tpu.matmul %76, %77, %cst_43 {dimension_numbers = #tpu.dot_dimension_numbers<[1], [1], [0], [0], [0, 0, 1, 0], [], []>} : vector<8x8xbf16>, vector<8x8xbf16>, vector<8x8xf32> -> vector<8x8xf32>
    %80 = arith.addf %79, %3 : vector<8x8xf32>
    %cst_44 = arith.constant dense<0xFF800000> : vector<8xf32>
    %81 = vector.multi_reduction <maximumf>, %80, %cst_44 [1] : vector<8x8xf32> to vector<8xf32>
    %82 = vector.shape_cast %81 : vector<8xf32> to vector<8x1xf32>
    %83 = vector.broadcast %82 : vector<8x1xf32> to vector<8x8xf32>
    %84 = arith.subf %80, %83 : vector<8x8xf32>
    %85 = math.exp %84 : vector<8x8xf32>
    %cst_45 = arith.constant dense<0.000000e+00> : vector<8xf32>
    %86 = vector.multi_reduction <add>, %85, %cst_45 [1] : vector<8x8xf32> to vector<8xf32>
    %87 = vector.shape_cast %86 : vector<8xf32> to vector<8x1xf32>
    %88 = arith.truncf %85 : vector<8x8xf32> to vector<8x8xbf16>
    %cst_46 = arith.constant dense<0.000000e+00> : vector<8x8xf32>
    %89 = tpu.matmul %88, %78, %cst_46 {dimension_numbers = #tpu.dot_dimension_numbers<[1], [0], [0], [1], [0, 0, 1, 1], [], []>} : vector<8x8xbf16>, vector<8x8xbf16>, vector<8x8xf32> -> vector<8x8xf32>
    %90 = tpu.reciprocal %87 {approx = true} : vector<8x1xf32> -> vector<8x1xf32>
    %91 = vector.broadcast %90 : vector<8x1xf32> to vector<8x8xf32>
    %92 = arith.mulf %89, %91 : vector<8x8xf32>
    %93 = arith.truncf %92 : vector<8x8xf32> to vector<8x8xbf16>
    %c0_47 = arith.constant 0 : index
    %c24_48 = arith.constant 24 : index
    %94 = vector.load %arg38[%c0_47, %c24_48] : memref<8x32xbf16, #tpu.memory_space<vmem>>, vector<8x8xbf16>
    tpu.vector_store %arg38[%c0_47, %c24_48], %93 {strides = array<i32>} : memref<8x32xbf16, #tpu.memory_space<vmem>>, vector<8x8xbf16>,
    %c0_49 = arith.constant 0 : index
    %c0_50 = arith.constant 0 : index
    %95 = vector.load %arg38[%c0_49, %c0_50] : memref<8x32xbf16, #tpu.memory_space<vmem>>, vector<8x32xbf16>
    %c0_51 = arith.constant 0 : index
    %c0_52 = arith.constant 0 : index
    %96 = vector.load %arg13[%c0_51, %c0_52] : memref<32x32xbf16, #tpu.memory_space<vmem>>, vector<32x32xbf16>
    %cst_53 = arith.constant dense<0.000000e+00> : vector<8x32xf32>
    %97 = tpu.matmul %95, %96, %cst_53 {dimension_numbers = #tpu.dot_dimension_numbers<[1], [0], [0], [1], [0, 0, 1, 1], [], []>} : vector<8x32xbf16>, vector<32x32xbf16>, vector<8x32xf32> -> vector<8x32xf32>
    %c0_54 = arith.constant 0 : index
    %c0_55 = arith.constant 0 : index
    %98 = vector.load %arg14[%c0_54, %c0_55] : memref<1x32xf32, #tpu.memory_space<vmem>>, vector<1x32xf32>
    %99 = vector.broadcast %98 : vector<1x32xf32> to vector<8x32xf32>
    %100 = arith.addf %97, %99 : vector<8x32xf32>
    %101 = arith.addf %1, %100 : vector<8x32xf32>
    %cst_56 = arith.constant dense<0.000000e+00> : vector<8xf32>
    %102 = vector.multi_reduction <add>, %101, %cst_56 [1] : vector<8x32xf32> to vector<8xf32>
    %103 = vector.shape_cast %102 : vector<8xf32> to vector<8x1xf32>
    %cst_57 = arith.constant 3.200000e+01 : f32
    %104 = vector.broadcast %cst_57 : f32 to vector<8x1xf32>
    %105 = arith.divf %103, %104 : vector<8x1xf32>
    %106 = vector.broadcast %105 : vector<8x1xf32> to vector<8x32xf32>
    %107 = arith.subf %101, %106 : vector<8x32xf32>
    %108 = arith.mulf %107, %107 : vector<8x32xf32>
    %cst_58 = arith.constant dense<0.000000e+00> : vector<8xf32>
    %109 = vector.multi_reduction <add>, %108, %cst_58 [1] : vector<8x32xf32> to vector<8xf32>
    %110 = vector.shape_cast %109 : vector<8xf32> to vector<8x1xf32>
    %cst_59 = arith.constant 3.200000e+01 : f32
    %111 = vector.broadcast %cst_59 : f32 to vector<8x1xf32>
    %112 = arith.divf %110, %111 : vector<8x1xf32>
    %113 = vector.broadcast %105 : vector<8x1xf32> to vector<8x32xf32>
    %114 = arith.subf %101, %113 : vector<8x32xf32>
    %cst_60 = arith.constant 9.99999974E-6 : f32
    %115 = vector.broadcast %cst_60 : f32 to vector<8x1xf32>
    %116 = arith.addf %112, %115 : vector<8x1xf32>
    %117 = math.rsqrt %116 : vector<8x1xf32>
    %118 = vector.broadcast %117 : vector<8x1xf32> to vector<8x32xf32>
    %119 = arith.mulf %114, %118 : vector<8x32xf32>
    %c0_61 = arith.constant 0 : index
    %c0_62 = arith.constant 0 : index
    %120 = vector.load %arg23[%c0_61, %c0_62] : memref<1x32xf32, #tpu.memory_space<vmem>>, vector<1x32xf32>
    %121 = vector.broadcast %120 : vector<1x32xf32> to vector<8x32xf32>
    %122 = arith.mulf %119, %121 : vector<8x32xf32>
    %c0_63 = arith.constant 0 : index
    %c0_64 = arith.constant 0 : index
    %123 = vector.load %arg24[%c0_63, %c0_64] : memref<1x32xf32, #tpu.memory_space<vmem>>, vector<1x32xf32>
    %124 = vector.broadcast %123 : vector<1x32xf32> to vector<8x32xf32>
    %125 = arith.addf %122, %124 : vector<8x32xf32>
    %126 = arith.truncf %125 : vector<8x32xf32> to vector<8x32xbf16>
    %c0_65 = arith.constant 0 : index
    %c0_66 = arith.constant 0 : index
    %127 = vector.load %arg15[%c0_65, %c0_66] : memref<32x32xbf16, #tpu.memory_space<vmem>>, vector<32x32xbf16>
    %cst_67 = arith.constant dense<0.000000e+00> : vector<8x32xf32>
    %128 = tpu.matmul %126, %127, %cst_67 {dimension_numbers = #tpu.dot_dimension_numbers<[1], [0], [0], [1], [0, 0, 1, 1], [], []>} : vector<8x32xbf16>, vector<32x32xbf16>, vector<8x32xf32> -> vector<8x32xf32>
    %c0_68 = arith.constant 0 : index
    %c0_69 = arith.constant 0 : index
    %129 = vector.load %arg16[%c0_68, %c0_69] : memref<1x32xf32, #tpu.memory_space<vmem>>, vector<1x32xf32>
    %130 = vector.broadcast %129 : vector<1x32xf32> to vector<8x32xf32>
    %131 = arith.addf %128, %130 : vector<8x32xf32>
    %132 = vector.extract_strided_slice %131 {offsets = [0, 0], sizes = [8, 8], strides = [1, 1]} : vector<8x32xf32> to vector<8x8xf32>
    %133 = arith.truncf %132 : vector<8x8xf32> to vector<8x8xbf16>
    %c0_70 = arith.constant 0 : index
    %c0_71 = arith.constant 0 : index
    %134 = vector.load %arg36[%c0_70, %c0_71] : memref<8x32xbf16, #tpu.memory_space<vmem>>, vector<8x8xbf16>
    %c0_72 = arith.constant 0 : index
    %c0_73 = arith.constant 0 : index
    %135 = vector.load %arg37[%c0_72, %c0_73] : memref<8x32xbf16, #tpu.memory_space<vmem>>, vector<8x8xbf16>
    %cst_74 = arith.constant dense<0.000000e+00> : vector<8x8xf32>
    %136 = tpu.matmul %133, %134, %cst_74 {dimension_numbers = #tpu.dot_dimension_numbers<[1], [1], [0], [0], [0, 0, 1, 0], [], []>} : vector<8x8xbf16>, vector<8x8xbf16>, vector<8x8xf32> -> vector<8x8xf32>
    %137 = vector.broadcast %5 : vector<1x8xf32> to vector<8x8xf32>
    %138 = arith.addf %136, %137 : vector<8x8xf32>
    %cst_75 = arith.constant dense<0xFF800000> : vector<8xf32>
    %139 = vector.multi_reduction <maximumf>, %138, %cst_75 [1] : vector<8x8xf32> to vector<8xf32>
    %140 = vector.shape_cast %139 : vector<8xf32> to vector<8x1xf32>
    %141 = vector.broadcast %140 : vector<8x1xf32> to vector<8x8xf32>
    %142 = arith.subf %138, %141 : vector<8x8xf32>
    %143 = math.exp %142 : vector<8x8xf32>
    %cst_76 = arith.constant dense<0.000000e+00> : vector<8xf32>
    %144 = vector.multi_reduction <add>, %143, %cst_76 [1] : vector<8x8xf32> to vector<8xf32>
    %145 = vector.shape_cast %144 : vector<8xf32> to vector<8x1xf32>
    %146 = arith.truncf %143 : vector<8x8xf32> to vector<8x8xbf16>
    %cst_77 = arith.constant dense<0.000000e+00> : vector<8x8xf32>
    %147 = tpu.matmul %146, %135, %cst_77 {dimension_numbers = #tpu.dot_dimension_numbers<[1], [0], [0], [1], [0, 0, 1, 1], [], []>} : vector<8x8xbf16>, vector<8x8xbf16>, vector<8x8xf32> -> vector<8x8xf32>
    %148 = tpu.reciprocal %145 {approx = true} : vector<8x1xf32> -> vector<8x1xf32>
    %149 = vector.broadcast %148 : vector<8x1xf32> to vector<8x8xf32>
    %150 = arith.mulf %147, %149 : vector<8x8xf32>
    %151 = arith.truncf %150 : vector<8x8xf32> to vector<8x8xbf16>
    %c0_78 = arith.constant 0 : index
    %c0_79 = arith.constant 0 : index
    %152 = vector.load %arg38[%c0_78, %c0_79] : memref<8x32xbf16, #tpu.memory_space<vmem>>, vector<8x8xbf16>
    tpu.vector_store %arg38[%c0_78, %c0_79], %151 {strides = array<i32>} : memref<8x32xbf16, #tpu.memory_space<vmem>>, vector<8x8xbf16>,
    %153 = vector.extract_strided_slice %131 {offsets = [0, 8], sizes = [8, 8], strides = [1, 1]} : vector<8x32xf32> to vector<8x8xf32>
    %154 = arith.truncf %153 : vector<8x8xf32> to vector<8x8xbf16>
    %c0_80 = arith.constant 0 : index
    %c8_81 = arith.constant 8 : index
    %155 = vector.load %arg36[%c0_80, %c8_81] : memref<8x32xbf16, #tpu.memory_space<vmem>>, vector<8x8xbf16>
    %c0_82 = arith.constant 0 : index
    %c8_83 = arith.constant 8 : index
    %156 = vector.load %arg37[%c0_82, %c8_83] : memref<8x32xbf16, #tpu.memory_space<vmem>>, vector<8x8xbf16>
    %cst_84 = arith.constant dense<0.000000e+00> : vector<8x8xf32>
    %157 = tpu.matmul %154, %155, %cst_84 {dimension_numbers = #tpu.dot_dimension_numbers<[1], [1], [0], [0], [0, 0, 1, 0], [], []>} : vector<8x8xbf16>, vector<8x8xbf16>, vector<8x8xf32> -> vector<8x8xf32>
    %158 = vector.broadcast %5 : vector<1x8xf32> to vector<8x8xf32>
    %159 = arith.addf %157, %158 : vector<8x8xf32>
    %cst_85 = arith.constant dense<0xFF800000> : vector<8xf32>
    %160 = vector.multi_reduction <maximumf>, %159, %cst_85 [1] : vector<8x8xf32> to vector<8xf32>
    %161 = vector.shape_cast %160 : vector<8xf32> to vector<8x1xf32>
    %162 = vector.broadcast %161 : vector<8x1xf32> to vector<8x8xf32>
    %163 = arith.subf %159, %162 : vector<8x8xf32>
    %164 = math.exp %163 : vector<8x8xf32>
    %cst_86 = arith.constant dense<0.000000e+00> : vector<8xf32>
    %165 = vector.multi_reduction <add>, %164, %cst_86 [1] : vector<8x8xf32> to vector<8xf32>
    %166 = vector.shape_cast %165 : vector<8xf32> to vector<8x1xf32>
    %167 = arith.truncf %164 : vector<8x8xf32> to vector<8x8xbf16>
    %cst_87 = arith.constant dense<0.000000e+00> : vector<8x8xf32>
    %168 = tpu.matmul %167, %156, %cst_87 {dimension_numbers = #tpu.dot_dimension_numbers<[1], [0], [0], [1], [0, 0, 1, 1], [], []>} : vector<8x8xbf16>, vector<8x8xbf16>, vector<8x8xf32> -> vector<8x8xf32>
    %169 = tpu.reciprocal %166 {approx = true} : vector<8x1xf32> -> vector<8x1xf32>
    %170 = vector.broadcast %169 : vector<8x1xf32> to vector<8x8xf32>
    %171 = arith.mulf %168, %170 : vector<8x8xf32>
    %172 = arith.truncf %171 : vector<8x8xf32> to vector<8x8xbf16>
    %c0_88 = arith.constant 0 : index
    %c8_89 = arith.constant 8 : index
    %173 = vector.load %arg38[%c0_88, %c8_89] : memref<8x32xbf16, #tpu.memory_space<vmem>>, vector<8x8xbf16>
    tpu.vector_store %arg38[%c0_88, %c8_89], %172 {strides = array<i32>} : memref<8x32xbf16, #tpu.memory_space<vmem>>, vector<8x8xbf16>,
    %174 = vector.extract_strided_slice %131 {offsets = [0, 16], sizes = [8, 8], strides = [1, 1]} : vector<8x32xf32> to vector<8x8xf32>
    %175 = arith.truncf %174 : vector<8x8xf32> to vector<8x8xbf16>
    %c0_90 = arith.constant 0 : index
    %c16_91 = arith.constant 16 : index
    %176 = vector.load %arg36[%c0_90, %c16_91] : memref<8x32xbf16, #tpu.memory_space<vmem>>, vector<8x8xbf16>
    %c0_92 = arith.constant 0 : index
    %c16_93 = arith.constant 16 : index
    %177 = vector.load %arg37[%c0_92, %c16_93] : memref<8x32xbf16, #tpu.memory_space<vmem>>, vector<8x8xbf16>
    %cst_94 = arith.constant dense<0.000000e+00> : vector<8x8xf32>
    %178 = tpu.matmul %175, %176, %cst_94 {dimension_numbers = #tpu.dot_dimension_numbers<[1], [1], [0], [0], [0, 0, 1, 0], [], []>} : vector<8x8xbf16>, vector<8x8xbf16>, vector<8x8xf32> -> vector<8x8xf32>
    %179 = vector.broadcast %5 : vector<1x8xf32> to vector<8x8xf32>
    %180 = arith.addf %178, %179 : vector<8x8xf32>
    %cst_95 = arith.constant dense<0xFF800000> : vector<8xf32>
    %181 = vector.multi_reduction <maximumf>, %180, %cst_95 [1] : vector<8x8xf32> to vector<8xf32>
    %182 = vector.shape_cast %181 : vector<8xf32> to vector<8x1xf32>
    %183 = vector.broadcast %182 : vector<8x1xf32> to vector<8x8xf32>
    %184 = arith.subf %180, %183 : vector<8x8xf32>
    %185 = math.exp %184 : vector<8x8xf32>
    %cst_96 = arith.constant dense<0.000000e+00> : vector<8xf32>
    %186 = vector.multi_reduction <add>, %185, %cst_96 [1] : vector<8x8xf32> to vector<8xf32>
    %187 = vector.shape_cast %186 : vector<8xf32> to vector<8x1xf32>
    %188 = arith.truncf %185 : vector<8x8xf32> to vector<8x8xbf16>
    %cst_97 = arith.constant dense<0.000000e+00> : vector<8x8xf32>
    %189 = tpu.matmul %188, %177, %cst_97 {dimension_numbers = #tpu.dot_dimension_numbers<[1], [0], [0], [1], [0, 0, 1, 1], [], []>} : vector<8x8xbf16>, vector<8x8xbf16>, vector<8x8xf32> -> vector<8x8xf32>
    %190 = tpu.reciprocal %187 {approx = true} : vector<8x1xf32> -> vector<8x1xf32>
    %191 = vector.broadcast %190 : vector<8x1xf32> to vector<8x8xf32>
    %192 = arith.mulf %189, %191 : vector<8x8xf32>
    %193 = arith.truncf %192 : vector<8x8xf32> to vector<8x8xbf16>
    %c0_98 = arith.constant 0 : index
    %c16_99 = arith.constant 16 : index
    %194 = vector.load %arg38[%c0_98, %c16_99] : memref<8x32xbf16, #tpu.memory_space<vmem>>, vector<8x8xbf16>
    tpu.vector_store %arg38[%c0_98, %c16_99], %193 {strides = array<i32>} : memref<8x32xbf16, #tpu.memory_space<vmem>>, vector<8x8xbf16>,
    %195 = vector.extract_strided_slice %131 {offsets = [0, 24], sizes = [8, 8], strides = [1, 1]} : vector<8x32xf32> to vector<8x8xf32>
    %196 = arith.truncf %195 : vector<8x8xf32> to vector<8x8xbf16>
    %c0_100 = arith.constant 0 : index
    %c24_101 = arith.constant 24 : index
    %197 = vector.load %arg36[%c0_100, %c24_101] : memref<8x32xbf16, #tpu.memory_space<vmem>>, vector<8x8xbf16>
    %c0_102 = arith.constant 0 : index
    %c24_103 = arith.constant 24 : index
    %198 = vector.load %arg37[%c0_102, %c24_103] : memref<8x32xbf16, #tpu.memory_space<vmem>>, vector<8x8xbf16>
    %cst_104 = arith.constant dense<0.000000e+00> : vector<8x8xf32>
    %199 = tpu.matmul %196, %197, %cst_104 {dimension_numbers = #tpu.dot_dimension_numbers<[1], [1], [0], [0], [0, 0, 1, 0], [], []>} : vector<8x8xbf16>, vector<8x8xbf16>, vector<8x8xf32> -> vector<8x8xf32>
    %200 = vector.broadcast %5 : vector<1x8xf32> to vector<8x8xf32>
    %201 = arith.addf %199, %200 : vector<8x8xf32>
    %cst_105 = arith.constant dense<0xFF800000> : vector<8xf32>
    %202 = vector.multi_reduction <maximumf>, %201, %cst_105 [1] : vector<8x8xf32> to vector<8xf32>
    %203 = vector.shape_cast %202 : vector<8xf32> to vector<8x1xf32>
    %204 = vector.broadcast %203 : vector<8x1xf32> to vector<8x8xf32>
    %205 = arith.subf %201, %204 : vector<8x8xf32>
    %206 = math.exp %205 : vector<8x8xf32>
    %cst_106 = arith.constant dense<0.000000e+00> : vector<8xf32>
    %207 = vector.multi_reduction <add>, %206, %cst_106 [1] : vector<8x8xf32> to vector<8xf32>
    %208 = vector.shape_cast %207 : vector<8xf32> to vector<8x1xf32>
    %209 = arith.truncf %206 : vector<8x8xf32> to vector<8x8xbf16>
    %cst_107 = arith.constant dense<0.000000e+00> : vector<8x8xf32>
    %210 = tpu.matmul %209, %198, %cst_107 {dimension_numbers = #tpu.dot_dimension_numbers<[1], [0], [0], [1], [0, 0, 1, 1], [], []>} : vector<8x8xbf16>, vector<8x8xbf16>, vector<8x8xf32> -> vector<8x8xf32>
    %211 = tpu.reciprocal %208 {approx = true} : vector<8x1xf32> -> vector<8x1xf32>
    %212 = vector.broadcast %211 : vector<8x1xf32> to vector<8x8xf32>
    %213 = arith.mulf %210, %212 : vector<8x8xf32>
    %214 = arith.truncf %213 : vector<8x8xf32> to vector<8x8xbf16>
    %c0_108 = arith.constant 0 : index
    %c24_109 = arith.constant 24 : index
    %215 = vector.load %arg38[%c0_108, %c24_109] : memref<8x32xbf16, #tpu.memory_space<vmem>>, vector<8x8xbf16>
    tpu.vector_store %arg38[%c0_108, %c24_109], %214 {strides = array<i32>} : memref<8x32xbf16, #tpu.memory_space<vmem>>, vector<8x8xbf16>,
    %c0_110 = arith.constant 0 : index
    %c0_111 = arith.constant 0 : index
    %216 = vector.load %arg38[%c0_110, %c0_111] : memref<8x32xbf16, #tpu.memory_space<vmem>>, vector<8x32xbf16>
    %c0_112 = arith.constant 0 : index
    %c0_113 = arith.constant 0 : index
    %217 = vector.load %arg21[%c0_112, %c0_113] : memref<32x32xbf16, #tpu.memory_space<vmem>>, vector<32x32xbf16>
    %cst_114 = arith.constant dense<0.000000e+00> : vector<8x32xf32>
    %218 = tpu.matmul %216, %217, %cst_114 {dimension_numbers = #tpu.dot_dimension_numbers<[1], [0], [0], [1], [0, 0, 1, 1], [], []>} : vector<8x32xbf16>, vector<32x32xbf16>, vector<8x32xf32> -> vector<8x32xf32>
    %c0_115 = arith.constant 0 : index
    %c0_116 = arith.constant 0 : index
    %219 = vector.load %arg22[%c0_115, %c0_116] : memref<1x32xf32, #tpu.memory_space<vmem>>, vector<1x32xf32>
    %220 = vector.broadcast %219 : vector<1x32xf32> to vector<8x32xf32>
    %221 = arith.addf %218, %220 : vector<8x32xf32>
    %222 = arith.addf %125, %221 : vector<8x32xf32>
    %cst_117 = arith.constant dense<0.000000e+00> : vector<8xf32>
    %223 = vector.multi_reduction <add>, %222, %cst_117 [1] : vector<8x32xf32> to vector<8xf32>
    %224 = vector.shape_cast %223 : vector<8xf32> to vector<8x1xf32>
    %cst_118 = arith.constant 3.200000e+01 : f32
    %225 = vector.broadcast %cst_118 : f32 to vector<8x1xf32>
    %226 = arith.divf %224, %225 : vector<8x1xf32>
    %227 = vector.broadcast %226 : vector<8x1xf32> to vector<8x32xf32>
    %228 = arith.subf %222, %227 : vector<8x32xf32>
    %229 = arith.mulf %228, %228 : vector<8x32xf32>
    %cst_119 = arith.constant dense<0.000000e+00> : vector<8xf32>
    %230 = vector.multi_reduction <add>, %229, %cst_119 [1] : vector<8x32xf32> to vector<8xf32>
    %231 = vector.shape_cast %230 : vector<8xf32> to vector<8x1xf32>
    %cst_120 = arith.constant 3.200000e+01 : f32
    %232 = vector.broadcast %cst_120 : f32 to vector<8x1xf32>
    %233 = arith.divf %231, %232 : vector<8x1xf32>
    %234 = vector.broadcast %226 : vector<8x1xf32> to vector<8x32xf32>
    %235 = arith.subf %222, %234 : vector<8x32xf32>
    %cst_121 = arith.constant 9.99999974E-6 : f32
    %236 = vector.broadcast %cst_121 : f32 to vector<8x1xf32>
    %237 = arith.addf %233, %236 : vector<8x1xf32>
    %238 = math.rsqrt %237 : vector<8x1xf32>
    %239 = vector.broadcast %238 : vector<8x1xf32> to vector<8x32xf32>
    %240 = arith.mulf %235, %239 : vector<8x32xf32>
    %c0_122 = arith.constant 0 : index
    %c0_123 = arith.constant 0 : index
    %241 = vector.load %arg25[%c0_122, %c0_123] : memref<1x32xf32, #tpu.memory_space<vmem>>, vector<1x32xf32>
    %242 = vector.broadcast %241 : vector<1x32xf32> to vector<8x32xf32>
    %243 = arith.mulf %240, %242 : vector<8x32xf32>
    %c0_124 = arith.constant 0 : index
    %c0_125 = arith.constant 0 : index
    %244 = vector.load %arg26[%c0_124, %c0_125] : memref<1x32xf32, #tpu.memory_space<vmem>>, vector<1x32xf32>
    %245 = vector.broadcast %244 : vector<1x32xf32> to vector<8x32xf32>
    %246 = arith.addf %243, %245 : vector<8x32xf32>
    %247 = arith.truncf %246 : vector<8x32xf32> to vector<8x32xbf16>
    %cst_126 = arith.constant 0.000000e+00 : f32
    %248 = vector.broadcast %cst_126 : f32 to vector<8x32xf32>
    %c0_127 = arith.constant 0 : index
    %c0_128 = arith.constant 0 : index
    %249 = vector.load %arg29[%c0_127, %c0_128] : memref<32x64xbf16, #tpu.memory_space<vmem>>, vector<32x64xbf16>
    %cst_129 = arith.constant dense<0.000000e+00> : vector<8x64xf32>
    %250 = tpu.matmul %247, %249, %cst_129 {dimension_numbers = #tpu.dot_dimension_numbers<[1], [0], [0], [1], [0, 0, 1, 1], [], []>} : vector<8x32xbf16>, vector<32x64xbf16>, vector<8x64xf32> -> vector<8x64xf32>
    %c0_130 = arith.constant 0 : index
    %c0_131 = arith.constant 0 : index
    %251 = vector.load %arg30[%c0_130, %c0_131] : memref<1x64xf32, #tpu.memory_space<vmem>>, vector<1x64xf32>
    %252 = vector.broadcast %251 : vector<1x64xf32> to vector<8x64xf32>
    %253 = arith.addf %250, %252 : vector<8x64xf32>
    %cst_132 = arith.constant 0.000000e+00 : f32
    %254 = vector.broadcast %cst_132 : f32 to vector<8x64xf32>
    %255 = arith.maximumf %253, %254 : vector<8x64xf32>
    %256 = arith.truncf %255 : vector<8x64xf32> to vector<8x64xbf16>
    %c0_133 = arith.constant 0 : index
    %c0_134 = arith.constant 0 : index
    %257 = vector.load %arg31[%c0_133, %c0_134] : memref<64x32xbf16, #tpu.memory_space<vmem>>, vector<64x32xbf16>
    %cst_135 = arith.constant dense<0.000000e+00> : vector<8x32xf32>
    %258 = tpu.matmul %256, %257, %cst_135 {dimension_numbers = #tpu.dot_dimension_numbers<[1], [0], [0], [1], [0, 0, 1, 1], [], []>} : vector<8x64xbf16>, vector<64x32xbf16>, vector<8x32xf32> -> vector<8x32xf32>
    %259 = arith.addf %248, %258 : vector<8x32xf32>
    %260 = arith.addf %246, %259 : vector<8x32xf32>
    %c0_136 = arith.constant 0 : index
    %c0_137 = arith.constant 0 : index
    %261 = vector.load %arg32[%c0_136, %c0_137] : memref<1x32xf32, #tpu.memory_space<vmem>>, vector<1x32xf32>
    %262 = vector.broadcast %261 : vector<1x32xf32> to vector<8x32xf32>
    %263 = arith.addf %260, %262 : vector<8x32xf32>
    %cst_138 = arith.constant dense<0.000000e+00> : vector<8xf32>
    %264 = vector.multi_reduction <add>, %263, %cst_138 [1] : vector<8x32xf32> to vector<8xf32>
    %265 = vector.shape_cast %264 : vector<8xf32> to vector<8x1xf32>
    %cst_139 = arith.constant 3.200000e+01 : f32
    %266 = vector.broadcast %cst_139 : f32 to vector<8x1xf32>
    %267 = arith.divf %265, %266 : vector<8x1xf32>
    %268 = vector.broadcast %267 : vector<8x1xf32> to vector<8x32xf32>
    %269 = arith.subf %263, %268 : vector<8x32xf32>
    %270 = arith.mulf %269, %269 : vector<8x32xf32>
    %cst_140 = arith.constant dense<0.000000e+00> : vector<8xf32>
    %271 = vector.multi_reduction <add>, %270, %cst_140 [1] : vector<8x32xf32> to vector<8xf32>
    %272 = vector.shape_cast %271 : vector<8xf32> to vector<8x1xf32>
    %cst_141 = arith.constant 3.200000e+01 : f32
    %273 = vector.broadcast %cst_141 : f32 to vector<8x1xf32>
    %274 = arith.divf %272, %273 : vector<8x1xf32>
    %275 = vector.broadcast %267 : vector<8x1xf32> to vector<8x32xf32>
    %276 = arith.subf %263, %275 : vector<8x32xf32>
    %cst_142 = arith.constant 9.99999974E-6 : f32
    %277 = vector.broadcast %cst_142 : f32 to vector<8x1xf32>
    %278 = arith.addf %274, %277 : vector<8x1xf32>
    %279 = math.rsqrt %278 : vector<8x1xf32>
    %280 = vector.broadcast %279 : vector<8x1xf32> to vector<8x32xf32>
    %281 = arith.mulf %276, %280 : vector<8x32xf32>
    %c0_143 = arith.constant 0 : index
    %c0_144 = arith.constant 0 : index
    %282 = vector.load %arg27[%c0_143, %c0_144] : memref<1x32xf32, #tpu.memory_space<vmem>>, vector<1x32xf32>
    %283 = vector.broadcast %282 : vector<1x32xf32> to vector<8x32xf32>
    %284 = arith.mulf %281, %283 : vector<8x32xf32>
    %c0_145 = arith.constant 0 : index
    %c0_146 = arith.constant 0 : index
    %285 = vector.load %arg28[%c0_145, %c0_146] : memref<1x32xf32, #tpu.memory_space<vmem>>, vector<1x32xf32>
    %286 = vector.broadcast %285 : vector<1x32xf32> to vector<8x32xf32>
    %287 = arith.addf %284, %286 : vector<8x32xf32>
    %c0_147 = arith.constant 0 : index
    %c0_148 = arith.constant 0 : index
    %c0_149 = arith.constant 0 : index
    %288 = vector.load %arg33[%c0_147, %c0_148, %c0_149] : memref<1x8x32xf32, #tpu.memory_space<vmem>>, vector<1x8x32xf32>
    %289 = vector.shape_cast %288 : vector<1x8x32xf32> to vector<8x32xf32>
    %290 = vector.shape_cast %287 : vector<8x32xf32> to vector<1x8x32xf32>
    tpu.vector_store %arg33[%c0_147, %c0_148, %c0_149], %290 {strides = array<i32>} : memref<1x8x32xf32, #tpu.memory_space<vmem>>, vector<1x8x32xf32>,
    return
  }
  func.func @transform_0(%arg0: i32, %arg1: i32) -> (i32, i32, i32) {
    %c0_i32 = arith.constant 0 : i32
    %c0_i32_0 = arith.constant 0 : i32
    %c0_i32_1 = arith.constant 0 : i32
    return %arg0, %c0_i32, %c0_i32_0 : i32, i32, i32
  }
  func.func @transform_1(%arg0: i32, %arg1: i32) -> (i32, i32, i32) {
    %c0_i32 = arith.constant 0 : i32
    %c0_i32_0 = arith.constant 0 : i32
    return %arg0, %arg1, %c0_i32 : i32, i32, i32
  }
  func.func @transform_2(%arg0: i32, %arg1: i32) -> (i32, i32, i32) {
    %c0_i32 = arith.constant 0 : i32
    %c0_i32_0 = arith.constant 0 : i32
    %c0_i32_1 = arith.constant 0 : i32
    return %arg0, %c0_i32, %c0_i32_0 : i32, i32, i32
  }
  func.func @transform_3(%arg0: i32, %arg1: i32) -> (i32, i32) {
    %c0_i32 = arith.constant 0 : i32
    %c0_i32_0 = arith.constant 0 : i32
    return %arg1, %c0_i32 : i32, i32
  }
  func.func @transform_4(%arg0: i32, %arg1: i32) -> (i32, i32, i32) {
    %c0_i32 = arith.constant 0 : i32
    %c0_i32_0 = arith.constant 0 : i32
    %c0_i32_1 = arith.constant 0 : i32
    return %arg0, %c0_i32, %c0_i32_0 : i32, i32, i32
  }
  func.func @transform_5(%arg0: i32, %arg1: i32) -> (i32, i32) {
    %c0_i32 = arith.constant 0 : i32
    %c0_i32_0 = arith.constant 0 : i32
    %c0_i32_1 = arith.constant 0 : i32
    return %c0_i32, %c0_i32_0 : i32, i32
  }
  func.func @transform_6(%arg0: i32, %arg1: i32) -> (i32, i32) {
    %c0_i32 = arith.constant 0 : i32
    %c0_i32_0 = arith.constant 0 : i32
    %c0_i32_1 = arith.constant 0 : i32
    return %c0_i32, %c0_i32_0 : i32, i32
  }
  func.func @transform_7(%arg0: i32, %arg1: i32) -> (i32, i32) {
    %c0_i32 = arith.constant 0 : i32
    %c0_i32_0 = arith.constant 0 : i32
    %c0_i32_1 = arith.constant 0 : i32
    return %c0_i32, %c0_i32_0 : i32, i32
  }
  func.func @transform_8(%arg0: i32, %arg1: i32) -> (i32, i32) {
    %c0_i32 = arith.constant 0 : i32
    %c0_i32_0 = arith.constant 0 : i32
    %c0_i32_1 = arith.constant 0 : i32
    return %c0_i32, %c0_i32_0 : i32, i32
  }
  func.func @transform_9(%arg0: i32, %arg1: i32) -> (i32, i32) {
    %c0_i32 = arith.constant 0 : i32
    %c0_i32_0 = arith.constant 0 : i32
    %c0_i32_1 = arith.constant 0 : i32
    return %c0_i32, %c0_i32_0 : i32, i32
  }
  func.func @transform_10(%arg0: i32, %arg1: i32) -> (i32, i32) {
    %c0_i32 = arith.constant 0 : i32
    %c0_i32_0 = arith.constant 0 : i32
    %c0_i32_1 = arith.constant 0 : i32
    return %c0_i32, %c0_i32_0 : i32, i32
  }
  func.func @transform_11(%arg0: i32, %arg1: i32) -> (i32, i32) {
    %c0_i32 = arith.constant 0 : i32
    %c0_i32_0 = arith.constant 0 : i32
    %c0_i32_1 = arith.constant 0 : i32
    return %c0_i32, %c0_i32_0 : i32, i32
  }
  func.func @transform_12(%arg0: i32, %arg1: i32) -> (i32, i32) {
    %c0_i32 = arith.constant 0 : i32
    %c0_i32_0 = arith.constant 0 : i32
    %c0_i32_1 = arith.constant 0 : i32
    return %c0_i32, %c0_i32_0 : i32, i32
  }
  func.func @transform_13(%arg0: i32, %arg1: i32) -> (i32, i32) {
    %c0_i32 = arith.constant 0 : i32
    %c0_i32_0 = arith.constant 0 : i32
    %c0_i32_1 = arith.constant 0 : i32
    return %c0_i32, %c0_i32_0 : i32, i32
  }
  func.func @transform_14(%arg0: i32, %arg1: i32) -> (i32, i32) {
    %c0_i32 = arith.constant 0 : i32
    %c0_i32_0 = arith.constant 0 : i32
    %c0_i32_1 = arith.constant 0 : i32
    return %c0_i32, %c0_i32_0 : i32, i32
  }
  func.func @transform_15(%arg0: i32, %arg1: i32) -> (i32, i32) {
    %c0_i32 = arith.constant 0 : i32
    %c0_i32_0 = arith.constant 0 : i32
    %c0_i32_1 = arith.constant 0 : i32
    return %c0_i32, %c0_i32_0 : i32, i32
  }
  func.func @transform_16(%arg0: i32, %arg1: i32) -> (i32, i32) {
    %c0_i32 = arith.constant 0 : i32
    %c0_i32_0 = arith.constant 0 : i32
    %c0_i32_1 = arith.constant 0 : i32
    return %c0_i32, %c0_i32_0 : i32, i32
  }
  func.func @transform_17(%arg0: i32, %arg1: i32) -> (i32, i32) {
    %c0_i32 = arith.constant 0 : i32
    %c0_i32_0 = arith.constant 0 : i32
    %c0_i32_1 = arith.constant 0 : i32
    return %c0_i32, %c0_i32_0 : i32, i32
  }
  func.func @transform_18(%arg0: i32, %arg1: i32) -> (i32, i32) {
    %c0_i32 = arith.constant 0 : i32
    %c0_i32_0 = arith.constant 0 : i32
    %c0_i32_1 = arith.constant 0 : i32
    return %c0_i32, %c0_i32_0 : i32, i32
  }
  func.func @transform_19(%arg0: i32, %arg1: i32) -> (i32, i32) {
    %c0_i32 = arith.constant 0 : i32
    %c0_i32_0 = arith.constant 0 : i32
    %c0_i32_1 = arith.constant 0 : i32
    return %c0_i32, %c0_i32_0 : i32, i32
  }
  func.func @transform_20(%arg0: i32, %arg1: i32) -> (i32, i32) {
    %c0_i32 = arith.constant 0 : i32
    %c0_i32_0 = arith.constant 0 : i32
    %c0_i32_1 = arith.constant 0 : i32
    return %c0_i32, %c0_i32_0 : i32, i32
  }
  func.func @transform_21(%arg0: i32, %arg1: i32) -> (i32, i32) {
    %c0_i32 = arith.constant 0 : i32
    %c0_i32_0 = arith.constant 0 : i32
    %c0_i32_1 = arith.constant 0 : i32
    return %c0_i32, %c0_i32_0 : i32, i32
  }
  func.func @transform_22(%arg0: i32, %arg1: i32) -> (i32, i32) {
    %c0_i32 = arith.constant 0 : i32
    %c0_i32_0 = arith.constant 0 : i32
    %c0_i32_1 = arith.constant 0 : i32
    return %c0_i32, %c0_i32_0 : i32, i32
  }
  func.func @transform_23(%arg0: i32, %arg1: i32) -> (i32, i32) {
    %c0_i32 = arith.constant 0 : i32
    %c0_i32_0 = arith.constant 0 : i32
    %c0_i32_1 = arith.constant 0 : i32
    return %c0_i32, %c0_i32_0 : i32, i32
  }
  func.func @transform_24(%arg0: i32, %arg1: i32) -> (i32, i32) {
    %c0_i32 = arith.constant 0 : i32
    %c0_i32_0 = arith.constant 0 : i32
    %c0_i32_1 = arith.constant 0 : i32
    return %c0_i32, %c0_i32_0 : i32, i32
  }
  func.func @transform_25(%arg0: i32, %arg1: i32) -> (i32, i32) {
    %c0_i32 = arith.constant 0 : i32
    %c0_i32_0 = arith.constant 0 : i32
    %c0_i32_1 = arith.constant 0 : i32
    return %c0_i32, %c0_i32_0 : i32, i32
  }
  func.func @transform_26(%arg0: i32, %arg1: i32) -> (i32, i32) {
    %c0_i32 = arith.constant 0 : i32
    %c0_i32_0 = arith.constant 0 : i32
    %c0_i32_1 = arith.constant 0 : i32
    return %c0_i32, %c0_i32_0 : i32, i32
  }
  func.func @transform_27(%arg0: i32, %arg1: i32) -> (i32, i32) {
    %c0_i32 = arith.constant 0 : i32
    %c0_i32_0 = arith.constant 0 : i32
    %c0_i32_1 = arith.constant 0 : i32
    return %c0_i32, %c0_i32_0 : i32, i32
  }
  func.func @transform_28(%arg0: i32, %arg1: i32) -> (i32, i32) {
    %c0_i32 = arith.constant 0 : i32
    %c0_i32_0 = arith.constant 0 : i32
    %c0_i32_1 = arith.constant 0 : i32
    return %c0_i32, %c0_i32_0 : i32, i32
  }
  func.func @transform_29(%arg0: i32, %arg1: i32) -> (i32, i32) {
    %c0_i32 = arith.constant 0 : i32
    %c0_i32_0 = arith.constant 0 : i32
    %c0_i32_1 = arith.constant 0 : i32
    return %c0_i32, %c0_i32_0 : i32, i32
  }
  func.func @transform_30(%arg0: i32, %arg1: i32) -> (i32, i32) {
    %c0_i32 = arith.constant 0 : i32
    %c0_i32_0 = arith.constant 0 : i32
    %c0_i32_1 = arith.constant 0 : i32
    return %c0_i32, %c0_i32_0 : i32, i32
  }
  func.func @transform_31(%arg0: i32, %arg1: i32) -> (i32, i32, i32) {
    %c0_i32 = arith.constant 0 : i32
    %c0_i32_0 = arith.constant 0 : i32
    return %arg0, %arg1, %c0_i32 : i32, i32, i32
  }
}

</mosaic_0001>

<bundles_post_ra>
// kernel: tpu_custom_call.1
= control target key start
LH: loop header
LB: loop body
LE: loop exit
PB: predicated region body
PF: predicated region fallthrough
CT: control target
= control target key end

     0   :  { %s5578_s6 = smov 1   ;;  %s5579_s10 = smov 2   ;;  %s6676_s0 = inlined_call_operand.smem [shape: u32[32], index: -1, kind: input, shape index: {}] }
   0x1   :  { %s5659_s5 = sld [smem:[%s6676_s0]]   ;;  %s5580_s14 = smov 3  }
   0x2   :  { %s5664_s9 = sld [smem:[%s6676_s0 + %s5578_s6]]   ;;  %s5581_s18 = smov 4  }
   0x3   :  { %s5669_s13 = sld [smem:[%s6676_s0 + %s5579_s10]]   ;;  %s5582_s22 = smov 5  }
   0x4   :  { %s5674_s17 = sld [smem:[%s6676_s0 + %s5580_s14]]   ;;  %s5583_s26 = smov 6  }
   0x5   :  { %s5679_s21 = sld [smem:[%s6676_s0 + %s5581_s18]]   ;;  %s5584_s30 = smov 7  }
   0x6   :  { %s5684_s25 = sld [smem:[%s6676_s0 + %s5582_s22]]   ;;  %s5585_s4 = smov 8  }
   0x7   :  { %6734 = sst [smem:[#allocation74_spill]] %s5659_s5  ;;  %s5586_s10 = smov 9  }
   0x8   :  { %6735 = sst [smem:[#allocation75_spill]] %s5664_s9  ;;  %s5587_s15 = smov 10  }
   0x9   :  { %6736 = sst [smem:[#allocation76_spill]] %s5669_s13  ;;  %s5588_s20 = smov 11  }
   0xa   :  { %6737 = sst [smem:[#allocation77_spill]] %s5674_s17  ;;  %s5590_s1 = smov 13  }
   0xb   :  { %6738 = sst [smem:[#allocation78_spill]] %s5679_s21  ;;  %s5591_s7 = smov 14  }
   0xc   :  { %6739 = sst [smem:[#allocation79_spill]] %s5684_s25  ;;  %s5593_s22 = smov 16  }
   0xd   :  { %s5689_s29 = sld [smem:[%s6676_s0 + %s5583_s26]]   ;;  %s5589_s26 = smov 12  }
   0xe   :  { %s5694_s3 = sld [smem:[%s6676_s0 + %s5584_s30]]   ;;  %s5594_s28 = smov 17  }
   0xf   :  { %s5699_s8 = sld [smem:[%s6676_s0 + %s5585_s4]]  }
  0x10   :  { %s5704_s14 = sld [smem:[%s6676_s0 + %s5586_s10]]  }
  0x11   :  { %s5709_s19 = sld [smem:[%s6676_s0 + %s5587_s15]]   ;;  %s5592_s15 = smov 15  }
  0x12   :  { %s5714_s24 = sld [smem:[%s6676_s0 + %s5588_s20]]  }
  0x13   :  { %6740 = sst [smem:[#allocation80_spill]] %s5689_s29 }
  0x14   :  { %6741 = sst [smem:[#allocation81_spill]] %s5694_s3 }
  0x15   :  { %6742 = sst [smem:[#allocation82_spill]] %s5699_s8 }
  0x16   :  { %6743 = sst [smem:[#allocation83_spill]] %s5704_s14 }
  0x17   :  { %6744 = sst [smem:[#allocation84_spill]] %s5709_s19 }
  0x18   :  { %6745 = sst [smem:[#allocation85_spill]] %s5714_s24 }
  0x19   :  { %s5719_s30 = sld [smem:[%s6676_s0 + %s5589_s26]]  }
  0x1a   :  { %s5724_s6 = sld [smem:[%s6676_s0 + %s5590_s1]]  }
  0x1b   :  { %s5729_s12 = sld [smem:[%s6676_s0 + %s5591_s7]]   ;;  %s5595_s7 = smov 18  }
  0x1c   :  { %s5734_s20 = sld [smem:[%s6676_s0 + %s5592_s15]]   ;;  %s5596_s15 = smov 19  }
  0x1d   :  { %s5739_s27 = sld [smem:[%s6676_s0 + %s5593_s22]]   ;;  %s5597_s22 = smov 20  }
  0x1e   :  { %s5744_s4 = sld [smem:[%s6676_s0 + %s5594_s28]]   ;;  %s5598_s28 = smov 21  }
  0x1f   :  { %6746 = sst [smem:[#allocation86_spill]] %s5719_s30 }
  0x20   :  { %6747 = sst [smem:[#allocation87_spill]] %s5724_s6 }
  0x21   :  { %6748 = sst [smem:[#allocation88_spill]] %s5729_s12 }
  0x22   :  { %6749 = sst [smem:[#allocation89_spill]] %s5734_s20 }
  0x23   :  { %6750 = sst [smem:[#allocation90_spill]] %s5739_s27 }
  0x24   :  { %6751 = sst [smem:[#allocation91_spill]] %s5744_s4 }
  0x25   :  { %s5749_s21 = sld [smem:[%s6676_s0 + %s5595_s7]]   ;;  %s5599_s7 = smov 22  }
  0x26   :  { %s5754_s12 = sld [smem:[%s6676_s0 + %s5596_s15]]   ;;  %s5600_s15 = smov 23  }
  0x27   :  { %s5759_s27 = sld [smem:[%s6676_s0 + %s5597_s22]]   ;;  %s5601_s22 = smov 24  }
  0x28   :  { %s5764_s30 = sld [smem:[%s6676_s0 + %s5598_s28]]   ;;  %s5602_s28 = smov 25  }
  0x29   :  { %s5774_s19 = sld [smem:[%s6676_s0 + %s5600_s15]]   ;;  %s5604_s15 = smov 27  }
  0x2a   :  { %s5784_s8 = sld [smem:[%s6676_s0 + %s5602_s28]]   ;;  %s5606_s28 = smov 29  }
  0x2b   :  { %6752 = sst [smem:[#allocation92_spill]] %s5749_s21 }
  0x2c   :  { %6753 = sst [smem:[#allocation93_spill]] %s5754_s12 }
  0x2d   :  { %6754 = sst [smem:[#allocation94_spill]] %s5759_s27 }
  0x2e   :  { %6755 = sst [smem:[#allocation95_spill]] %s5764_s30 }
  0x2f   :  { %s5769_s21 = sld [smem:[%s6676_s0 + %s5599_s7]]   ;;  %s5603_s7 = smov 26  }
  0x30   :  { %6757 = sst [smem:[#allocation97_spill]] %s5774_s19 }
  0x31   :  { %s5779_s27 = sld [smem:[%s6676_s0 + %s5601_s22]]   ;;  %s5605_s22 = smov 28  }
  0x32   :  { %6759 = sst [smem:[#allocation99_spill]] %s5784_s8 }
  0x33   :  { %s5794_s29 = sld [smem:[%s6676_s0 + %s5604_s15]]   ;;  %s5608_s15 = smov 31  }
  0x34   :  { %s5804_s9 = sld [smem:[%s6676_s0 + %s5606_s28]]  }
  0x35   :  { %6756 = sst [smem:[#allocation96_spill]] %s5769_s21 }
  0x36   :  { %s5789_s21 = sld [smem:[%s6676_s0 + %s5603_s7]]   ;;  %s5607_s7 = smov 30  }
  0x37   :  { %6758 = sst [smem:[#allocation98_spill]] %s5779_s27 }
  0x38   :  { %s5799_s27 = sld [smem:[%s6676_s0 + %s5605_s22]]  }
  0x39   :  { %6761 = sst [smem:[#allocation101_spill]] %s5794_s29 }
  0x3a   :  { %6762 = sst [smem:[#allocation102_spill]] %s5804_s9 }
  0x3b   :  { %s5814_s13 = sld [smem:[%s6676_s0 + %s5608_s15]]  }
  0x3c   :  { %6760 = sst [smem:[#allocation100_spill]] %s5789_s21 }
  0x3d   :  { %s5809_s21 = sld [smem:[%s6676_s0 + %s5607_s7]]  }
  0x41   :  { %6764 = sst [smem:[#allocation104_spill]] %s5814_s13 }
  0x43   :  { %6763 = sst [smem:[#allocation103_spill]] %s5809_s21 }
  0x44   :  { %68 = vsyncpa [#allocation8], 0 }
  0x45   :  { %70 = vsyncpa [#allocation8 + $0x1], 0 }
  0x46   :  { %71 = vsyncpa [#allocation11], 0 }
  0x47   :  { %73 = vsyncpa [#allocation11 + $0x1], 0 }
  0x48   :  { %74 = vsyncpa [#allocation14], 0 }
  0x49   :  { %75 = vsyncpa [#allocation19], 0 }
  0x4a   :  { %76 = vsyncpa [#allocation22], 0 }
  0x4b   :  { %77 = vsyncpa [#allocation25], 0 }
  0x4c   :  { %78 = vsyncpa [#allocation28], 0 }
  0x4d   :  { %79 = vsyncpa [#allocation31], 0 }
  0x4e   :  { %80 = vsyncpa [#allocation34], 0 }
  0x4f   :  { %81 = vsyncpa [#allocation37], 0 }
  0x50   :  { %82 = vsyncpa [#allocation40], 0 }
  0x51   :  { %83 = vsyncpa [#allocation43], 0 }
  0x52   :  { %84 = vsyncpa [#allocation46], 0 }
  0x53   :  { %85 = vsyncpa [#allocation49], 0 }
  0x54   :  { %86 = vsyncpa [#allocation52], 0 }
  0x55   :  { %87 = vsyncpa [#allocation9], 0 }
  0x56   :  { %89 = vsyncpa [#allocation9 + $0x1], 0  ;;  %s5816_s0 = smov 0   ;;  %s5818_s22 = smov 0  }
  0x57   :  { %s5820_s23 = smov 0   ;;  %s5822_s26 = smov 0  }
  0x58   :  { %s5824_s28 = smov 0   ;;  %s5826_s1 = smov 0  }
  0x59 LB: > { %s6765_s30 = sld [smem:[#allocation95_spill]]  ;;  %s6766_s29 = sld [smem:[#allocation101_spill]]  ;;  %s5564_s23 = sphi %s5820_s23, %s6859_s23   ;;  %s5560_s22 = sphi %s5818_s22, %s6858_s22   ;;  %s5556_s0 = sphi %s5816_s0, %s6857_s0   ;;  %s5576_s1 = sphi %s5826_s1, %s95_s1   ;;  %s5572_s28 = sphi %s5824_s28, %s6861_s28   ;;  %s5568_s26 = sphi %s5822_s26, %s6860_s26  }
  0x5a   : > { %s6767_s5 = sld [smem:[#allocation74_spill]]  ;;  %s6768_s24 = sld [smem:[#allocation85_spill]] }
  0x5b   : > { %s6769_s20 = sld [smem:[#allocation89_spill]]  ;;  %s6771_s14 = sld [smem:[#allocation83_spill]] }
  0x5c   : > { %s6770_s19 = sld [smem:[#allocation97_spill]]  ;;  %s6772_s12 = sld [smem:[#allocation93_spill]] }
  0x5d   : > { %s6773_s9 = sld [smem:[#allocation102_spill]]  ;;  %s6774_s8 = sld [smem:[#allocation99_spill]] }
  0x5e   : > { %s6775_s6 = sld [smem:[#allocation87_spill]]  ;;  %s6776_s4 = sld [smem:[#allocation91_spill]] }
  0x5f   : > { %s6777_s3 = sld [smem:[#allocation81_spill]]  ;;  %s6778_s25 = sld [smem:[#allocation79_spill]] }
  0x60   : > { %s6779_s17 = sld [smem:[#allocation77_spill]]  ;;  %6780 = sst [smem:[#allocation105_spill]] %s5568_s26 }
  0x61   : > { %s5609_s2 = smov [#allocation16]   ;;  %s5847_s10 = sadd.s32 4294967295, %s5576_s1  }
  0x62   : > { %s843_s7 = sshll.u32 %s5609_s2, 4  ;;  %p3684_p0 = scmp.ge.s32.totalorder %s5576_s1, 1  ;;  %s5852_s7 = int_to_ptr.vmem [resolvable:$true] %s843_s7 }
  0x63   : > { %p6693_p1 = scmp.eq.s32.totalorder %s5847_s10, 0  ;;  %p818_p2 = scmp.lt.s32.totalorder %s5576_s1, 3 }
  0x64   : > { %s5610_s16 = smov [#allocation13]   ;;  %s5611_s2 = smov [#allocation18]  }
  0x65   : > { %p5854_p3 = pnand %p3684_p0, %p818_p2  ;;  %s833_s18 = sshll.u32 %s5610_s16, 4  ;;  %s5867_s18 = int_to_ptr.vmem [resolvable:$true] %s833_s18 }
  0x66   : > { %s5869_s13 = sshll.u32 %s5611_s2, 4  ;;  %s4550_s26 = scalar_lea.hbm %s6778_s25, 256  ;;  %s868_s13 = int_to_ptr.vmem [resolvable:$true] %s5869_s13 }
  0x67   : > { %s6781_s11 = scalar_select %p5854_p3, 1, 0 }
  0x68   : > { %p4207_p5 = pneg %p5854_p3  ;;  %p4551_p7 = scmp.ne.s32.totalorder %s6778_s25, %s4550_s26 }
  0x69   : > { %6782 = sst [smem:[#allocation106_spill]] %s6781_s11  ;;  %p4557_p11 = scmp.lt.u32.totalorder %s4550_s26, %s6778_s25 }
  0x6a   : > { %p5863_p6 = pnand %p4207_p5, %p6693_p1 }
  0x6c   : > { %s6783_s15 = scalar_select %p5863_p6, 1, 0 }
  0x6d   : > { %p5875_p8 = pneg %p5863_p6 }
  0x6f   : > { %s6784_s21 = scalar_select %p5875_p8, 1, 0 }
  0x70   : > { %p4553_p9 = pnand %p5875_p8, %p4551_p7 }
  0x72   : > { %p4554_p10 = pneg %p4553_p9 }
  0x74   : > { %p4559_p12 = pnand %p4557_p11, %p4554_p10 }
  0x76   : > { %4562 = shalt.err (!%p4559_p12)
}
  0x77   : > { %s4563_s16 = scalar_lea.vmem %s5852_s7, 256  ;;  %p4571_p5 = scmp.lt.s32.totalorder %s5852_s7, %s5852_s7 }
  0x78   : > { %p4564_p13 = scmp.ne.s32.totalorder %s5852_s7, %s4563_s16  ;;  %p4572_p4 = scmp.lt.s32.totalorder %s4563_s16, %s4563_s16 }
  0x7a   : > { %p4566_p0 = pnand %p4564_p13, %p5875_p8  ;;  %p4573_p1 = por %p4572_p4, %p4571_p5 }
  0x7c   : > { %p4567_p2 = pneg %p4566_p0 }
  0x7e   : > { %p4574_p3 = pnand %p4573_p1, %p4567_p2 }
  0x80   : > { %4577 = shalt.err (!%p4574_p3)
}
  0x81   : > { %s6698_s2 = smov 64   ;;  %s5613_s26 = smov 4  }
  0x82   : > { %4213 = dma.hbm_to_vmem [thread:$0]  (!%p5863_p6), %s6778_s25, 256, %s5852_s7, [#allocation11], %s6698_s2, %s6698_s2, %s5613_s26  }
  0x83   : > { %s4578_s11 = scalar_lea.hbm %s6779_s17, 64 }
  0x84   : > { %p4579_p7 = scmp.ne.s32.totalorder %s6779_s17, %s4578_s11  ;;  %p4585_p3 = scmp.lt.u32.totalorder %s4578_s11, %s6779_s17 }
  0x86   : > { %p4581_p4 = pnand %p4579_p7, %p5875_p8 }
  0x88   : > { %p4582_p1 = pneg %p4581_p4 }
  0x8a   : > { %p4587_p9 = pnand %p4585_p3, %p4582_p1 }
  0x8c   : > { %4590 = shalt.err (!%p4587_p9)
}
  0x8d   : > { %s4591_s16 = scalar_lea.vmem %s5867_s18, 64  ;;  %p4599_p13 = scmp.lt.s32.totalorder %s5867_s18, %s5867_s18 }
  0x8e   : > { %p4592_p10 = scmp.ne.s32.totalorder %s5867_s18, %s4591_s16  ;;  %p4600_p0 = scmp.lt.s32.totalorder %s4591_s16, %s4591_s16 }
  0x90   : > { %p4594_p11 = pnand %p4592_p10, %p5875_p8  ;;  %p4601_p2 = por %p4600_p0, %p4599_p13 }
  0x92   : > { %p4595_p12 = pneg %p4594_p11 }
  0x94   : > { %p4602_p5 = pnand %p4601_p2, %p4595_p12 }
  0x96   : > { %4605 = shalt.err (!%p4602_p5)
}
  0x97   : > { %4210 = dma.hbm_to_vmem [thread:$0]  (!%p5863_p6), %s6779_s17, 64, %s5867_s18, [#allocation14]  }
  0x98   : > { %s4606_s7 = scalar_lea.hbm %s6777_s3, 256 }
  0x99   : > { %p4607_p7 = scmp.ne.s32.totalorder %s6777_s3, %s4606_s7  ;;  %p4613_p3 = scmp.lt.u32.totalorder %s4606_s7, %s6777_s3 }
  0x9b   : > { %p4609_p4 = pnand %p4607_p7, %p5875_p8 }
  0x9d   : > { %p4610_p1 = pneg %p4609_p4 }
  0x9f   : > { %p4615_p9 = pnand %p4613_p3, %p4610_p1 }
  0xa1   : > { %4618 = shalt.err (!%p4615_p9)
}
  0xa2   : > { %s4619_s11 = scalar_lea.vmem %s868_s13, 256  ;;  %p4627_p13 = scmp.lt.s32.totalorder %s868_s13, %s868_s13 }
  0xa3   : > { %p4620_p10 = scmp.ne.s32.totalorder %s868_s13, %s4619_s11  ;;  %p4628_p0 = scmp.lt.s32.totalorder %s4619_s11, %s4619_s11 }
  0xa5   : > { %p4622_p11 = pnand %p4620_p10, %p5875_p8  ;;  %p4629_p2 = por %p4628_p0, %p4627_p13 }
  0xa7   : > { %p4623_p12 = pneg %p4622_p11 }
  0xa9   : > { %p4630_p5 = pnand %p4629_p2, %p4623_p12 }
  0xab   : > { %4633 = shalt.err (!%p4630_p5)
}
  0xac   : > { %4219 = dma.hbm_to_vmem [thread:$0]  (!%p5863_p6), %s6777_s3, 256, %s868_s13, [#allocation19], %s6698_s2, %s6698_s2, %s5613_s26  }
  0xad   : > { %s5614_s18 = smov [#allocation21]   ;;  %s5615_s7 = smov [#allocation24]  }
  0xae   : > { %s891_s16 = sshll.u32 %s5614_s18, 4  ;;  %s915_s17 = sshll.u32 %s5615_s7, 4  ;;  %s892_s16 = int_to_ptr.vmem [resolvable:$true] %s891_s16  ;;  %s916_s17 = int_to_ptr.vmem [resolvable:$true] %s915_s17 }
  0xaf   : > { %s4634_s11 = scalar_lea.hbm %s6771_s14, 256 }
  0xb0   : > { %p4635_p7 = scmp.ne.s32.totalorder %s6771_s14, %s4634_s11  ;;  %p4641_p3 = scmp.lt.u32.totalorder %s4634_s11, %s6771_s14 }
  0xb2   : > { %p4637_p4 = pnand %p4635_p7, %p5875_p8 }
  0xb4   : > { %p4638_p1 = pneg %p4637_p4 }
  0xb6   : > { %p4643_p9 = pnand %p4641_p3, %p4638_p1 }
  0xb8   : > { %4646 = shalt.err (!%p4643_p9)
}
  0xb9   : > { %s4647_s25 = scalar_lea.vmem %s892_s16, 256  ;;  %p4655_p13 = scmp.lt.s32.totalorder %s892_s16, %s892_s16 }
  0xba   : > { %p4648_p10 = scmp.ne.s32.totalorder %s892_s16, %s4647_s25  ;;  %p4656_p0 = scmp.lt.s32.totalorder %s4647_s25, %s4647_s25 }
  0xbc   : > { %p4650_p11 = pnand %p4648_p10, %p5875_p8  ;;  %p4657_p2 = por %p4656_p0, %p4655_p13 }
  0xbe   : > { %p4651_p12 = pneg %p4650_p11 }
  0xc0   : > { %p4658_p5 = pnand %p4657_p2, %p4651_p12 }
  0xc2   : > { %4661 = shalt.err (!%p4658_p5)
}
  0xc3   : > { %4225 = dma.hbm_to_vmem [thread:$0]  (!%p5863_p6), %s6771_s14, 256, %s892_s16, [#allocation22], %s6698_s2, %s6698_s2, %s5613_s26  }
  0xc4   : > { %s4662_s13 = scalar_lea.hbm %s6768_s24, 256 }
  0xc5   : > { %p4663_p7 = scmp.ne.s32.totalorder %s6768_s24, %s4662_s13  ;;  %p4669_p3 = scmp.lt.u32.totalorder %s4662_s13, %s6768_s24 }
  0xc7   : > { %p4665_p4 = pnand %p4663_p7, %p5875_p8 }
  0xc9   : > { %p4666_p1 = pneg %p4665_p4 }
  0xcb   : > { %p4671_p9 = pnand %p4669_p3, %p4666_p1 }
  0xcd   : > { %4674 = shalt.err (!%p4671_p9)
}
  0xce   : > { %s4675_s25 = scalar_lea.vmem %s916_s17, 256  ;;  %p4683_p13 = scmp.lt.s32.totalorder %s916_s17, %s916_s17 }
  0xcf   : > { %p4676_p10 = scmp.ne.s32.totalorder %s916_s17, %s4675_s25  ;;  %p4684_p0 = scmp.lt.s32.totalorder %s4675_s25, %s4675_s25 }
  0xd1   : > { %p4678_p11 = pnand %p4676_p10, %p5875_p8  ;;  %p4685_p2 = por %p4684_p0, %p4683_p13 }
  0xd3   : > { %p4679_p12 = pneg %p4678_p11 }
  0xd5   : > { %p4686_p5 = pnand %p4685_p2, %p4679_p12 }
  0xd7   : > { %4689 = shalt.err (!%p4686_p5)
}
  0xd8   : > { %4231 = dma.hbm_to_vmem [thread:$0]  (!%p5863_p6), %s6768_s24, 256, %s916_s17, [#allocation25], %s6698_s2, %s6698_s2, %s5613_s26  }
  0xd9   : > { %s5616_s18 = smov [#allocation27]   ;;  %s5617_s7 = smov [#allocation30]  }
  0xda   : > { %s939_s16 = sshll.u32 %s5616_s18, 4  ;;  %s963_s11 = sshll.u32 %s5617_s7, 4  ;;  %s940_s16 = int_to_ptr.vmem [resolvable:$true] %s939_s16  ;;  %s964_s11 = int_to_ptr.vmem [resolvable:$true] %s963_s11 }
  0xdb   : > { %s4690_s13 = scalar_lea.hbm %s6775_s6, 256 }
  0xdc   : > { %p4691_p7 = scmp.ne.s32.totalorder %s6775_s6, %s4690_s13  ;;  %p4697_p3 = scmp.lt.u32.totalorder %s4690_s13, %s6775_s6 }
  0xde   : > { %p4693_p4 = pnand %p4691_p7, %p5875_p8 }
  0xe0   : > { %p4694_p1 = pneg %p4693_p4 }
  0xe2   : > { %p4699_p9 = pnand %p4697_p3, %p4694_p1 }
  0xe4   : > { %4702 = shalt.err (!%p4699_p9)
}
  0xe5   : > { %s4703_s25 = scalar_lea.vmem %s940_s16, 256  ;;  %p4711_p13 = scmp.lt.s32.totalorder %s940_s16, %s940_s16 }
  0xe6   : > { %p4704_p10 = scmp.ne.s32.totalorder %s940_s16, %s4703_s25  ;;  %p4712_p0 = scmp.lt.s32.totalorder %s4703_s25, %s4703_s25 }
  0xe8   : > { %p4706_p11 = pnand %p4704_p10, %p5875_p8  ;;  %p4713_p2 = por %p4712_p0, %p4711_p13 }
  0xea   : > { %p4707_p12 = pneg %p4706_p11 }
  0xec   : > { %p4714_p5 = pnand %p4713_p2, %p4707_p12 }
  0xee   : > { %4717 = shalt.err (!%p4714_p5)
}
  0xef   : > { %4237 = dma.hbm_to_vmem [thread:$0]  (!%p5863_p6), %s6775_s6, 256, %s940_s16, [#allocation28], %s6698_s2, %s6698_s2, %s5613_s26  }
  0xf0   : > { %s4718_s17 = scalar_lea.hbm %s6769_s20, 256 }
  0xf1   : > { %p4719_p7 = scmp.ne.s32.totalorder %s6769_s20, %s4718_s17  ;;  %p4725_p3 = scmp.lt.u32.totalorder %s4718_s17, %s6769_s20 }
  0xf3   : > { %p4721_p4 = pnand %p4719_p7, %p5875_p8 }
  0xf5   : > { %p4722_p1 = pneg %p4721_p4 }
  0xf7   : > { %p4727_p9 = pnand %p4725_p3, %p4722_p1 }
  0xf9   : > { %4730 = shalt.err (!%p4727_p9)
}
  0xfa   : > { %s4731_s18 = scalar_lea.vmem %s964_s11, 256  ;;  %p4739_p13 = scmp.lt.s32.totalorder %s964_s11, %s964_s11 }
  0xfb   : > { %p4732_p10 = scmp.ne.s32.totalorder %s964_s11, %s4731_s18  ;;  %p4740_p0 = scmp.lt.s32.totalorder %s4731_s18, %s4731_s18 }
  0xfd   : > { %p4734_p11 = pnand %p4732_p10, %p5875_p8  ;;  %p4741_p2 = por %p4740_p0, %p4739_p13 }
  0xff   : > { %p4735_p12 = pneg %p4734_p11 }
 0x101   : > { %p4742_p5 = pnand %p4741_p2, %p4735_p12 }
 0x103   : > { %4745 = shalt.err (!%p4742_p5)
}
 0x104   : > { %4243 = dma.hbm_to_vmem [thread:$0]  (!%p5863_p6), %s6769_s20, 256, %s964_s11, [#allocation31], %s6698_s2, %s6698_s2, %s5613_s26  }
 0x105   : > { %s5618_s16 = smov [#allocation33]   ;;  %s5619_s13 = smov [#allocation36]  }
 0x106   : > { %s987_s7 = sshll.u32 %s5618_s16, 4  ;;  %s1011_s25 = sshll.u32 %s5619_s13, 4  ;;  %s988_s7 = int_to_ptr.vmem [resolvable:$true] %s987_s7  ;;  %s1012_s25 = int_to_ptr.vmem [resolvable:$true] %s1011_s25 }
 0x107   : > { %s4746_s17 = scalar_lea.hbm %s6776_s4, 256 }
 0x108   : > { %p4747_p7 = scmp.ne.s32.totalorder %s6776_s4, %s4746_s17  ;;  %p4753_p3 = scmp.lt.u32.totalorder %s4746_s17, %s6776_s4 }
 0x10a   : > { %p4749_p4 = pnand %p4747_p7, %p5875_p8 }
 0x10c   : > { %p4750_p1 = pneg %p4749_p4 }
 0x10e   : > { %p4755_p9 = pnand %p4753_p3, %p4750_p1 }
 0x110   : > { %4758 = shalt.err (!%p4755_p9)
}
 0x111   : > { %s4759_s18 = scalar_lea.vmem %s988_s7, 256  ;;  %p4767_p13 = scmp.lt.s32.totalorder %s988_s7, %s988_s7 }
 0x112   : > { %p4760_p10 = scmp.ne.s32.totalorder %s988_s7, %s4759_s18  ;;  %p4768_p0 = scmp.lt.s32.totalorder %s4759_s18, %s4759_s18 }
 0x114   : > { %p4762_p11 = pnand %p4760_p10, %p5875_p8  ;;  %p4769_p2 = por %p4768_p0, %p4767_p13 }
 0x116   : > { %p4763_p12 = pneg %p4762_p11 }
 0x118   : > { %p4770_p5 = pnand %p4769_p2, %p4763_p12 }
 0x11a   : > { %4773 = shalt.err (!%p4770_p5)
}
 0x11b   : > { %4249 = dma.hbm_to_vmem [thread:$0]  (!%p5863_p6), %s6776_s4, 256, %s988_s7, [#allocation34], %s6698_s2, %s6698_s2, %s5613_s26  }
 0x11c   : > { %s4774_s11 = scalar_lea.hbm %s6772_s12, 256 }
 0x11d   : > { %p4775_p7 = scmp.ne.s32.totalorder %s6772_s12, %s4774_s11  ;;  %p4781_p3 = scmp.lt.u32.totalorder %s4774_s11, %s6772_s12 }
 0x11f   : > { %p4777_p4 = pnand %p4775_p7, %p5875_p8 }
 0x121   : > { %p4778_p1 = pneg %p4777_p4 }
 0x123   : > { %p4783_p9 = pnand %p4781_p3, %p4778_p1 }
 0x125   : > { %4786 = shalt.err (!%p4783_p9)
}
 0x126   : > { %s4787_s16 = scalar_lea.vmem %s1012_s25, 256  ;;  %p4795_p13 = scmp.lt.s32.totalorder %s1012_s25, %s1012_s25 }
 0x127   : > { %p4788_p10 = scmp.ne.s32.totalorder %s1012_s25, %s4787_s16  ;;  %p4796_p0 = scmp.lt.s32.totalorder %s4787_s16, %s4787_s16 }
 0x129   : > { %p4790_p11 = pnand %p4788_p10, %p5875_p8  ;;  %p4797_p2 = por %p4796_p0, %p4795_p13 }
 0x12b   : > { %p4791_p12 = pneg %p4790_p11 }
 0x12d   : > { %p4798_p5 = pnand %p4797_p2, %p4791_p12 }
 0x12f   : > { %4801 = shalt.err (!%p4798_p5)
}
 0x130   : > { %4255 = dma.hbm_to_vmem [thread:$0]  (!%p5863_p6), %s6772_s12, 256, %s1012_s25, [#allocation37], %s6698_s2, %s6698_s2, %s5613_s26  }
 0x131   : > { %s5620_s7 = smov [#allocation39]   ;;  %s5621_s17 = smov [#allocation42]  }
 0x132   : > { %s1036_s13 = sshll.u32 %s5620_s7, 4  ;;  %s1058_s18 = sshll.u32 %s5621_s17, 4  ;;  %s1037_s13 = int_to_ptr.vmem [resolvable:$true] %s1036_s13  ;;  %s1059_s18 = int_to_ptr.vmem [resolvable:$true] %s1058_s18 }
 0x133   : > { %s4802_s11 = scalar_lea.hbm %s6765_s30, 16 }
 0x134   : > { %p4803_p7 = scmp.ne.s32.totalorder %s6765_s30, %s4802_s11  ;;  %p4809_p3 = scmp.lt.u32.totalorder %s4802_s11, %s6765_s30 }
 0x136   : > { %p4805_p4 = pnand %p4803_p7, %p5875_p8 }
 0x138   : > { %p4806_p1 = pneg %p4805_p4 }
 0x13a   : > { %p4811_p9 = pnand %p4809_p3, %p4806_p1 }
 0x13c   : > { %4814 = shalt.err (!%p4811_p9)
}
 0x13d   : > { %s4815_s16 = scalar_lea.vmem %s1037_s13, 16  ;;  %s4822_s25 = scalar_lea.vmem %s1037_s13, 32 }
 0x13e   : > { %p4816_p10 = scmp.ne.s32.totalorder %s1037_s13, %s4815_s16  ;;  %p4823_p13 = scmp.lt.s32.totalorder %s1037_s13, %s1037_s13 }
 0x13f   : > { %p4824_p0 = scmp.lt.s32.totalorder %s4822_s25, %s4815_s16 }
 0x140   : > { %p4818_p11 = pnand %p4816_p10, %p5875_p8 }
 0x141   : > { %p4825_p2 = por %p4824_p0, %p4823_p13 }
 0x142   : > { %p4819_p12 = pneg %p4818_p11 }
 0x144   : > { %p4826_p5 = pnand %p4825_p2, %p4819_p12 }
 0x146   : > { %4829 = shalt.err (!%p4826_p5)
}
 0x147   : > { %4261 = dma.hbm_to_vmem [thread:$0]  (!%p5863_p6), %s6765_s30, 16, %s1037_s13, [#allocation40]  }
 0x148   : > { %s4830_s7 = scalar_lea.hbm %s6770_s19, 16 }
 0x149   : > { %p4831_p7 = scmp.ne.s32.totalorder %s6770_s19, %s4830_s7  ;;  %p4837_p3 = scmp.lt.u32.totalorder %s4830_s7, %s6770_s19 }
 0x14b   : > { %p4833_p4 = pnand %p4831_p7, %p5875_p8 }
 0x14d   : > { %p4834_p1 = pneg %p4833_p4 }
 0x14f   : > { %p4839_p9 = pnand %p4837_p3, %p4834_p1 }
 0x151   : > { %4842 = shalt.err (!%p4839_p9)
}
 0x152   : > { %s4843_s17 = scalar_lea.vmem %s1059_s18, 16  ;;  %s4850_s11 = scalar_lea.vmem %s1059_s18, 32 }
 0x153   : > { %p4844_p10 = scmp.ne.s32.totalorder %s1059_s18, %s4843_s17  ;;  %p4851_p13 = scmp.lt.s32.totalorder %s1059_s18, %s1059_s18 }
 0x154   : > { %p4852_p0 = scmp.lt.s32.totalorder %s4850_s11, %s4843_s17 }
 0x155   : > { %p4846_p11 = pnand %p4844_p10, %p5875_p8 }
 0x156   : > { %p4853_p2 = por %p4852_p0, %p4851_p13 }
 0x157   : > { %p4847_p12 = pneg %p4846_p11 }
 0x159   : > { %p4854_p5 = pnand %p4853_p2, %p4847_p12 }
 0x15b   : > { %4857 = shalt.err (!%p4854_p5)
}
 0x15c   : > { %4267 = dma.hbm_to_vmem [thread:$0]  (!%p5863_p6), %s6770_s19, 16, %s1059_s18, [#allocation43]  }
 0x15d   : > { %s5622_s13 = smov [#allocation45]   ;;  %s5623_s25 = smov [#allocation48]  }
 0x15e   : > { %s1080_s16 = sshll.u32 %s5622_s13, 4  ;;  %s1101_s7 = sshll.u32 %s5623_s25, 4  ;;  %s1081_s16 = int_to_ptr.vmem [resolvable:$true] %s1080_s16  ;;  %s1102_s7 = int_to_ptr.vmem [resolvable:$true] %s1101_s7 }
 0x15f   : > { %s4858_s2 = scalar_lea.hbm %s6774_s8, 16 }
 0x160   : > { %p4859_p7 = scmp.ne.s32.totalorder %s6774_s8, %s4858_s2  ;;  %p4865_p3 = scmp.lt.u32.totalorder %s4858_s2, %s6774_s8 }
 0x162   : > { %p4861_p4 = pnand %p4859_p7, %p5875_p8 }
 0x164   : > { %p4862_p1 = pneg %p4861_p4 }
 0x166   : > { %p4867_p9 = pnand %p4865_p3, %p4862_p1 }
 0x168   : > { %4870 = shalt.err (!%p4867_p9)
}
 0x169   : > { %s4871_s17 = scalar_lea.vmem %s1081_s16, 16  ;;  %s4878_s18 = scalar_lea.vmem %s1081_s16, 32 }
 0x16a   : > { %p4872_p10 = scmp.ne.s32.totalorder %s1081_s16, %s4871_s17  ;;  %p4879_p13 = scmp.lt.s32.totalorder %s1081_s16, %s1081_s16 }
 0x16b   : > { %p4880_p0 = scmp.lt.s32.totalorder %s4878_s18, %s4871_s17 }
 0x16c   : > { %p4874_p11 = pnand %p4872_p10, %p5875_p8 }
 0x16d   : > { %p4881_p2 = por %p4880_p0, %p4879_p13 }
 0x16e   : > { %p4875_p12 = pneg %p4874_p11 }
 0x170   : > { %p4882_p5 = pnand %p4881_p2, %p4875_p12 }
 0x172   : > { %4885 = shalt.err (!%p4882_p5)
}
 0x173   : > { %4273 = dma.hbm_to_vmem [thread:$0]  (!%p5863_p6), %s6774_s8, 16, %s1081_s16, [#allocation46]  }
 0x174   : > { %s4886_s2 = scalar_lea.hbm %s6766_s29, 256 }
 0x175   : > { %p4887_p7 = scmp.ne.s32.totalorder %s6766_s29, %s4886_s2  ;;  %p4893_p3 = scmp.lt.u32.totalorder %s4886_s2, %s6766_s29 }
 0x177   : > { %p4889_p4 = pnand %p4887_p7, %p5875_p8 }
 0x179   : > { %p4890_p1 = pneg %p4889_p4 }
 0x17b   : > { %p4895_p9 = pnand %p4893_p3, %p4890_p1 }
 0x17d   : > { %4898 = shalt.err (!%p4895_p9)
}
 0x17e   : > { %s4899_s11 = scalar_lea.vmem %s1102_s7, 256  ;;  %p4907_p13 = scmp.lt.s32.totalorder %s1102_s7, %s1102_s7 }
 0x17f   : > { %p4900_p10 = scmp.ne.s32.totalorder %s1102_s7, %s4899_s11  ;;  %p4908_p0 = scmp.lt.s32.totalorder %s4899_s11, %s4899_s11 }
 0x181   : > { %p4902_p11 = pnand %p4900_p10, %p5875_p8  ;;  %p4909_p2 = por %p4908_p0, %p4907_p13 }
 0x183   : > { %p4903_p12 = pneg %p4902_p11 }
 0x185   : > { %p4910_p5 = pnand %p4909_p2, %p4903_p12 }
 0x187   : > { %4913 = shalt.err (!%p4910_p5)
}
 0x188   : > { %s6785_s13 = smov 64   ;;  %s5624_s16 = smov [#allocation51]  }
 0x189   : > { %4279 = dma.hbm_to_vmem [thread:$0]  (!%p5863_p6), %s6766_s29, 256, %s1102_s7, [#allocation49], %s6785_s13, %s6785_s13, %s5613_s26  }
 0x18a   : > { %s1125_s25 = sshll.u32 %s5624_s16, 4  ;;  %s4914_s17 = scalar_lea.hbm %s6773_s9, 512  ;;  %s1126_s25 = int_to_ptr.vmem [resolvable:$true] %s1125_s25 }
 0x18b   : > { %p4915_p7 = scmp.ne.s32.totalorder %s6773_s9, %s4914_s17  ;;  %p4921_p3 = scmp.lt.u32.totalorder %s4914_s17, %s6773_s9 }
 0x18d   : > { %p4917_p4 = pnand %p4915_p7, %p5875_p8 }
 0x18f   : > { %p4918_p1 = pneg %p4917_p4 }
 0x191   : > { %p4923_p9 = pnand %p4921_p3, %p4918_p1 }
 0x193   : > { %4926 = shalt.err (!%p4923_p9)
}
 0x194   : > { %s4927_s18 = scalar_lea.vmem %s1126_s25, 512  ;;  %p4935_p13 = scmp.lt.s32.totalorder %s1126_s25, %s1126_s25 }
 0x195   : > { %p4928_p10 = scmp.ne.s32.totalorder %s1126_s25, %s4927_s18  ;;  %p4936_p0 = scmp.lt.s32.totalorder %s4927_s18, %s4927_s18 }
 0x197   : > { %p4930_p11 = pnand %p4928_p10, %p5875_p8  ;;  %p4937_p2 = por %p4936_p0, %p4935_p13 }
 0x199   : > { %p4931_p12 = pneg %p4930_p11 }
 0x19b   : > { %p4938_p5 = pnand %p4937_p2, %p4931_p12 }
 0x19d   : > { %4941 = shalt.err (!%p4938_p5)
}
 0x19e   : > { %4285 = dma.hbm_to_vmem [thread:$0]  (!%p5863_p6), %s6773_s9, 512, %s1126_s25, [#allocation52], %s6785_s13, %s6785_s13, %s5613_s26  }
 0x19f   : > { %s3683_s7 = sadd.s32 4294967294, %s5576_s1   ;;  %s107_s2 = sadd.s32 1, %s5572_s28 }
 0x1a0   : > { %p109_p7 = scmp.ge.s32.totalorder %s107_s2, 2  ;;  %s114_s11 = sadd.s32 1, %s5564_s23 }
 0x1a1   : > { %p121_p4 = scmp.ne.s32.totalorder %s5564_s23, %s5560_s22  ;;  %p122_p1 = scmp.eq.s32.totalorder %s5576_s1, 0 }
 0x1a2   : > { %s6863_s2 = smov (%p109_p7, %s107_s2), 0  ;;  %p127_p9 = scmp.ne.s32.totalorder %s5560_s22, %s5556_s0 }
 0x1a3   : > { %6786 = sst [smem:[#allocation107_spill]] %s6863_s2  ;;  %p6066_p3 = por %p122_p1, %p121_p4 }
 0x1a4   : > { %s111_s26 = ssub.s32 %s5572_s28, %s6863_s2  ;;  %p805_p10 = scmp.eq.s32.totalorder %s5847_s10, 1 }
 0x1a5   : > { %p112_p11 = scmp.eq.s32.totalorder %s111_s26, 0  ;;  %p6788_p12 = scmp.eq.s32.totalorder %s5847_s10, 0 }
 0x1a6   : > { %s6789_s13 = sld [smem:[#allocation76_spill]]  ;;  %p6081_p0 = por %p805_p10, %p121_p4 }
 0x1a7   : > { %p6077_p13 = por %p6788_p12, %p127_p9  ;;  %p811_p2 = scmp.eq.s32.totalorder %s3683_s7, 1 }
 0x1a8   : > { %s6791_s17 = scalar_select %p6081_p0, 1, 0 }
 0x1a9   : > { %s6790_s25 = scalar_select %p6077_p13, 1, 0 }
 0x1aa   : > { %s6086_s18 = scalar_select %p112_p11, %s5564_s23, %s114_s11  }
 0x1ab   : > { %p6088_p5 = por %p811_p2, %p127_p9  ;;  %p4333_p7 = scmp.lt.s32.totalorder %s5576_s1, 2 }
 0x1ac   : > { %6792 = sst [smem:[#allocation108_spill]] %s6086_s18  ;;  %s6095_s4 = sand.u32 1, %s5564_s23  }
 0x1ad   : > { %s6793_s3 = scalar_select %p6088_p5, 1, 0 }
 0x1ae   : > { %s6716_s6 = sshll.u32 %s6095_s4, 2  ;;  %s3714_s8 = sshll.u32 %s5572_s28, 6 }
 0x1af   : > { %s6100_s9 = scalar_lea.hbm %s6767_s5, %s3714_s8  ;;  %s1154_s7 = scalar_lea.vmem [#allocation7], %s6716_s6 }
 0x1b0   : > { %s1161_s11 = sshll.u32 %s1154_s7, 4  ;;  %p6108_p4 = pnand %p4333_p7, %p6066_p3  ;;  %s6104_s11 = int_to_ptr.vmem [resolvable:$true] %s1161_s11 }
 0x1b1   : > { %s6113_s12 = scalar_lea.hbm %s6789_s13, %s3714_s8  ;;  %s6795_s14 = sand.u32 1, %s5576_s1  }
 0x1b2   : > { %s6794_s26 = scalar_select %p6108_p4, 1, 0 }
 0x1b3   : > { %s6117_s19 = scalar_lea.sflag [#allocation8], %s6795_s14  ;;  %s4942_s20 = scalar_lea.hbm %s6100_s9, 64 }
 0x1b4   : > { %p4943_p1 = scmp.ne.s32.totalorder %s6100_s9, %s4942_s20  ;;  %p6123_p9 = pneg %p6108_p4 }
 0x1b5   : > { %s4947_s16 = scalar_lea.hbm %s6767_s5, 128  ;;  %p4948_p11 = scmp.lt.u32.totalorder %s6100_s9, %s6767_s5 }
 0x1b6   : > { %s6796_s24 = scalar_select %p6123_p9, 1, 0 }
 0x1b7   : > { %p4945_p10 = pnand %p6123_p9, %p4943_p1  ;;  %p4949_p12 = scmp.lt.u32.totalorder %s4947_s16, %s4942_s20 }
 0x1b8   : > { %p4951_p7 = scmp.lt.u32.totalorder %s4942_s20, %s6100_s9 }
 0x1b9   : > { %p4946_p3 = pneg %p4945_p10  ;;  %p4950_p2 = por %p4949_p12, %p4948_p11 }
 0x1bb   : > { %p4952_p5 = por %p4951_p7, %p4950_p2 }
 0x1bd   : > { %p4953_p0 = pnand %p4952_p5, %p4946_p3 }
 0x1bf   : > { %4956 = shalt.err (!%p4953_p0)
}
 0x1c0   : > { %s4957_s8 = scalar_lea.vmem %s6104_s11, 64  ;;  %s5625_s14 = smov [#allocation7]  }
 0x1c1   : > { %p4958_p13 = scmp.ne.s32.totalorder %s6104_s11, %s4957_s8  ;;  %s4962_s7 = sshll.u32 %s5625_s14, 4  ;;  %s4963_s7 = int_to_ptr.vmem [resolvable:$false] %s4962_s7 }
 0x1c2   : > { %s4964_s6 = scalar_lea.vmem %s4963_s7, 128  ;;  %p4965_p1 = scmp.lt.s32.totalorder %s6104_s11, %s4963_s7 }
 0x1c3   : > { %p4960_p6 = pnand %p4958_p13, %p6123_p9  ;;  %p4966_p10 = scmp.lt.s32.totalorder %s4964_s6, %s4957_s8 }
 0x1c5   : > { %p4961_p8 = pneg %p4960_p6  ;;  %p4967_p11 = por %p4966_p10, %p4965_p1 }
 0x1c7   : > { %p4968_p12 = pnand %p4967_p11, %p4961_p8 }
 0x1c9   : > { %4971 = shalt.err (!%p4968_p12)
}
 0x1ca   : > { %s6797_s20 = sld [smem:[#allocation75_spill]]  ;;  %s3715_s16 = sshll.u32 %s6095_s4, 3 }
 0x1cb   : > { %4292 = dma.hbm_to_vmem [thread:$0]  (!%p6108_p4), %s6100_s9, 64, %s6104_s11, %s6117_s19  }
 0x1cc   : > { %s3716_s14 = sshll.u32 %s5572_s28, 7  ;;  %s1172_s6 = scalar_lea.vmem [#allocation10], %s3715_s16 }
 0x1cd   : > { %s1180_s8 = sshll.u32 %s1172_s6, 4  ;;  %s5626_s5 = smov [#allocation17]   ;;  %s6148_s8 = int_to_ptr.vmem [resolvable:$true] %s1180_s8 }
 0x1ce   : > { %s6150_s29 = sshll.u32 %s5626_s5, 4  ;;  %s6798_s30 = sand.u32 1, %s5576_s1   ;;  %s858_s29 = int_to_ptr.vmem [resolvable:$true] %s6150_s29 }
 0x1cf   : > { %s6154_s2 = scalar_lea.sflag [#allocation11], %s6798_s30 }
 0x1d0   : > { %s6146_s7 = scalar_lea.hbm %s6797_s20, %s3716_s14  ;;  %s4977_s9 = scalar_lea.hbm %s6797_s20, 256 }
 0x1d1   : > { %s4972_s18 = scalar_lea.hbm %s6146_s7, 128  ;;  %p4978_p0 = scmp.lt.u32.totalorder %s6146_s7, %s6797_s20 }
 0x1d2   : > { %p4973_p6 = scmp.ne.s32.totalorder %s6146_s7, %s4972_s18  ;;  %p4979_p5 = scmp.lt.u32.totalorder %s4977_s9, %s4972_s18 }
 0x1d3   : > { %p4981_p2 = scmp.lt.u32.totalorder %s4972_s18, %s6146_s7 }
 0x1d4   : > { %p4975_p8 = pnand %p4973_p6, %p6123_p9  ;;  %p4980_p3 = por %p4979_p5, %p4978_p0 }
 0x1d6   : > { %p4976_p13 = pneg %p4975_p8  ;;  %p4982_p7 = por %p4981_p2, %p4980_p3 }
 0x1d8   : > { %p4983_p1 = pnand %p4982_p7, %p4976_p13 }
 0x1da   : > { %4986 = shalt.err (!%p4983_p1)
}
 0x1db   : > { %s4987_s5 = scalar_lea.vmem %s6148_s8, 128  ;;  %s5627_s30 = smov [#allocation10]  }
 0x1dc   : > { %p4988_p10 = scmp.ne.s32.totalorder %s6148_s8, %s4987_s5  ;;  %s4992_s11 = sshll.u32 %s5627_s30, 4  ;;  %s4993_s11 = int_to_ptr.vmem [resolvable:$false] %s4992_s11 }
 0x1dd   : > { %s4994_s16 = scalar_lea.vmem %s4993_s11, 256  ;;  %p4995_p6 = scmp.lt.s32.totalorder %s6148_s8, %s4993_s11 }
 0x1de   : > { %p4990_p11 = pnand %p4988_p10, %p6123_p9  ;;  %p4996_p8 = scmp.lt.s32.totalorder %s4994_s16, %s4987_s5 }
 0x1e0   : > { %p4991_p12 = pneg %p4990_p11  ;;  %p4997_p0 = por %p4996_p8, %p4995_p6 }
 0x1e2   : > { %p4998_p5 = pnand %p4997_p0, %p4991_p12 }
 0x1e4   : > { %5001 = shalt.err (!%p4998_p5)
}
 0x1e5   : > { %s6799_s18 = sld [smem:[#allocation80_spill]]  ;;  %p6800_p3 = scmp.ne.s32.totalorder %s6784_s21, 0 }
 0x1e6   : > { %4295 = dma.hbm_to_vmem [thread:$0]  (!%p6108_p4), %s6146_s7, 128, %s6148_s8, %s6154_s2  }
 0x1eb   : > { %s5002_s14 = scalar_lea.hbm %s6799_s18, 16 }
 0x1ec   : > { %p5003_p13 = scmp.ne.s32.totalorder %s6799_s18, %s5002_s14  ;;  %p5009_p1 = scmp.lt.u32.totalorder %s5002_s14, %s6799_s18 }
 0x1ee   : > { %p5005_p2 = pnand %p5003_p13, %p6800_p3 }
 0x1f0   : > { %p5006_p7 = pneg %p5005_p2 }
 0x1f2   : > { %p5011_p10 = pnand %p5009_p1, %p5006_p7 }
 0x1f4   : > { %5014 = shalt.err (!%p5011_p10)
}
 0x1f5   : > { %s5015_s6 = scalar_lea.vmem %s858_s29, 16  ;;  %s5022_s9 = scalar_lea.vmem %s858_s29, 32 }
 0x1f6   : > { %p5016_p11 = scmp.ne.s32.totalorder %s858_s29, %s5015_s6  ;;  %p5023_p8 = scmp.lt.s32.totalorder %s858_s29, %s858_s29 }
 0x1f7   : > { %p5024_p0 = scmp.lt.s32.totalorder %s5022_s9, %s5015_s6 }
 0x1f8   : > { %p5018_p12 = pnand %p5016_p11, %p6800_p3 }
 0x1f9   : > { %p5025_p5 = por %p5024_p0, %p5023_p8 }
 0x1fa   : > { %p5019_p6 = pneg %p5018_p12 }
 0x1fc   : > { %p5026_p4 = pnand %p5025_p5, %p5019_p6 }
 0x1fe   : > { %5029 = shalt.err (!%p5026_p4)
}
 0x1ff   : > { %p6801_p9 = scmp.ne.s32.totalorder %s6783_s15, 0  ;;  %s6802_s7 = sld [smem:[#allocation82_spill]] }
 0x200   : > { %s5628_s8 = smov [#allocation20]   ;;  %s5629_s30 = smov [#allocation23]  }
 0x201   : > { %4216 = dma.hbm_to_vmem [thread:$0]  (!%p6801_p9), %s6799_s18, 16, %s858_s29, [#allocation14]  }
 0x202   : > { %s881_s5 = sshll.u32 %s5628_s8, 4  ;;  %s905_s11 = sshll.u32 %s5629_s30, 4  ;;  %s882_s5 = int_to_ptr.vmem [resolvable:$true] %s881_s5  ;;  %s906_s11 = int_to_ptr.vmem [resolvable:$true] %s905_s11 }
 0x205   : > { %s5030_s16 = scalar_lea.hbm %s6802_s7, 16 }
 0x206   : > { %p5031_p13 = scmp.ne.s32.totalorder %s6802_s7, %s5030_s16  ;;  %p5037_p1 = scmp.lt.u32.totalorder %s5030_s16, %s6802_s7 }
 0x208   : > { %p5033_p2 = pnand %p5031_p13, %p6800_p3 }
 0x20a   : > { %p5034_p7 = pneg %p5033_p2 }
 0x20c   : > { %p5039_p4 = pnand %p5037_p1, %p5034_p7 }
 0x20e   : > { %5042 = shalt.err (!%p5039_p4)
}
 0x20f   : > { %s5043_s14 = scalar_lea.vmem %s882_s5, 16  ;;  %s5050_s29 = scalar_lea.vmem %s882_s5, 32 }
 0x210   : > { %p5044_p10 = scmp.ne.s32.totalorder %s882_s5, %s5043_s14  ;;  %p5051_p6 = scmp.lt.s32.totalorder %s882_s5, %s882_s5 }
 0x211   : > { %p5052_p8 = scmp.lt.s32.totalorder %s5050_s29, %s5043_s14 }
 0x212   : > { %p5046_p11 = pnand %p5044_p10, %p6800_p3 }
 0x213   : > { %p5053_p0 = por %p5052_p8, %p5051_p6 }
 0x214   : > { %p5047_p12 = pneg %p5046_p11 }
 0x216   : > { %p5054_p5 = pnand %p5053_p0, %p5047_p12 }
 0x218   : > { %5057 = shalt.err (!%p5054_p5)
}
 0x219   : > { %s6803_s6 = sld [smem:[#allocation84_spill]] }
 0x21a   : > { %4222 = dma.hbm_to_vmem [thread:$0]  (!%p6801_p9), %s6802_s7, 16, %s882_s5, [#allocation19]  }
 0x21f   : > { %s5058_s9 = scalar_lea.hbm %s6803_s6, 16 }
 0x220   : > { %p5059_p13 = scmp.ne.s32.totalorder %s6803_s6, %s5058_s9  ;;  %p5065_p1 = scmp.lt.u32.totalorder %s5058_s9, %s6803_s6 }
 0x222   : > { %p5061_p2 = pnand %p5059_p13, %p6800_p3 }
 0x224   : > { %p5062_p7 = pneg %p5061_p2 }
 0x226   : > { %p5067_p4 = pnand %p5065_p1, %p5062_p7 }
 0x228   : > { %5070 = shalt.err (!%p5067_p4)
}
 0x229   : > { %s5071_s8 = scalar_lea.vmem %s906_s11, 16  ;;  %s5078_s30 = scalar_lea.vmem %s906_s11, 32 }
 0x22a   : > { %p5072_p10 = scmp.ne.s32.totalorder %s906_s11, %s5071_s8  ;;  %p5079_p6 = scmp.lt.s32.totalorder %s906_s11, %s906_s11 }
 0x22b   : > { %p5080_p8 = scmp.lt.s32.totalorder %s5078_s30, %s5071_s8 }
 0x22c   : > { %p5074_p11 = pnand %p5072_p10, %p6800_p3 }
 0x22d   : > { %p5081_p0 = por %p5080_p8, %p5079_p6 }
 0x22e   : > { %p5075_p12 = pneg %p5074_p11 }
 0x230   : > { %p5082_p5 = pnand %p5081_p0, %p5075_p12 }
 0x232   : > { %5085 = shalt.err (!%p5082_p5)
}
 0x233   : > { %s6804_s5 = sld [smem:[#allocation86_spill]]  ;;  %s5630_s16 = smov [#allocation26]  }
 0x234   : > { %4228 = dma.hbm_to_vmem [thread:$0]  (!%p6801_p9), %s6803_s6, 16, %s906_s11, [#allocation22]  }
 0x235   : > { %s929_s14 = sshll.u32 %s5630_s16, 4  ;;  %s5631_s29 = smov [#allocation29]   ;;  %s930_s14 = int_to_ptr.vmem [resolvable:$true] %s929_s14 }
 0x236   : > { %s953_s9 = sshll.u32 %s5631_s29, 4  ;;  %s954_s9 = int_to_ptr.vmem [resolvable:$true] %s953_s9 }
 0x239   : > { %s5086_s7 = scalar_lea.hbm %s6804_s5, 16 }
 0x23a   : > { %p5087_p13 = scmp.ne.s32.totalorder %s6804_s5, %s5086_s7  ;;  %p5093_p1 = scmp.lt.u32.totalorder %s5086_s7, %s6804_s5 }
 0x23c   : > { %p5089_p2 = pnand %p5087_p13, %p6800_p3 }
 0x23e   : > { %p5090_p7 = pneg %p5089_p2 }
 0x240   : > { %p5095_p4 = pnand %p5093_p1, %p5090_p7 }
 0x242   : > { %5098 = shalt.err (!%p5095_p4)
}
 0x243   : > { %s5099_s8 = scalar_lea.vmem %s930_s14, 16  ;;  %s5106_s11 = scalar_lea.vmem %s930_s14, 32 }
 0x244   : > { %p5100_p10 = scmp.ne.s32.totalorder %s930_s14, %s5099_s8  ;;  %p5107_p6 = scmp.lt.s32.totalorder %s930_s14, %s930_s14 }
 0x245   : > { %p5108_p8 = scmp.lt.s32.totalorder %s5106_s11, %s5099_s8 }
 0x246   : > { %p5102_p11 = pnand %p5100_p10, %p6800_p3 }
 0x247   : > { %p5109_p0 = por %p5108_p8, %p5107_p6 }
 0x248   : > { %p5103_p12 = pneg %p5102_p11 }
 0x24a   : > { %p5110_p5 = pnand %p5109_p0, %p5103_p12 }
 0x24c   : > { %5113 = shalt.err (!%p5110_p5)
}
 0x24d   : > { %s6805_s30 = sld [smem:[#allocation88_spill]] }
 0x24e   : > { %4234 = dma.hbm_to_vmem [thread:$0]  (!%p6801_p9), %s6804_s5, 16, %s930_s14, [#allocation25]  }
 0x253   : > { %s5114_s7 = scalar_lea.hbm %s6805_s30, 16 }
 0x254   : > { %p5115_p13 = scmp.ne.s32.totalorder %s6805_s30, %s5114_s7  ;;  %p5121_p1 = scmp.lt.u32.totalorder %s5114_s7, %s6805_s30 }
 0x256   : > { %p5117_p2 = pnand %p5115_p13, %p6800_p3 }
 0x258   : > { %p5118_p7 = pneg %p5117_p2 }
 0x25a   : > { %p5123_p4 = pnand %p5121_p1, %p5118_p7 }
 0x25c   : > { %5126 = shalt.err (!%p5123_p4)
}
 0x25d   : > { %s5127_s16 = scalar_lea.vmem %s954_s9, 16  ;;  %s5134_s29 = scalar_lea.vmem %s954_s9, 32 }
 0x25e   : > { %p5128_p10 = scmp.ne.s32.totalorder %s954_s9, %s5127_s16  ;;  %p5135_p6 = scmp.lt.s32.totalorder %s954_s9, %s954_s9 }
 0x25f   : > { %p5136_p8 = scmp.lt.s32.totalorder %s5134_s29, %s5127_s16 }
 0x260   : > { %p5130_p11 = pnand %p5128_p10, %p6800_p3 }
 0x261   : > { %p5137_p0 = por %p5136_p8, %p5135_p6 }
 0x262   : > { %p5131_p12 = pneg %p5130_p11 }
 0x264   : > { %p5138_p5 = pnand %p5137_p0, %p5131_p12 }
 0x266   : > { %5141 = shalt.err (!%p5138_p5)
}
 0x267   : > { %s6806_s14 = sld [smem:[#allocation90_spill]]  ;;  %s5632_s8 = smov [#allocation32]  }
 0x268   : > { %4240 = dma.hbm_to_vmem [thread:$0]  (!%p6801_p9), %s6805_s30, 16, %s954_s9, [#allocation28]  }
 0x269   : > { %s977_s11 = sshll.u32 %s5632_s8, 4  ;;  %s5633_s7 = smov [#allocation35]   ;;  %s978_s11 = int_to_ptr.vmem [resolvable:$true] %s977_s11 }
 0x26a   : > { %s1001_s5 = sshll.u32 %s5633_s7, 4  ;;  %s1002_s5 = int_to_ptr.vmem [resolvable:$true] %s1001_s5 }
 0x26d   : > { %s5142_s6 = scalar_lea.hbm %s6806_s14, 16 }
 0x26e   : > { %p5143_p13 = scmp.ne.s32.totalorder %s6806_s14, %s5142_s6  ;;  %p5149_p1 = scmp.lt.u32.totalorder %s5142_s6, %s6806_s14 }
 0x270   : > { %p5145_p2 = pnand %p5143_p13, %p6800_p3 }
 0x272   : > { %p5146_p7 = pneg %p5145_p2 }
 0x274   : > { %p5151_p4 = pnand %p5149_p1, %p5146_p7 }
 0x276   : > { %5154 = shalt.err (!%p5151_p4)
}
 0x277   : > { %s5155_s16 = scalar_lea.vmem %s978_s11, 16  ;;  %s5162_s9 = scalar_lea.vmem %s978_s11, 32 }
 0x278   : > { %p5156_p10 = scmp.ne.s32.totalorder %s978_s11, %s5155_s16  ;;  %p5163_p6 = scmp.lt.s32.totalorder %s978_s11, %s978_s11 }
 0x279   : > { %p5164_p8 = scmp.lt.s32.totalorder %s5162_s9, %s5155_s16 }
 0x27a   : > { %p5158_p11 = pnand %p5156_p10, %p6800_p3 }
 0x27b   : > { %p5165_p0 = por %p5164_p8, %p5163_p6 }
 0x27c   : > { %p5159_p12 = pneg %p5158_p11 }
 0x27e   : > { %p5166_p5 = pnand %p5165_p0, %p5159_p12 }
 0x280   : > { %5169 = shalt.err (!%p5166_p5)
}
 0x281   : > { %s6807_s29 = sld [smem:[#allocation92_spill]] }
 0x282   : > { %4246 = dma.hbm_to_vmem [thread:$0]  (!%p6801_p9), %s6806_s14, 16, %s978_s11, [#allocation31]  }
 0x287   : > { %s5170_s6 = scalar_lea.hbm %s6807_s29, 16 }
 0x288   : > { %p5171_p13 = scmp.ne.s32.totalorder %s6807_s29, %s5170_s6  ;;  %p5177_p1 = scmp.lt.u32.totalorder %s5170_s6, %s6807_s29 }
 0x28a   : > { %p5173_p2 = pnand %p5171_p13, %p6800_p3 }
 0x28c   : > { %p5174_p7 = pneg %p5173_p2 }
 0x28e   : > { %p5179_p4 = pnand %p5177_p1, %p5174_p7 }
 0x290   : > { %5182 = shalt.err (!%p5179_p4)
}
 0x291   : > { %s5183_s8 = scalar_lea.vmem %s1002_s5, 16  ;;  %s5190_s7 = scalar_lea.vmem %s1002_s5, 32 }
 0x292   : > { %p5184_p10 = scmp.ne.s32.totalorder %s1002_s5, %s5183_s8  ;;  %p5191_p6 = scmp.lt.s32.totalorder %s1002_s5, %s1002_s5 }
 0x293   : > { %p5192_p8 = scmp.lt.s32.totalorder %s5190_s7, %s5183_s8 }
 0x294   : > { %p5186_p11 = pnand %p5184_p10, %p6800_p3 }
 0x295   : > { %p5193_p0 = por %p5192_p8, %p5191_p6 }
 0x296   : > { %p5187_p12 = pneg %p5186_p11 }
 0x298   : > { %p5194_p5 = pnand %p5193_p0, %p5187_p12 }
 0x29a   : > { %5197 = shalt.err (!%p5194_p5)
}
 0x29b   : > { %s6808_s11 = sld [smem:[#allocation94_spill]]  ;;  %s5634_s16 = smov [#allocation38]  }
 0x29c   : > { %4252 = dma.hbm_to_vmem [thread:$0]  (!%p6801_p9), %s6807_s29, 16, %s1002_s5, [#allocation34]  }
 0x29d   : > { %s1025_s9 = sshll.u32 %s5634_s16, 4  ;;  %s5635_s6 = smov [#allocation41]   ;;  %s1026_s9 = int_to_ptr.vmem [resolvable:$true] %s1025_s9 }
 0x29e   : > { %s1047_s14 = sshll.u32 %s5635_s6, 4  ;;  %s1048_s14 = int_to_ptr.vmem [resolvable:$true] %s1047_s14 }
 0x2a1   : > { %s5198_s18 = scalar_lea.hbm %s6808_s11, 16 }
 0x2a2   : > { %p5199_p13 = scmp.ne.s32.totalorder %s6808_s11, %s5198_s18  ;;  %p5205_p1 = scmp.lt.u32.totalorder %s5198_s18, %s6808_s11 }
 0x2a4   : > { %p5201_p2 = pnand %p5199_p13, %p6800_p3 }
 0x2a6   : > { %p5202_p7 = pneg %p5201_p2 }
 0x2a8   : > { %p5207_p4 = pnand %p5205_p1, %p5202_p7 }
 0x2aa   : > { %5210 = shalt.err (!%p5207_p4)
}
 0x2ab   : > { %s5211_s8 = scalar_lea.vmem %s1026_s9, 16  ;;  %s5218_s5 = scalar_lea.vmem %s1026_s9, 32 }
 0x2ac   : > { %p5212_p10 = scmp.ne.s32.totalorder %s1026_s9, %s5211_s8  ;;  %p5219_p6 = scmp.lt.s32.totalorder %s1026_s9, %s1026_s9 }
 0x2ad   : > { %p5220_p8 = scmp.lt.s32.totalorder %s5218_s5, %s5211_s8 }
 0x2ae   : > { %p5214_p11 = pnand %p5212_p10, %p6800_p3 }
 0x2af   : > { %p5221_p0 = por %p5220_p8, %p5219_p6 }
 0x2b0   : > { %p5215_p12 = pneg %p5214_p11 }
 0x2b2   : > { %p5222_p5 = pnand %p5221_p0, %p5215_p12 }
 0x2b4   : > { %5225 = shalt.err (!%p5222_p5)
}
 0x2b5   : > { %s6809_s7 = sld [smem:[#allocation96_spill]] }
 0x2b6   : > { %4258 = dma.hbm_to_vmem [thread:$0]  (!%p6801_p9), %s6808_s11, 16, %s1026_s9, [#allocation37]  }
 0x2bb   : > { %s5226_s18 = scalar_lea.hbm %s6809_s7, 16 }
 0x2bc   : > { %p5227_p13 = scmp.ne.s32.totalorder %s6809_s7, %s5226_s18  ;;  %p5233_p1 = scmp.lt.u32.totalorder %s5226_s18, %s6809_s7 }
 0x2be   : > { %p5229_p2 = pnand %p5227_p13, %p6800_p3 }
 0x2c0   : > { %p5230_p7 = pneg %p5229_p2 }
 0x2c2   : > { %p5235_p4 = pnand %p5233_p1, %p5230_p7 }
 0x2c4   : > { %5238 = shalt.err (!%p5235_p4)
}
 0x2c5   : > { %s5239_s16 = scalar_lea.vmem %s1048_s14, 16  ;;  %s5246_s6 = scalar_lea.vmem %s1048_s14, 32 }
 0x2c6   : > { %p5240_p10 = scmp.ne.s32.totalorder %s1048_s14, %s5239_s16  ;;  %p5247_p6 = scmp.lt.s32.totalorder %s1048_s14, %s1048_s14 }
 0x2c7   : > { %p5248_p8 = scmp.lt.s32.totalorder %s5246_s6, %s5239_s16 }
 0x2c8   : > { %p5242_p11 = pnand %p5240_p10, %p6800_p3 }
 0x2c9   : > { %p5249_p0 = por %p5248_p8, %p5247_p6 }
 0x2ca   : > { %p5243_p12 = pneg %p5242_p11 }
 0x2cc   : > { %p5250_p5 = pnand %p5249_p0, %p5243_p12 }
 0x2ce   : > { %5253 = shalt.err (!%p5250_p5)
}
 0x2cf   : > { %s6810_s9 = sld [smem:[#allocation98_spill]]  ;;  %s5636_s8 = smov [#allocation44]  }
 0x2d0   : > { %4264 = dma.hbm_to_vmem [thread:$0]  (!%p6801_p9), %s6809_s7, 16, %s1048_s14, [#allocation40]  }
 0x2d1   : > { %s1069_s5 = sshll.u32 %s5636_s8, 4  ;;  %s5637_s18 = smov [#allocation47]   ;;  %s1070_s5 = int_to_ptr.vmem [resolvable:$true] %s1069_s5 }
 0x2d2   : > { %s1091_s11 = sshll.u32 %s5637_s18, 4  ;;  %s1092_s11 = int_to_ptr.vmem [resolvable:$true] %s1091_s11 }
 0x2d5   : > { %s5254_s20 = scalar_lea.hbm %s6810_s9, 16 }
 0x2d6   : > { %p5255_p13 = scmp.ne.s32.totalorder %s6810_s9, %s5254_s20  ;;  %p5261_p1 = scmp.lt.u32.totalorder %s5254_s20, %s6810_s9 }
 0x2d8   : > { %p5257_p2 = pnand %p5255_p13, %p6800_p3 }
 0x2da   : > { %p5258_p7 = pneg %p5257_p2 }
 0x2dc   : > { %p5263_p4 = pnand %p5261_p1, %p5258_p7 }
 0x2de   : > { %5266 = shalt.err (!%p5263_p4)
}
 0x2df   : > { %s5267_s16 = scalar_lea.vmem %s1070_s5, 16  ;;  %s5274_s14 = scalar_lea.vmem %s1070_s5, 32 }
 0x2e0   : > { %p5268_p10 = scmp.ne.s32.totalorder %s1070_s5, %s5267_s16  ;;  %p5275_p6 = scmp.lt.s32.totalorder %s1070_s5, %s1070_s5 }
 0x2e1   : > { %p5276_p8 = scmp.lt.s32.totalorder %s5274_s14, %s5267_s16 }
 0x2e2   : > { %p5270_p11 = pnand %p5268_p10, %p6800_p3 }
 0x2e3   : > { %p5277_p0 = por %p5276_p8, %p5275_p6 }
 0x2e4   : > { %p5271_p12 = pneg %p5270_p11 }
 0x2e6   : > { %p5278_p5 = pnand %p5277_p0, %p5271_p12 }
 0x2e8   : > { %5281 = shalt.err (!%p5278_p5)
}
 0x2e9   : > { %s6811_s6 = sld [smem:[#allocation100_spill]] }
 0x2ea   : > { %4270 = dma.hbm_to_vmem [thread:$0]  (!%p6801_p9), %s6810_s9, 16, %s1070_s5, [#allocation43]  }
 0x2ef   : > { %s5282_s20 = scalar_lea.hbm %s6811_s6, 16 }
 0x2f0   : > { %p5283_p13 = scmp.ne.s32.totalorder %s6811_s6, %s5282_s20  ;;  %p5289_p1 = scmp.lt.u32.totalorder %s5282_s20, %s6811_s6 }
 0x2f2   : > { %p5285_p2 = pnand %p5283_p13, %p6800_p3 }
 0x2f4   : > { %p5286_p7 = pneg %p5285_p2 }
 0x2f6   : > { %p5291_p4 = pnand %p5289_p1, %p5286_p7 }
 0x2f8   : > { %5294 = shalt.err (!%p5291_p4)
}
 0x2f9   : > { %s5295_s8 = scalar_lea.vmem %s1092_s11, 16  ;;  %s5302_s18 = scalar_lea.vmem %s1092_s11, 32 }
 0x2fa   : > { %p5296_p10 = scmp.ne.s32.totalorder %s1092_s11, %s5295_s8  ;;  %p5303_p6 = scmp.lt.s32.totalorder %s1092_s11, %s1092_s11 }
 0x2fb   : > { %p5304_p8 = scmp.lt.s32.totalorder %s5302_s18, %s5295_s8 }
 0x2fc   : > { %p5298_p11 = pnand %p5296_p10, %p6800_p3 }
 0x2fd   : > { %p5305_p0 = por %p5304_p8, %p5303_p6 }
 0x2fe   : > { %p5299_p12 = pneg %p5298_p11 }
 0x300   : > { %p5306_p5 = pnand %p5305_p0, %p5299_p12 }
 0x302   : > { %5309 = shalt.err (!%p5306_p5)
}
 0x303   : > { %4276 = dma.hbm_to_vmem [thread:$0]  (!%p6801_p9), %s6811_s6, 16, %s1092_s11, [#allocation46]  }
 0x304   : > { %s5638_s5 = smov [#allocation50]   ;;  %s5639_s14 = smov [#allocation53]  }
 0x305   : > { %s1115_s16 = sshll.u32 %s5638_s5, 4  ;;  %s1139_s20 = sshll.u32 %s5639_s14, 4  ;;  %s1116_s16 = int_to_ptr.vmem [resolvable:$true] %s1115_s16  ;;  %s1140_s20 = int_to_ptr.vmem [resolvable:$true] %s1139_s20 }
 0x306   : > { %s5310_s7 = scalar_lea.hbm %s5799_s27, 16 }
 0x307   : > { %p5311_p13 = scmp.ne.s32.totalorder %s5799_s27, %s5310_s7  ;;  %p5317_p1 = scmp.lt.u32.totalorder %s5310_s7, %s5799_s27 }
 0x309   : > { %p5313_p2 = pnand %p5311_p13, %p6800_p3 }
 0x30b   : > { %p5314_p7 = pneg %p5313_p2 }
 0x30d   : > { %p5319_p4 = pnand %p5317_p1, %p5314_p7 }
 0x30f   : > { %5322 = shalt.err (!%p5319_p4)
}
 0x310   : > { %s5323_s8 = scalar_lea.vmem %s1116_s16, 16  ;;  %s5330_s11 = scalar_lea.vmem %s1116_s16, 32 }
 0x311   : > { %p5324_p10 = scmp.ne.s32.totalorder %s1116_s16, %s5323_s8  ;;  %p5331_p6 = scmp.lt.s32.totalorder %s1116_s16, %s1116_s16 }
 0x312   : > { %p5332_p8 = scmp.lt.s32.totalorder %s5330_s11, %s5323_s8 }
 0x313   : > { %p5326_p11 = pnand %p5324_p10, %p6800_p3 }
 0x314   : > { %p5333_p0 = por %p5332_p8, %p5331_p6 }
 0x315   : > { %p5327_p12 = pneg %p5326_p11 }
 0x317   : > { %p5334_p5 = pnand %p5333_p0, %p5327_p12 }
 0x319   : > { %5337 = shalt.err (!%p5334_p5)
}
 0x31a   : > { %s6812_s18 = sld [smem:[#allocation103_spill]]  ;;  %s6813_s7 = sshll.u32 %s6095_s4, 2 }
 0x31b   : > { %4282 = dma.hbm_to_vmem [thread:$0]  (!%p6801_p9), %s5799_s27, 16, %s1116_s16, [#allocation49]  }
 0x31c   : > { %s1191_s5 = scalar_lea.vmem [#allocation12], %s6813_s7 }
 0x31d   : > { %s1198_s14 = sshll.u32 %s1191_s5, 4  ;;  %s1199_s14 = int_to_ptr.vmem [resolvable:$true] %s1198_s14 }
 0x320   : > { %s5338_s6 = scalar_lea.hbm %s6812_s18, 16 }
 0x321   : > { %p5339_p13 = scmp.ne.s32.totalorder %s6812_s18, %s5338_s6  ;;  %p5345_p1 = scmp.lt.u32.totalorder %s5338_s6, %s6812_s18 }
 0x323   : > { %p5341_p2 = pnand %p5339_p13, %p6800_p3 }
 0x325   : > { %p5342_p7 = pneg %p5341_p2 }
 0x327   : > { %p5347_p4 = pnand %p5345_p1, %p5342_p7 }
 0x329   : > { %5350 = shalt.err (!%p5347_p4)
}
 0x32a   : > { %s5351_s8 = scalar_lea.vmem %s1140_s20, 16  ;;  %s5358_s11 = scalar_lea.vmem %s1140_s20, 32 }
 0x32b   : > { %p5352_p10 = scmp.ne.s32.totalorder %s1140_s20, %s5351_s8  ;;  %p5359_p6 = scmp.lt.s32.totalorder %s1140_s20, %s1140_s20 }
 0x32c   : > { %p5360_p8 = scmp.lt.s32.totalorder %s5358_s11, %s5351_s8 }
 0x32d   : > { %p5354_p11 = pnand %p5352_p10, %p6800_p3 }
 0x32e   : > { %p5361_p0 = por %p5360_p8, %p5359_p6 }
 0x32f   : > { %p5355_p12 = pneg %p5354_p11 }
 0x331   : > { %p5362_p5 = pnand %p5361_p0, %p5355_p12 }
 0x333   : > { %5365 = shalt.err (!%p5362_p5)
}
 0x334   : > { %4288 = dma.hbm_to_vmem [thread:$0]  (!%p6801_p9), %s6812_s18, 16, %s1140_s20, [#allocation52]  }
 0x335   : > { %s5366_s21 = scalar_lea.hbm %s6113_s12, 64  ;;  %p6814_p13 = scmp.ne.s32.totalorder %s6796_s24, 0 }
 0x336   : > { %p5367_p3 = scmp.ne.s32.totalorder %s6113_s12, %s5366_s21  ;;  %s5371_s6 = scalar_lea.hbm %s6789_s13, 128 }
 0x337   : > { %p5372_p1 = scmp.lt.u32.totalorder %s6113_s12, %s6789_s13  ;;  %p5373_p4 = scmp.lt.u32.totalorder %s5371_s6, %s5366_s21 }
 0x338   : > { %p5369_p2 = pnand %p5367_p3, %p6814_p13  ;;  %p5375_p11 = scmp.lt.u32.totalorder %s5366_s21, %s6113_s12 }
 0x339   : > { %p5374_p10 = por %p5373_p4, %p5372_p1 }
 0x33a   : > { %p5370_p7 = pneg %p5369_p2 }
 0x33b   : > { %p5376_p12 = por %p5375_p11, %p5374_p10 }
 0x33d   : > { %p5377_p6 = pnand %p5376_p12, %p5370_p7 }
 0x33f   : > { %5380 = shalt.err (!%p5377_p6)
}
 0x340   : > { %s5381_s15 = scalar_lea.vmem %s1199_s14, 64  ;;  %s5640_s16 = smov [#allocation12]  }
 0x341   : > { %p5382_p8 = scmp.ne.s32.totalorder %s1199_s14, %s5381_s15  ;;  %s5386_s20 = sshll.u32 %s5640_s16, 4  ;;  %s5387_s20 = int_to_ptr.vmem [resolvable:$false] %s5386_s20 }
 0x342   : > { %s5388_s7 = scalar_lea.vmem %s5387_s20, 128  ;;  %p5389_p5 = scmp.lt.s32.totalorder %s1199_s14, %s5387_s20 }
 0x343   : > { %p5384_p0 = pnand %p5382_p8, %p6814_p13  ;;  %p5390_p3 = scmp.lt.s32.totalorder %s5388_s7, %s5381_s15 }
 0x345   : > { %p5385_p9 = pneg %p5384_p0  ;;  %p5391_p2 = por %p5390_p3, %p5389_p5 }
 0x347   : > { %p5392_p1 = pnand %p5391_p2, %p5385_p9 }
 0x349   : > { %5395 = shalt.err (!%p5392_p1)
}
 0x34a   : > { %p6815_p4 = scmp.ne.s32.totalorder %s6794_s26, 0  ;;  %s6816_s5 = sld [smem:[#allocation78_spill]] }
 0x34b   : > { %s3719_s8 = sshll.u32 %s5572_s28, 4  ;;  %s1208_s11 = scalar_lea.vmem [#allocation15], %s6095_s4 }
 0x34c   : > { %4298 = dma.hbm_to_vmem [thread:$0]  (!%p6815_p4), %s6113_s12, 64, %s1199_s14, %s6154_s2  }
 0x34d   : > { %s1215_s21 = sshll.u32 %s1208_s11, 4  ;;  %s1216_s21 = int_to_ptr.vmem [resolvable:$true] %s1215_s21 }
 0x350   : > { %s1213_s6 = scalar_lea.hbm %s6816_s5, %s3719_s8  ;;  %s5401_s16 = scalar_lea.hbm %s6816_s5, 32 }
 0x351   : > { %s5396_s15 = scalar_lea.hbm %s1213_s6, 16  ;;  %p5402_p12 = scmp.lt.u32.totalorder %s1213_s6, %s6816_s5 }
 0x352   : > { %p5397_p7 = scmp.ne.s32.totalorder %s1213_s6, %s5396_s15  ;;  %p5403_p6 = scmp.lt.u32.totalorder %s5401_s16, %s5396_s15 }
 0x353   : > { %p5405_p0 = scmp.lt.u32.totalorder %s5396_s15, %s1213_s6 }
 0x354   : > { %p5399_p10 = pnand %p5397_p7, %p6814_p13  ;;  %p5404_p8 = por %p5403_p6, %p5402_p12 }
 0x356   : > { %p5400_p11 = pneg %p5399_p10  ;;  %p5406_p9 = por %p5405_p0, %p5404_p8 }
 0x358   : > { %p5407_p5 = pnand %p5406_p9, %p5400_p11 }
 0x35a   : > { %5410 = shalt.err (!%p5407_p5)
}
 0x35b   : > { %s5411_s20 = scalar_lea.vmem %s1216_s21, 16  ;;  %s5641_s12 = smov [#allocation15]  }
 0x35c   : > { %p5412_p3 = scmp.ne.s32.totalorder %s1216_s21, %s5411_s20  ;;  %s5416_s4 = sshll.u32 %s5641_s12, 4  ;;  %s5417_s4 = int_to_ptr.vmem [resolvable:$false] %s5416_s4 }
 0x35d   : > { %s5418_s2 = scalar_lea.vmem %s5417_s4, 32  ;;  %p5419_p7 = scmp.lt.s32.totalorder %s1216_s21, %s5417_s4 }
 0x35e   : > { %p5414_p2 = pnand %p5412_p3, %p6814_p13  ;;  %p5420_p10 = scmp.lt.s32.totalorder %s5418_s2, %s5411_s20 }
 0x360   : > { %p5415_p1 = pneg %p5414_p2  ;;  %p5421_p4 = por %p5420_p10, %p5419_p7 }
 0x362   : > { %p5422_p6 = pnand %p5421_p4, %p5415_p1 }
 0x364   : > { %5425 = shalt.err (!%p5422_p6)
}
 0x365   : > { %p6817_p12 = scmp.ne.s32.totalorder %s6794_s26, 0  ;;  %s6818_s14 = sld [smem:[#allocation106_spill]] }
 0x367   : > { %4301 = dma.hbm_to_vmem [thread:$0]  (!%p6817_p12), %s1213_s6, 16, %s1216_s21, %s6117_s19  }
 0x36b   : > { %p6819_p11 = scmp.ne.s32.totalorder %s6818_s14, 0 }
 0x36c   : > { %s1226_s24 = sand.u32 (!%p6819_p11), 1, %s5847_s10   ;;  %s6337_s7 = sand.u32 (!%p6819_p11), 1, %s5560_s22  }
 0x36d   : > { %1224 = sbr.rel (%p6819_p11) target bundleno = 4907 (0x132b), region = 144  ;;  %s3721_s8 = sshll.u32 (!%p6819_p11), %s6337_s7, 2 }
 0x36e   : > { %s1227_s11 = scalar_lea.sflag (!%p6819_p11), [#allocation8], %s1226_s24  ;;  %s6340_s15 = scalar_lea.vmem (!%p6819_p11), [#allocation7], %s3721_s8 }
 0x36f   : > { %p6820_p13 = scmp.ne.s32.totalorder (!%p6819_p11), %s6790_s25, 0 }
 0x374   : > { %5479 = dma.done.wait (%p6820_p13), %s1227_s11, 64  }
 0x375   : > { %5481 = vsyncadd (%p6820_p13), %s1227_s11, 4294967232  ;;  %s3722_s19 = sshll.u32 %s6337_s7, 3  ;;  %s1236_s26 = scalar_lea.sflag [#allocation11], %s1226_s24 }
 0x376   : > { %s6349_s21 = scalar_lea.vmem [#allocation10], %s3722_s19 }
 0x377   : > { %5483 = dma.done.wait (%p6820_p13), %s1236_s26, 192  }
 0x378   : > { %5485 = vsyncadd (%p6820_p13), %s1236_s26, 4294967104  ;;  %s6355_s6 = scalar_lea.vmem [#allocation12], %s3721_s8  ;;  %p6821_p4 = scmp.eq.s32.totalorder %s5847_s10, 0 }
 0x37a   : > { %5487 = dma.done.wait (%p6821_p4), [#allocation14], 64   ;;  %p6822_p8 = pmov %p6821_p4 }
 0x37b   : > { %s1260_s16 = scalar_lea.vmem [#allocation15], %s6337_s7 }
 0x37c   : > { %5489 = vsyncadd (%p6822_p8), [#allocation14], 4294967232 }
 0x37d   : > { %5491 = dma.done.wait (%p6820_p13), %s1227_s11, 16  }
 0x37e   : > { %5493 = vsyncadd (%p6820_p13), %s1227_s11, 4294967280  ;;  %p6823_p0 = pmov %p6821_p4 }
 0x380   : > { %5495 = dma.done.wait (%p6823_p0), [#allocation11], 256   ;;  %p6824_p9 = pmov %p6823_p0 }
 0x381   : > { %p6825_p5 = pmov %p6823_p0 }
 0x382   : > { %5497 = vsyncadd (%p6824_p9), [#allocation11], 4294967040 }
 0x383   : > { %5499 = dma.done.wait (%p6825_p5), [#allocation14], 16   ;;  %p6826_p3 = pmov %p6823_p0 }
 0x384   : > { %p6827_p2 = pmov %p6823_p0 }
 0x385   : > { %5501 = vsyncadd (%p6826_p3), [#allocation14], 4294967280 }
 0x386   : > { %5503 = dma.done.wait (%p6827_p2), [#allocation19], 272   ;;  %p6828_p1 = pmov %p6823_p0 }
 0x387   : > { %p6829_p7 = pmov %p6823_p0 }
 0x388   : > { %5505 = vsyncadd (%p6828_p1), [#allocation19], 4294967024 }
 0x389   : > { %5507 = dma.done.wait (%p6829_p7), [#allocation22], 272   ;;  %p6830_p10 = pmov %p6823_p0 }
 0x38a   : > { %p6831_p6 = pmov %p6823_p0 }
 0x38b   : > { %5509 = vsyncadd (%p6830_p10), [#allocation22], 4294967024 }
 0x38c   : > { %5511 = dma.done.wait (%p6831_p6), [#allocation25], 272   ;;  %p6832_p12 = pmov %p6823_p0 }
 0x38d   : > { %p6833_p11 = pmov %p6823_p0 }
 0x38e   : > { %5513 = vsyncadd (%p6832_p12), [#allocation25], 4294967024 }
 0x38f   : > { %5515 = dma.done.wait (%p6833_p11), [#allocation28], 272   ;;  %p6834_p13 = pmov %p6823_p0 }
 0x390   : > { %p6835_p4 = pmov %p6823_p0 }
 0x391   : > { %5517 = vsyncadd (%p6834_p13), [#allocation28], 4294967024 }
 0x392   : > { %5519 = dma.done.wait (%p6835_p4), [#allocation31], 272   ;;  %p6836_p8 = pmov %p6823_p0 }
 0x394   : > { %5521 = vsyncadd (%p6836_p8), [#allocation31], 4294967024 }
 0x395   : > { %5523 = dma.done.wait (%p6823_p0), [#allocation34], 272   ;;  %p6837_p9 = pmov %p6823_p0 }
 0x396   : > { %p6838_p5 = pmov %p6823_p0 }
 0x397   : > { %5525 = vsyncadd (%p6837_p9), [#allocation34], 4294967024 }
 0x398   : > { %5527 = dma.done.wait (%p6838_p5), [#allocation37], 272   ;;  %p6839_p3 = pmov %p6823_p0 }
 0x399   : > { %p6840_p2 = pmov %p6823_p0 }
 0x39a   : > { %5529 = vsyncadd (%p6839_p3), [#allocation37], 4294967024 }
 0x39b   : > { %5531 = dma.done.wait (%p6840_p2), [#allocation40], 32   ;;  %p6841_p1 = pmov %p6823_p0 }
 0x39c   : > { %p6842_p7 = pmov %p6823_p0 }
 0x39d   : > { %5533 = vsyncadd (%p6841_p1), [#allocation40], 4294967264 }
 0x39e   : > { %5535 = dma.done.wait (%p6842_p7), [#allocation43], 32   ;;  %p6843_p10 = pmov %p6823_p0 }
 0x39f   : > { %p6844_p6 = pmov %p6823_p0 }
 0x3a0   : > { %5537 = vsyncadd (%p6843_p10), [#allocation43], 4294967264 }
 0x3a1   : > { %5539 = dma.done.wait (%p6844_p6), [#allocation46], 32   ;;  %p6845_p12 = pmov %p6823_p0 }
 0x3a2   : > { %p6846_p11 = pmov %p6823_p0 }
 0x3a3   : > { %5541 = vsyncadd (%p6845_p12), [#allocation46], 4294967264 }
 0x3a4   : > { %5543 = dma.done.wait (%p6846_p11), [#allocation49], 272   ;;  %p6847_p13 = pmov %p6823_p0 }
 0x3a5   : > { %p6848_p4 = pmov %p6823_p0 }
 0x3a6   : > { %5545 = vsyncadd (%p6847_p13), [#allocation49], 4294967024 }
 0x3a7   : > { %5547 = dma.done.wait (%p6848_p4), [#allocation52], 528   ;;  %p6849_p8 = pmov %p6823_p0 }
 0x3a8   : > { %v5642_v0 = vmov 0.0   ;;  %vm5643_vm0 = vmmov 0   ;;  %v4478_v1 = vld [vmem:[#allocation18] sm:$0xff]   ;;  %v4479_v2 = vld [vmem:[#allocation18 + $0x8] sm:$0xff]   ;;  %vm1491_vm1 = vcmask 261120   ;;  %v4484_v5 = vld [vmem:[#allocation21] sm:$0xff]  }
 0x3a9   : > { %5549 = vsyncadd (%p6849_p8), [#allocation52], 4294966768  ;;  %3909 = vmatprep.subr.bf16.mxu0 %v5642_v0  ;;  %3913 = vmatprep.mubr.msk.bf16.mxu0 %vm5643_vm0, %v5642_v0  ;;  %v1466_v3 = vld [vmem:[%s6340_s15] sm:$0xf]  ;;  %v4481_v6 = vld [vmem:[#allocation30 + $0x8] sm:$0xff]   ;;  %vm1536_vm2 = vcmask 257024  }
 0x3aa   : > { %3917 = vmatprep.subr.bf16.mxu1 %v5642_v0  ;;  %3921 = vmatprep.mubr.msk.bf16.mxu1 %vm5643_vm0, %v5642_v0  ;;  %v4480_v4 = vld [vmem:[#allocation30] sm:$0xff]   ;;  %v4485_v7 = vld [vmem:[#allocation21 + $0x8] sm:$0xff]   ;;  %v3752_v15 = vld [vmem:[#allocation20] ss:$0 sm:$0xff]  ;;  %vm1807_vm3 = vcmask 64512   ;;  %s5644_s10 = smov 112  }
 0x3ab   : > { %3910 = vmatpush3.bf16.msra.mxu0 %v4478_v1  ;;  %3918 = vmatpush3.bf16.msra.mxu1 %v4484_v5  ;;  %v1467_v8 = vld [vmem:[%s6355_s6] sm:$0xf]  ;;  %v4482_v9 = vld [vmem:[#allocation16] sm:$0xff]   ;;  %v4483_v10 = vld [vmem:[#allocation16 + $0x8] sm:$0xff]   ;;  %s5645_s25 = smov 120   ;;  %s5646_s20 = smov 104  }
 0x3ac   : > { %3911 = vmatprep.subr.bf16.mxu0 %v5642_v0  ;;  %3919 = vmatprep.subr.bf16.mxu1 %v5642_v0  ;;  %v6446_v11 = vld [vmem:[%s6349_s21] sm:$0xff]  ;;  %v4487_v14 = vld [vmem:[#allocation33 + $0x8] sm:$0xff]   ;;  %v3764_v48 = vld [vmem:[#allocation35] ss:$0 sm:$0xff]  ;;  %vm1867_vm4 = vcmask 1043456   ;;  %vm1914_vm5 = vcmask 60416  }
 0x3ad   : > { %v1736_v12 = vpack.c.bf16 %v6446_v11, %v6446_v11  ;;  %v4486_v13 = vld [vmem:[#allocation33] sm:$0xff]   ;;  %v3760_v22 = vld [vmem:[#allocation32] ss:$0 sm:$0xff]  ;;  %v3756_v41 = vld [vmem:[#allocation23] ss:$0 sm:$0xff]  ;;  %s5647_s12 = smov 8  }
 0x3ae   : > { %v3768_v33 = vld [vmem:[#allocation17] ss:$0 sm:$0xff]  ;;  %s5648_s4 = smov 16   ;;  %s5649_s2 = smov 24   ;;  %vm2042_vm6 = vcmask 126016   ;;  %vm2169_vm7 = vcmask 191616  }
 0x3af   : > { %3912 = vmatpush3.bf16.msra.mxu0 %v4479_v2  ;;  %3920 = vmatpush3.bf16.msra.mxu1 %v4485_v7  ;;  %vm2296_vm8 = vcmask 257216   ;;  %vm3155_vm9 = vcmask 523264   ;;  %s6850_s14 = sld [smem:[#allocation105_spill]]  ;;  %s6851_s24 = sld [smem:[#allocation104_spill]] }
 0x3b0   : > { %3925 = vmatprep.subr.bf16.mxu0 %v5642_v0  ;;  %3933 = vmatprep.subr.bf16.mxu1 %v5642_v0  ;;  %s1456_s11 = scalar_lea.vmem [#allocation54], %s3722_s19  ;;  %s3239_s21 = scalar_lea.sflag [#allocation9], %s6337_s7 }
 0x3b1   : > { %s3253_s15 = sshll.u32 %s1456_s11, 4  ;;  %p6852_p9 = scmp.ne.s32.totalorder %s6791_s17, 0  ;;  %s6632_s15 = int_to_ptr.vmem [resolvable:$true] %s3253_s15 }
 0x3b2   : > { %3914 = vmatmul.mubr.msk.bf16.vlgmr.msra.gmra.mrb[0].mxu0 %vm1491_vm1, %v1466_v3  ;;  %3922 = vmatmul.mubr.msk.bf16.vlgmr.msra.gmra.mrb[0].mxu1 %vm1491_vm1, %v1466_v3  ;;  %v1459_v3 = vld [vmem:[#allocation13] sm:$0xf]  ;;  %s5426_s6 = scalar_lea.vmem %s6632_s15, 128 }
 0x3b3   : > { %3926 = vmatpush3.bf16.msra.mxu0 %v4480_v4  ;;  %3929 = vmatprep.mubr.msk.bf16.mxu0 %vm5643_vm0, %v5642_v0  ;;  %v1460_v4 = vunpack.c.l.bf16 %v1459_v3  ;;  %p5427_p0 = scmp.ne.s32.totalorder %s6632_s15, %s5426_s6 }
 0x3b4   : > { %3927 = vmatprep.subr.bf16.mxu0 %v5642_v0  ;;  %3937 = vmatprep.mubr.msk.bf16.mxu1 %vm5643_vm0, %v5642_v0 }
 0x3b5   : > { %3934 = vmatpush3.bf16.msra.mxu1 %v4486_v13  ;;  %s3836_s8 = sshll.u32 %s6850_s14, 7  ;;  %p5428_p5 = pnand %p5427_p0, %p6852_p9 }
 0x3b6   : > { %3935 = vmatprep.subr.bf16.mxu1 %v5642_v0  ;;  %s6630_s26 = scalar_lea.hbm %s6851_s24, %s3836_s8 }
 0x3b7   : > { %3928 = vmatpush3.bf16.msra.mxu0 %v4481_v6  ;;  %p5429_p3 = pneg %p5428_p5 }
 0x3b8   : > { %3941 = vmatprep.subr.bf16.mxu0 %v5642_v0 }
 0x3b9   : > { %3936 = vmatpush3.bf16.msra.mxu1 %v4487_v14 }
 0x3ba   : > { %3930 = vmatmul.mubr.msk.bf16.vlgmr.msra.gmra.mrb[4].mxu0 %vm1491_vm1, %v1467_v8  ;;  %3949 = vmatprep.subr.bf16.mxu1 %v5642_v0 }
 0x3bb   : > { %3942 = vmatpush3.bf16.msra.mxu0 %v4482_v9  ;;  %3945 = vmatprep.mubr.msk.bf16.mxu0 %vm5643_vm0, %v5642_v0 }
 0x3bc   : > { %3943 = vmatprep.subr.bf16.mxu0 %v5642_v0  ;;  %3938 = vmatmul.mubr.msk.bf16.vlgmr.msra.gmra.mrb[4].mxu1 %vm1491_vm1, %v1467_v8 }
 0x3bd   : > { %3951 = vmatprep.mubr.msk.bf16.mxu1 %vm5643_vm0, %v5642_v0 }
 0x3bf   : > { %3944 = vmatpush3.bf16.msra.mxu0 %v4483_v10 }
 0x3c0   : > { %3955 = vmatprep.subr.bf16.mxu0 %v5642_v0 }
 0x3c2   : > { %3946 = vmatmul.mubr.msk.bf16.vlgmr.msra.gmra.mrb[8].mxu0 %vm1491_vm1, %v1736_v12 }
 0x3c3   : > { %3957 = vmatprep.mubr.msk.bf16.mxu0 %vm5643_vm0, %v5642_v0 }
 0x485   : > { %v1529_v16 = vpop.f32.mrb[0].mxu0  ;;  %v1595_v42 = vpop.f32.mrb[0].mxu1 }
 0x486   : > { %v1530_v17 = vadd.f32 %v3752_v15, %v1529_v16  ;;  %v3915_v18 = vpop.f32.mrb[1].mxu0  ;;  %v1596_v43 = vadd.f32 %v3756_v41, %v1595_v42  ;;  %v3923_v44 = vpop.f32.mrb[1].mxu1 }
 0x487   : > { %v1532_v19 = vpop.f32.mrb[2].mxu0  ;;  %v1598_v45 = vpop.f32.mrb[2].mxu1 }
 0x488   : > { %v1535_v20 = vpack.c.bf16 %v1530_v17, %v1530_v17  ;;  %v3916_v21 = vpop.f32.mrb[3].mxu0  ;;  %v1601_v46 = vpack.c.bf16 %v1596_v43, %v1596_v43  ;;  %v3924_v47 = vpop.f32.mrb[3].mxu1 }
 0x48a   : > { %1537 = vst.msk [vmem:[#allocation2] sm:$0xf] %vm1536_vm2, %v1535_v20  ;;  %1602 = vst.msk [vmem:[#allocation3] sm:$0xf] %vm1536_vm2, %v1601_v46 }
 0x48d   : > { %v1663_v23 = vpop.f32.mrb[4].mxu0 }
 0x48e   : > { %v1664_v24 = vadd.f32 %v3760_v22, %v1663_v23  ;;  %v3931_v25 = vpop.f32.mrb[5].mxu0 }
 0x48f   : > { %v1666_v26 = vpop.f32.mrb[6].mxu0  ;;  %v1728_v49 = vpop.f32.mrb[4].mxu1 }
 0x490   : > { %v1669_v27 = vpack.c.bf16 %v1664_v24, %v1664_v24  ;;  %v3932_v28 = vpop.f32.mrb[7].mxu0  ;;  %v1729_v50 = vadd.f32 %v3764_v48, %v1728_v49  ;;  %v3939_v51 = vpop.f32.mrb[5].mxu1 }
 0x491   : > { %v1805_v29 = vld [vmem:[#allocation2] sm:$0xf]  ;;  %v1731_v52 = vpop.f32.mrb[6].mxu1  ;;  %v1806_v55 = vld [vmem:[#allocation3] sm:$0xf] }
 0x492   : > { %v4488_v30 = vld [vmem:[#allocation2] ss:$0 sps:$4 sm:$0xff]   ;;  %1670 = vst.msk [vmem:[#allocation4] sm:$0xf] %vm1536_vm2, %v1669_v27  ;;  %v1812_v31 = vsel %vm1807_vm3, %v1805_v29, 0  ;;  %v1734_v53 = vpack.c.bf16 %v1729_v50, %v1729_v50  ;;  %v3940_v54 = vpop.f32.mrb[7].mxu1 }
 0x493   : > { %v4489_v32 = vld [vmem:[#allocation2] ss:$0 sps:$4 sm:$0xff]   ;;  %3950 = vmatpush3.bf16.xpose.msra.mxu1 %v1812_v31  ;;  %2051 = vrot.lane.b32.xlu1 %v4488_v30, %s5644_s10  ;;  %v1869_v56 = vsel %vm1867_vm4, %v1806_v55, 0  ;;  %v4491_v30 = vld [vmem:[#allocation3] ss:$0 sps:$4 sm:$0xff]  }
 0x494   : > { %1924 = vrot.lane.b32.xlu0 %v4489_v32, %s5645_s25  ;;  %3961 = vmatprep.subr.bf16.mxu1 %v5642_v0  ;;  %v4490_v40 = vld [vmem:[#allocation2] ss:$0 sps:$4 sm:$0xff]   ;;  %1735 = vst.msk [vmem:[#allocation5] sm:$0xf] %vm1536_vm2, %v1734_v53  ;;  %v4492_v31 = vld [vmem:[#allocation3] ss:$0 sps:$4 sm:$0xff]  }
 0x495   : > { %v1798_v34 = vpop.f32.mrb[8].mxu0  ;;  %3956 = vmatpush3.bf16.msra.mxu0 %v1869_v56 }
 0x496   : > { %v1799_v35 = vadd.f32 %v3768_v33, %v1798_v34  ;;  %v3947_v36 = vpop.f32.mrb[9].mxu0  ;;  %3967 = vmatprep.subr.bf16.mxu0 %v5642_v0 }
 0x497   : > { %v1801_v37 = vpop.f32.mrb[10].mxu0 }
 0x498   : > { %v1804_v38 = vpack.c.bf16 %v1799_v35, %v1799_v35  ;;  %v3948_v39 = vpop.f32.mrb[11].mxu0  ;;  %v4493_v35 = vld [vmem:[#allocation3] ss:$0 sps:$4 sm:$0xff]  }
 0x49a   : > { %2046 = vrot.lane.b32.xlu1 %v1804_v38, %s5644_s10  ;;  %1919 = vrot.lane.b32.xlu0 %v1804_v38, %s5645_s25 }
 0x49b   : > { %3952 = vmatmul.mubr.msk.bf16.vlgmr.msra.gmra.mrb[8].mxu1 %vm1807_vm3, %v1804_v38 }
 0x49c   : > { %3963 = vmatprep.mubr.msk.bf16.mxu1 %vm5643_vm0, %v5642_v0 }
 0x49e   : > { %2173 = vrot.lane.b32.xlu1 %v1804_v38, %s5646_s20  ;;  %2178 = vrot.lane.b32.xlu0 %v4490_v40, %s5646_s20 }
 0x505   : > { %v2052_v59 = vpop.permute.xlu1 %2051 }
 0x506   : > { %v1925_v57 = vpop.permute.xlu0 %1924  ;;  %v2057_v61 = vsel %vm1807_vm3, %v2052_v59, 0 }
 0x507   : > { %v1930_v58 = vsel %vm1807_vm3, %v1925_v57, 0 }
 0x508   : > { %3962 = vmatpush3.bf16.xpose.msra.mxu1 %v1930_v58 }
 0x509   : > { %3973 = vmatprep.subr.bf16.mxu1 %v5642_v0 }
 0x50c   : > { %v1920_v60 = vpop.permute.xlu0 %1919  ;;  %v2047_v63 = vpop.permute.xlu1 %2046 }
 0x50f   : > { %3964 = vmatmul.mubr.msk.bf16.vlgmr.msra.gmra.mrb[12].mxu1 %vm1807_vm3, %v1920_v60 }
 0x510   : > { %3974 = vmatpush3.bf16.xpose.msra.mxu1 %v2057_v61  ;;  %3975 = vmatprep.mubr.msk.bf16.mxu1 %vm5643_vm0, %v5642_v0  ;;  %v2179_v62 = vpop.permute.xlu0 %2178  ;;  %v2174_v2 = vpop.permute.xlu1 %2173 }
 0x511   : > { %3985 = vmatprep.subr.bf16.mxu1 %v5642_v0  ;;  %v2184_v1 = vsel %vm1807_vm3, %v2179_v62, 0 }
 0x517   : > { %3976 = vmatmul.mubr.msk.bf16.vlgmr.msra.gmra.mrb[16].mxu1 %vm1807_vm3, %v2047_v63 }
 0x518   : > { %3986 = vmatpush3.bf16.xpose.msra.mxu1 %v2184_v1  ;;  %3987 = vmatprep.mubr.msk.bf16.mxu1 %vm5643_vm0, %v5642_v0 }
 0x519   : > { %3997 = vmatprep.subr.bf16.mxu1 %v5642_v0 }
 0x51f   : > { %3988 = vmatmul.mubr.msk.bf16.vlgmr.msra.gmra.mrb[20].mxu1 %vm1807_vm3, %v2174_v2 }
 0x520   : > { %4001 = vmatprep.mubr.msk.bf16.mxu1 %vm5643_vm0, %v5642_v0 }
 0x56e   : > { %v1848_v5 = vpop.f32.mrb[8].mxu1 }
 0x56f   : > { %v1849_v6 = vadd.f32 %v1848_v5, %v1460_v4  ;;  %v3953_v7 = vpop.f32.mrb[9].mxu1 }
 0x570   : > { %v1851_v8 = vpop.f32.mrb[10].mxu1 }
 0x571   : > { %v3954_v9 = vpop.f32.mrb[11].mxu1  ;;  %v1854_v10 = vsel %vm1807_vm3, %v1849_v6, -inf }
 0x572   : > { %1855 = vmax.xlane.f32.xlu0 %v1854_v10 }
 0x5e2   : > { %v1966_v12 = vpop.f32.mrb[12].mxu1 }
 0x5e3   : > { %v1967_v13 = vadd.f32 %v1966_v12, %v1460_v4  ;;  %v3965_v14 = vpop.f32.mrb[13].mxu1 }
 0x5e4   : > { %v1969_v15 = vpop.f32.mrb[14].mxu1 }
 0x5e5   : > { %v3966_v16 = vpop.f32.mrb[15].mxu1  ;;  %v1972_v17 = vsel %vm1807_vm3, %v1967_v13, -inf }
 0x5e6   : > { %1973 = vmax.xlane.f32.xlu1 %v1972_v17  ;;  %v4495_v17 = vld [vmem:[#allocation24 + $0x8] sm:$0xff]  }
 0x5ea   : > { %v2093_v18 = vpop.f32.mrb[16].mxu1 }
 0x5eb   : > { %v2094_v19 = vadd.f32 %v2093_v18, %v1460_v4  ;;  %v3977_v20 = vpop.f32.mrb[17].mxu1 }
 0x5ec   : > { %v2096_v21 = vpop.f32.mrb[18].mxu1 }
 0x5ed   : > { %v3978_v22 = vpop.f32.mrb[19].mxu1  ;;  %v2099_v23 = vsel %vm1807_vm3, %v2094_v19, -inf }
 0x5ee   : > { %2100 = vmax.xlane.f32.xlu0 %v2099_v23 }
 0x5f2   : > { %v2220_v24 = vpop.f32.mrb[20].mxu1 }
 0x5f3   : > { %v2221_v25 = vadd.f32 %v2220_v24, %v1460_v4  ;;  %v3989_v26 = vpop.f32.mrb[21].mxu1 }
 0x5f4   : > { %v2223_v27 = vpop.f32.mrb[22].mxu1 }
 0x5f5   : > { %v3990_v28 = vpop.f32.mrb[23].mxu1  ;;  %v2226_v29 = vsel %vm1807_vm3, %v2221_v25, -inf }
 0x5f6   : > { %2227 = vmax.xlane.f32.xlu0 %v2226_v29 }
 0x5f7   : > { %1985 = vrot.lane.b32.xlu1 %v4491_v30, %s5645_s25 }
 0x5fb   : > { %2239 = vrot.lane.b32.xlu1 %v4492_v31, %s5646_s20 }
 0x5ff   : > { %v1856_v32 = vpop.xlane.xlu0 %1855 }
 0x600   : > { %v1857_v33 = vsub.f32 %v1849_v6, %v1856_v32 }
 0x602   : > { %v1858_v34 = vmul.f32 1.442695, %v1857_v33 }
 0x604   : > { %4512 = vpow2.f32 %v1858_v34 }
 0x60c   : > { %2112 = vrot.lane.b32.xlu0 %v4493_v35, %s5644_s10 }
 0x60e   : > { %v4513_v36 = vpop.eup %4512 }
 0x60f   : > { %v1863_v37 = vpack.c.bf16 %v4513_v36, %v4513_v36  ;;  %v1860_v53 = vsel %vm1807_vm3, %v4513_v36, 0.0 }
 0x611   : > { %3958 = vmatmul.mubr.msk.bf16.vlgmr.msra.gmra.mrb[12].mxu0 %vm1807_vm3, %v1863_v37 }
 0x612   : > { %3969 = vmatprep.mubr.msk.bf16.mxu0 %vm5643_vm0, %v5642_v0 }
 0x673   : > { %v1974_v38 = vpop.xlane.xlu1 %1973 }
 0x674   : > { %v1975_v39 = vsub.f32 %v1967_v13, %v1974_v38  ;;  %v4494_v13 = vld [vmem:[#allocation24] sm:$0xff]   ;;  %v2464_v38 = vld [vmem:[#allocation4] sm:$0xf] }
 0x675   : > { %3998 = vmatpush3.bf16.msra.mxu1 %v4494_v13 }
 0x676   : > { %v1976_v40 = vmul.f32 1.442695, %v1975_v39  ;;  %3999 = vmatprep.subr.bf16.mxu1 %v5642_v0 }
 0x677   : > { %v1986_v41 = vpop.permute.xlu1 %1985 }
 0x678   : > { %4514 = vpow2.f32 %v1976_v40  ;;  %v1991_v42 = vsel %vm1867_vm4, %v1986_v41, 0  ;;  %v2476_v40 = vsel %vm1807_vm3, %v2464_v38, 0  ;;  %v3789_v41 = vld [vmem:[#allocation26] ss:$0 sm:$0xff] }
 0x679   : > { %3968 = vmatpush3.bf16.msra.mxu0 %v1991_v42  ;;  %4000 = vmatpush3.bf16.msra.mxu1 %v4495_v17 }
 0x67a   : > { %3979 = vmatprep.subr.bf16.mxu0 %v5642_v0  ;;  %4013 = vmatprep.subr.bf16.mxu1 %v5642_v0 }
 0x67b   : > { %v2101_v43 = vpop.xlane.xlu0 %2100  ;;  %v2240_v56 = vpop.permute.xlu1 %2239 }
 0x67c   : > { %v2102_v44 = vsub.f32 %v2094_v19, %v2101_v43  ;;  %v2245_v59 = vsel %vm1867_vm4, %v2240_v56, 0 }
 0x67e   : > { %v2103_v45 = vmul.f32 1.442695, %v2102_v44 }
 0x680   : > { %4516 = vpow2.f32 %v2103_v45 }
 0x682   : > { %v4515_v46 = vpop.eup %4514 }
 0x683   : > { %v2228_v47 = vpop.xlane.xlu0 %2227  ;;  %v1978_v48 = vsel %vm1807_vm3, %v4515_v46, 0.0  ;;  %v1981_v49 = vpack.c.bf16 %v4515_v46, %v4515_v46 }
 0x684   : > { %v2229_v50 = vsub.f32 %v2221_v25, %v2228_v47  ;;  %1979 = vadd.xlane.f32.xlu1 %v1978_v48 }
 0x685   : > { %3970 = vmatmul.mubr.msk.bf16.vlgmr.msra.gmra.mrb[16].mxu0 %vm1807_vm3, %v1981_v49  ;;  %v4496_v49 = vld [vmem:[#allocation4] ss:$0 sps:$4 sm:$0xff]  }
 0x686   : > { %v2230_v51 = vmul.f32 1.442695, %v2229_v50  ;;  %3981 = vmatprep.mubr.msk.bf16.mxu0 %vm5643_vm0, %v5642_v0  ;;  %v4497_v50 = vld [vmem:[#allocation4] ss:$0 sps:$4 sm:$0xff]  }
 0x687   : > { %v2113_v52 = vpop.permute.xlu0 %2112 }
 0x688   : > { %4518 = vpow2.f32 %v2230_v51  ;;  %v2118_v54 = vsel %vm1867_vm4, %v2113_v52, 0  ;;  %1861 = vadd.xlane.f32.xlu1 %v1860_v53  ;;  %v4498_v51 = vld [vmem:[#allocation4] ss:$0 sps:$4 sm:$0xff]  }
 0x689   : > { %3980 = vmatpush3.bf16.msra.mxu0 %v2118_v54 }
 0x68a   : > { %v4517_v55 = vpop.eup %4516  ;;  %3991 = vmatprep.subr.bf16.mxu0 %v5642_v0 }
 0x68b   : > { %v2105_v57 = vsel %vm1807_vm3, %v4517_v55, 0.0  ;;  %v2108_v58 = vpack.c.bf16 %v4517_v55, %v4517_v55 }
 0x68c   : > { %2106 = vadd.xlane.f32.xlu0 %v2105_v57  ;;  %v4500_v57 = vld [vmem:[#allocation27 + $0x8] sm:$0xff]  }
 0x68d   : > { %3982 = vmatmul.mubr.msk.bf16.vlgmr.msra.gmra.mrb[20].mxu0 %vm1807_vm3, %v2108_v58 }
 0x68e   : > { %3992 = vmatpush3.bf16.msra.mxu0 %v2245_v59  ;;  %3993 = vmatprep.mubr.msk.bf16.mxu0 %vm5643_vm0, %v5642_v0 }
 0x68f   : > { %4005 = vmatprep.subr.bf16.mxu0 %v5642_v0 }
 0x692   : > { %v4519_v60 = vpop.eup %4518 }
 0x693   : > { %v2232_v61 = vsel %vm1807_vm3, %v4519_v60, 0.0  ;;  %v2235_v62 = vpack.c.bf16 %v4519_v60, %v4519_v60 }
 0x694   : > { %2233 = vadd.xlane.f32.xlu0 %v2232_v61 }
 0x695   : > { %3994 = vmatmul.mubr.msk.bf16.vlgmr.msra.gmra.mrb[24].mxu0 %vm1807_vm3, %v2235_v62  ;;  %v3793_v62 = vld [vmem:[#allocation39] ss:$0 sm:$0xff] }
 0x696   : > { %4009 = vmatprep.mubr.msk.bf16.mxu0 %vm5643_vm0, %v5642_v0 }
 0x6e4   : > { %v1905_v63 = vpop.f32.mrb[12].mxu0 }
 0x6e5   : > { %v3959_v1 = vpop.f32.mrb[13].mxu0 }
 0x6e6   : > { %v1908_v2 = vpop.f32.mrb[14].mxu0  ;;  %v3794_v1 = vld [vmem:[#allocation41] ss:$0 sm:$0xff] }
 0x6e7   : > { %v3960_v3 = vpop.f32.mrb[15].mxu0 }
 0x711   : > { %v1980_v4 = vpop.xlane.xlu1 %1979 }
 0x715   : > { %v1862_v5 = vpop.xlane.xlu1 %1861 }
 0x716   : > { %4520 = vrcp.f32 %v1862_v5 }
 0x717   : > { %4522 = vrcp.f32 %v1980_v4  ;;  %v2465_v4 = vld [vmem:[#allocation5] sm:$0xf] }
 0x719   : > { %v2107_v9 = vpop.xlane.xlu0 %2106 }
 0x71a   : > { %4524 = vrcp.f32 %v2107_v9 }
 0x720   : > { %v4521_v6 = vpop.eup %4520 }
 0x721   : > { %v1912_v7 = vmul.f32 %v4521_v6, %v1905_v63  ;;  %v4523_v10 = vpop.eup %4522  ;;  %v2234_v18 = vpop.xlane.xlu0 %2233  ;;  %v2532_v6 = vsel %vm1867_vm4, %v2465_v4, 0 }
 0x722   : > { %4526 = vrcp.f32 %v2234_v18 }
 0x723   : > { %v1913_v8 = vpack.c.bf16 %v1912_v7, %v1912_v7  ;;  %v3795_v7 = vld [vmem:[#allocation29] ss:$0 sm:$0xff] }
 0x724   : > { %v4525_v21 = vpop.eup %4524 }
 0x725   : > { %1915 = vst.msk [vmem:[#allocation6] sm:$0xf] %vm1914_vm5, %v1913_v8 }
 0x72c   : > { %v4527_v28 = vpop.eup %4526 }
 0x758   : > { %v2027_v12 = vpop.f32.mrb[16].mxu0 }
 0x759   : > { %v2034_v14 = vmul.f32 %v4523_v10, %v2027_v12  ;;  %v3971_v15 = vpop.f32.mrb[17].mxu0 }
 0x75a   : > { %v2030_v16 = vpop.f32.mrb[18].mxu0 }
 0x75b   : > { %v3839_v19 = vpack.c.bf16 %v2034_v14, %v2034_v14  ;;  %v3972_v20 = vpop.f32.mrb[19].mxu0 }
 0x75d   : > { %2039 = vrot.lane.b32.xlu0 %v3839_v19, %s5647_s12 }
 0x760   : > { %v2154_v22 = vpop.f32.mrb[20].mxu0 }
 0x761   : > { %v2161_v23 = vmul.f32 %v4525_v21, %v2154_v22  ;;  %v3983_v24 = vpop.f32.mrb[21].mxu0 }
 0x762   : > { %v2157_v25 = vpop.f32.mrb[22].mxu0  ;;  %v3799_v24 = vld [vmem:[%s1260_s16] ss:$0 sm:$0xff]  ;;  %s5650_s16 = smov [#allocation54]  }
 0x763   : > { %v3840_v26 = vpack.c.bf16 %v2161_v23, %v2161_v23  ;;  %v3984_v27 = vpop.f32.mrb[23].mxu0  ;;  %s5430_s19 = sshll.u32 %s5650_s16, 4  ;;  %s5431_s19 = int_to_ptr.vmem [resolvable:$false] %s5430_s19 }
 0x764   : > { %p5433_p2 = scmp.lt.s32.totalorder %s6632_s15, %s5431_s19 }
 0x765   : > { %2166 = vrot.lane.b32.xlu1 %v3840_v26, %s5648_s4 }
 0x768   : > { %v2281_v29 = vpop.f32.mrb[24].mxu0 }
 0x769   : > { %v2288_v30 = vmul.f32 %v4527_v28, %v2281_v29  ;;  %v3995_v31 = vpop.f32.mrb[25].mxu0 }
 0x76a   : > { %v2284_v32 = vpop.f32.mrb[26].mxu0 }
 0x76b   : > { %v3841_v33 = vpack.c.bf16 %v2288_v30, %v2288_v30  ;;  %v3996_v34 = vpop.f32.mrb[27].mxu0 }
 0x76d   : > { %2293 = vrot.lane.b32.xlu1 %v3841_v33, %s5649_s2 }
 0x7cf   : > { %v2040_v35 = vpop.permute.xlu0 %2039 }
 0x7d0   : > { %2043 = vst.msk [vmem:[#allocation6] sm:$0xf] %vm2042_vm6, %v2040_v35 }
 0x7d7   : > { %v2167_v36 = vpop.permute.xlu1 %2166 }
 0x7d8   : > { %2170 = vst.msk [vmem:[#allocation6] sm:$0xf] %vm2169_vm7, %v2167_v36 }
 0x7df   : > { %v2294_v37 = vpop.permute.xlu1 %2293 }
 0x7e0   : > { %2297 = vst.msk [vmem:[#allocation6] sm:$0xf] %vm2296_vm8, %v2294_v37 }
 0x7e7   : > { %v2298_v39 = vld [vmem:[#allocation6] sm:$0xf] }
 0x7e8   : > { %4002 = vmatmul.mubr.msk.bf16.vlgmr.msra.gmra.mrb[24].mxu1 %vm1491_vm1, %v2298_v39 }
 0x7e9   : > { %4014 = vmatpush3.bf16.xpose.msra.mxu1 %v2476_v40  ;;  %4015 = vmatprep.mubr.msk.bf16.mxu1 %vm5643_vm0, %v5642_v0 }
 0x7ea   : > { %4025 = vmatprep.subr.bf16.mxu1 %v5642_v0 }
 0x8bb   : > { %v2359_v42 = vpop.f32.mrb[24].mxu1 }
 0x8bc   : > { %v2360_v43 = vadd.f32 %v3789_v41, %v2359_v42  ;;  %v4003_v44 = vpop.f32.mrb[25].mxu1 }
 0x8bd   : > { %v2362_v45 = vpop.f32.mrb[26].mxu1 }
 0x8be   : > { %v4004_v46 = vpop.f32.mrb[27].mxu1  ;;  %v2365_v47 = vadd.f32 %v2360_v43, %v6446_v11  ;;  %v4499_v11 = vld [vmem:[#allocation27] sm:$0xff]  }
 0x8bf   : > { %4006 = vmatpush3.bf16.msra.mxu0 %v4499_v11 }
 0x8c0   : > { %v2366_v48 = vsel %vm1491_vm1, %v2365_v47, 0.0  ;;  %4007 = vmatprep.subr.bf16.mxu0 %v5642_v0 }
 0x8c1   : > { %2367 = vadd.xlane.f32.xlu0 %v2366_v48 }
 0x8c3   : > { %4008 = vmatpush3.bf16.msra.mxu0 %v4500_v57 }
 0x8c4   : > { %4019 = vmatprep.subr.bf16.mxu0 %v5642_v0 }
 0x8d7   : > { %2586 = vrot.lane.b32.xlu0 %v4496_v49, %s5645_s25  ;;  %v4501_v49 = vld [vmem:[#allocation5] ss:$0 sps:$4 sm:$0xff]  }
 0x8db   : > { %2712 = vrot.lane.b32.xlu0 %v4497_v50, %s5644_s10  ;;  %v4502_v50 = vld [vmem:[#allocation5] ss:$0 sps:$4 sm:$0xff]  }
 0x8df   : > { %2838 = vrot.lane.b32.xlu0 %v4498_v51, %s5646_s20 }
 0x94e   : > { %v2368_v52 = vpop.xlane.xlu0 %2367 }
 0x94f   : > { %v2370_v53 = vmul.f32 0.03125, %v2368_v52 }
 0x951   : > { %v2371_v54 = vsub.f32 %v2365_v47, %v2370_v53 }
 0x952   : > { %v2587_v12 = vpop.permute.xlu0 %2586 }
 0x953   : > { %v2372_v55 = vmul.f32 %v2371_v54, %v2371_v54  ;;  %v2592_v16 = vsel %vm1807_vm3, %v2587_v12, 0 }
 0x955   : > { %v2373_v56 = vsel %vm1491_vm1, %v2372_v55, 0.0 }
 0x956   : > { %2374 = vadd.xlane.f32.xlu1 %v2373_v56  ;;  %v2713_v17 = vpop.permute.xlu0 %2712 }
 0x957   : > { %v2718_v19 = vsel %vm1807_vm3, %v2713_v17, 0 }
 0x95a   : > { %v2839_v20 = vpop.permute.xlu0 %2838 }
 0x95b   : > { %v2844_v22 = vsel %vm1807_vm3, %v2839_v20, 0 }
 0x9e3   : > { %v2375_v58 = vpop.xlane.xlu1 %2374 }
 0x9e4   : > { %v2376_v59 = vmul.f32 0.03125, %v2375_v58 }
 0x9e6   : > { %v2377_v60 = vadd.f32 1e-05, %v2376_v59 }
 0x9e8   : > { %4528 = vrsqrt.f32 %v2377_v60 }
 0x9f2   : > { %v4529_v61 = vpop.eup %4528 }
 0x9f3   : > { %v2379_v63 = vmul.f32 %v4529_v61, %v2371_v54  ;;  %v4503_v54 = vld [vmem:[#allocation5] ss:$0 sps:$4 sm:$0xff]  }
 0x9f5   : > { %v2387_v2 = vmul.f32 %v3793_v62, %v2379_v63 }
 0x9f7   : > { %v6543_v3 = vadd.f32 %v3794_v1, %v2387_v2 }
 0x9f9   : > { %v2396_v5 = vpack.c.bf16 %v6543_v3, %v6543_v3 }
 0x9fb   : > { %4010 = vmatmul.mubr.msk.bf16.vlgmr.msra.gmra.mrb[28].mxu0 %vm1491_vm1, %v2396_v5 }
 0x9fc   : > { %4020 = vmatpush3.bf16.msra.mxu0 %v2532_v6  ;;  %4021 = vmatprep.mubr.msk.bf16.mxu0 %vm5643_vm0, %v5642_v0 }
 0x9fd   : > { %4031 = vmatprep.subr.bf16.mxu0 %v5642_v0 }
 0xace   : > { %v2457_v8 = vpop.f32.mrb[28].mxu0 }
 0xacf   : > { %v2458_v9 = vadd.f32 %v3795_v7, %v2457_v8  ;;  %v4011_v10 = vpop.f32.mrb[29].mxu0 }
 0xad0   : > { %v2460_v13 = vpop.f32.mrb[30].mxu0 }
 0xad1   : > { %v2463_v14 = vpack.c.bf16 %v2458_v9, %v2458_v9  ;;  %v4012_v15 = vpop.f32.mrb[31].mxu0 }
 0xad3   : > { %2581 = vrot.lane.b32.xlu1 %v2463_v14, %s5645_s25  ;;  %4016 = vmatmul.mubr.msk.bf16.vlgmr.msra.gmra.mrb[28].mxu1 %vm1807_vm3, %v2463_v14 }
 0xad4   : > { %4026 = vmatpush3.bf16.xpose.msra.mxu1 %v2592_v16  ;;  %4027 = vmatprep.mubr.msk.bf16.mxu1 %vm5643_vm0, %v5642_v0 }
 0xad5   : > { %4037 = vmatprep.subr.bf16.mxu1 %v5642_v0 }
 0xad7   : > { %2707 = vrot.lane.b32.xlu1 %v2463_v14, %s5644_s10 }
 0xadb   : > { %2833 = vrot.lane.b32.xlu1 %v2463_v14, %s5646_s20 }
 0xb45   : > { %v2582_v18 = vpop.permute.xlu1 %2581 }
 0xb46   : > { %4028 = vmatmul.mubr.msk.bf16.vlgmr.msra.gmra.mrb[32].mxu1 %vm1807_vm3, %v2582_v18 }
 0xb47   : > { %4038 = vmatpush3.bf16.xpose.msra.mxu1 %v2718_v19  ;;  %4039 = vmatprep.mubr.msk.bf16.mxu1 %vm5643_vm0, %v5642_v0 }
 0xb48   : > { %4049 = vmatprep.subr.bf16.mxu1 %v5642_v0 }
 0xb49   : > { %v2708_v21 = vpop.permute.xlu1 %2707 }
 0xb4d   : > { %v2834_v23 = vpop.permute.xlu1 %2833 }
 0xb4e   : > { %4040 = vmatmul.mubr.msk.bf16.vlgmr.msra.gmra.mrb[36].mxu1 %vm1807_vm3, %v2708_v21 }
 0xb4f   : > { %4050 = vmatpush3.bf16.xpose.msra.mxu1 %v2844_v22  ;;  %4051 = vmatprep.mubr.msk.bf16.mxu1 %vm5643_vm0, %v5642_v0 }
 0xb50   : > { %4061 = vmatprep.subr.bf16.mxu1 %v5642_v0 }
 0xb56   : > { %4052 = vmatmul.mubr.msk.bf16.vlgmr.msra.gmra.mrb[40].mxu1 %vm1807_vm3, %v2834_v23 }
 0xb57   : > { %4065 = vmatprep.mubr.msk.bf16.mxu1 %vm5643_vm0, %v5642_v0 }
 0xba6   : > { %v2512_v25 = vpop.f32.mrb[28].mxu1 }
 0xba7   : > { %v2513_v26 = vadd.f32 %v3799_v24, %v2512_v25  ;;  %v4017_v27 = vpop.f32.mrb[29].mxu1 }
 0xba8   : > { %v2515_v28 = vpop.f32.mrb[30].mxu1 }
 0xba9   : > { %v4018_v29 = vpop.f32.mrb[31].mxu1  ;;  %v2518_v30 = vsel %vm1807_vm3, %v2513_v26, -inf }
 0xbaa   : > { %2519 = vmax.xlane.f32.xlu0 %v2518_v30 }
 0xc19   : > { %v2628_v31 = vpop.f32.mrb[32].mxu1 }
 0xc1a   : > { %v2629_v32 = vadd.f32 %v3799_v24, %v2628_v31  ;;  %v4029_v33 = vpop.f32.mrb[33].mxu1 }
 0xc1b   : > { %v2631_v34 = vpop.f32.mrb[34].mxu1 }
 0xc1c   : > { %v4030_v35 = vpop.f32.mrb[35].mxu1  ;;  %v2634_v36 = vsel %vm1807_vm3, %v2629_v32, -inf }
 0xc1d   : > { %2635 = vmax.xlane.f32.xlu1 %v2634_v36 }
 0xc21   : > { %v2754_v37 = vpop.f32.mrb[36].mxu1 }
 0xc22   : > { %v2755_v38 = vadd.f32 %v3799_v24, %v2754_v37  ;;  %v4041_v39 = vpop.f32.mrb[37].mxu1 }
 0xc23   : > { %v2757_v40 = vpop.f32.mrb[38].mxu1 }
 0xc24   : > { %v4042_v41 = vpop.f32.mrb[39].mxu1  ;;  %v2760_v42 = vsel %vm1807_vm3, %v2755_v38, -inf  ;;  %v4504_v40 = vld [vmem:[#allocation36] sm:$0xff]  }
 0xc25   : > { %2761 = vmax.xlane.f32.xlu0 %v2760_v42  ;;  %4062 = vmatpush3.bf16.msra.mxu1 %v4504_v40 }
 0xc26   : > { %4063 = vmatprep.subr.bf16.mxu1 %v5642_v0 }
 0xc29   : > { %v2880_v43 = vpop.f32.mrb[40].mxu1 }
 0xc2a   : > { %v2881_v44 = vadd.f32 %v3799_v24, %v2880_v43  ;;  %v4053_v45 = vpop.f32.mrb[41].mxu1 }
 0xc2b   : > { %v2883_v46 = vpop.f32.mrb[42].mxu1 }
 0xc2c   : > { %v4054_v47 = vpop.f32.mrb[43].mxu1  ;;  %v2886_v48 = vsel %vm1807_vm3, %v2881_v44, -inf }
 0xc2d   : > { %2887 = vmax.xlane.f32.xlu0 %v2886_v48 }
 0xc2e   : > { %2647 = vrot.lane.b32.xlu1 %v4501_v49, %s5645_s25 }
 0xc32   : > { %2899 = vrot.lane.b32.xlu1 %v4502_v50, %s5646_s20 }
 0xc37   : > { %v2520_v51 = vpop.xlane.xlu0 %2519 }
 0xc38   : > { %v2521_v52 = vsub.f32 %v2513_v26, %v2520_v51 }
 0xc3a   : > { %v2522_v53 = vmul.f32 1.442695, %v2521_v52 }
 0xc3c   : > { %4530 = vpow2.f32 %v2522_v53 }
 0xc43   : > { %2773 = vrot.lane.b32.xlu0 %v4503_v54, %s5644_s10  ;;  %s5432_s10 = scalar_lea.vmem %s5431_s19, 256 }
 0xc44   : > { %p5434_p1 = scmp.lt.s32.totalorder %s5432_s10, %s5426_s6 }
 0xc46   : > { %v4531_v55 = vpop.eup %4530  ;;  %p5435_p7 = por %p5434_p1, %p5433_p2 }
 0xc47   : > { %v2527_v56 = vpack.c.bf16 %v4531_v55, %v4531_v55  ;;  %v2524_v9 = vsel %vm1807_vm3, %v4531_v55, 0.0 }
 0xc48   : > { %p5436_p10 = pnand %p5435_p7, %p5429_p3 }
 0xc49   : > { %4022 = vmatmul.mubr.msk.bf16.vlgmr.msra.gmra.mrb[32].mxu0 %vm1807_vm3, %v2527_v56 }
 0xc4a   : > { %4033 = vmatprep.mubr.msk.bf16.mxu0 %vm5643_vm0, %v5642_v0 }
 0xcaa   : > { %v2636_v11 = vpop.xlane.xlu1 %2635 }
 0xcab   : > { %v2637_v57 = vsub.f32 %v2629_v32, %v2636_v11 }
 0xcad   : > { %v2638_v58 = vmul.f32 1.442695, %v2637_v57  ;;  %v3817_v57 = vld [vmem:[#allocation38] ss:$0 sm:$0xff] }
 0xcae   : > { %v2648_v59 = vpop.permute.xlu1 %2647 }
 0xcaf   : > { %4532 = vpow2.f32 %v2638_v58  ;;  %v2653_v60 = vsel %vm1867_vm4, %v2648_v59, 0 }
 0xcb0   : > { %4032 = vmatpush3.bf16.msra.mxu0 %v2653_v60 }
 0xcb1   : > { %4043 = vmatprep.subr.bf16.mxu0 %v5642_v0 }
 0xcb2   : > { %v2762_v61 = vpop.xlane.xlu0 %2761  ;;  %v2900_v13 = vpop.permute.xlu1 %2899 }
 0xcb3   : > { %v2763_v62 = vsub.f32 %v2755_v38, %v2762_v61  ;;  %v2905_v16 = vsel %vm1867_vm4, %v2900_v13, 0 }
 0xcb5   : > { %v2764_v63 = vmul.f32 1.442695, %v2763_v62 }
 0xcb7   : > { %4534 = vpow2.f32 %v2764_v63 }
 0xcb9   : > { %v4533_v1 = vpop.eup %4532 }
 0xcba   : > { %v2888_v2 = vpop.xlane.xlu0 %2887  ;;  %v2640_v4 = vsel %vm1807_vm3, %v4533_v1, 0.0  ;;  %v2643_v5 = vpack.c.bf16 %v4533_v1, %v4533_v1 }
 0xcbb   : > { %v2889_v6 = vsub.f32 %v2881_v44, %v2888_v2  ;;  %2641 = vadd.xlane.f32.xlu1 %v2640_v4  ;;  %v4505_v44 = vld [vmem:[#allocation36 + $0x8] sm:$0xff]  }
 0xcbc   : > { %4034 = vmatmul.mubr.msk.bf16.vlgmr.msra.gmra.mrb[36].mxu0 %vm1807_vm3, %v2643_v5  ;;  %4064 = vmatpush3.bf16.msra.mxu1 %v4505_v44 }
 0xcbd   : > { %v2890_v7 = vmul.f32 1.442695, %v2889_v6  ;;  %4045 = vmatprep.mubr.msk.bf16.mxu0 %vm5643_vm0, %v5642_v0  ;;  %4077 = vmatprep.subr.bf16.mxu1 %v5642_v0 }
 0xcbe   : > { %v2774_v8 = vpop.permute.xlu0 %2773 }
 0xcbf   : > { %4536 = vpow2.f32 %v2890_v7  ;;  %v2779_v10 = vsel %vm1867_vm4, %v2774_v8, 0  ;;  %2525 = vadd.xlane.f32.xlu1 %v2524_v9  ;;  %v4506_v8 = vld [vmem:[#allocation48] sm:$0xff]   ;;  %v4507_v9 = vld [vmem:[#allocation48 + $0x8] sm:$0xff]  }
 0xcc0   : > { %4044 = vmatpush3.bf16.msra.mxu0 %v2779_v10  ;;  %v4508_v10 = vld [vmem:[#allocation51] sm:$0xff]  }
 0xcc1   : > { %v4535_v12 = vpop.eup %4534  ;;  %4055 = vmatprep.subr.bf16.mxu0 %v5642_v0 }
 0xcc2   : > { %v2766_v14 = vsel %vm1807_vm3, %v4535_v12, 0.0  ;;  %v2769_v15 = vpack.c.bf16 %v4535_v12, %v4535_v12  ;;  %v4509_v12 = vld [vmem:[#allocation51 + $0x8] sm:$0xff]  }
 0xcc3   : > { %2767 = vadd.xlane.f32.xlu0 %v2766_v14 }
 0xcc4   : > { %4046 = vmatmul.mubr.msk.bf16.vlgmr.msra.gmra.mrb[40].mxu0 %vm1807_vm3, %v2769_v15 }
 0xcc5   : > { %4056 = vmatpush3.bf16.msra.mxu0 %v2905_v16  ;;  %4057 = vmatprep.mubr.msk.bf16.mxu0 %vm5643_vm0, %v5642_v0  ;;  %v3821_v16 = vld [vmem:[#allocation42] ss:$0 sm:$0xff] }
 0xcc6   : > { %4069 = vmatprep.subr.bf16.mxu0 %v5642_v0 }
 0xcc9   : > { %v4537_v17 = vpop.eup %4536 }
 0xcca   : > { %v2892_v18 = vsel %vm1807_vm3, %v4537_v17, 0.0  ;;  %v2895_v19 = vpack.c.bf16 %v4537_v17, %v4537_v17 }
 0xccb   : > { %2893 = vadd.xlane.f32.xlu0 %v2892_v18  ;;  %v3822_v18 = vld [vmem:[#allocation44] ss:$0 sm:$0xff] }
 0xccc   : > { %4058 = vmatmul.mubr.msk.bf16.vlgmr.msra.gmra.mrb[44].mxu0 %vm1807_vm3, %v2895_v19 }
 0xccd   : > { %4073 = vmatprep.mubr.msk.bf16.mxu0 %vm5643_vm0, %v5642_v0  ;;  %4070 = vmatpush3.bf16.msra.mxu0 %v4506_v8 }
 0xcce   : > { %4071 = vmatprep.subr.bf16.mxu0 %v5642_v0 }
 0xcd1   : > { %4072 = vmatpush3.bf16.msra.mxu0 %v4507_v9 }
 0xd1c   : > { %v2568_v20 = vpop.f32.mrb[32].mxu0 }
 0xd1d   : > { %v4023_v21 = vpop.f32.mrb[33].mxu0 }
 0xd1e   : > { %v2571_v22 = vpop.f32.mrb[34].mxu0 }
 0xd1f   : > { %v4024_v23 = vpop.f32.mrb[35].mxu0  ;;  %v4510_v22 = vld [vmem:[#allocation51 + $0x10] sm:$0xff]  }
 0xd20   : > { %v4511_v23 = vld [vmem:[#allocation51 + $0x18] sm:$0xff]  }
 0xd48   : > { %v2642_v24 = vpop.xlane.xlu1 %2641 }
 0xd4c   : > { %v2526_v25 = vpop.xlane.xlu1 %2525 }
 0xd4d   : > { %4538 = vrcp.f32 %v2526_v25 }
 0xd4e   : > { %4540 = vrcp.f32 %v2642_v24  ;;  %v3823_v24 = vld [vmem:[#allocation50] ss:$0 sm:$0xff] }
 0xd50   : > { %v2768_v29 = vpop.xlane.xlu0 %2767 }
 0xd51   : > { %4542 = vrcp.f32 %v2768_v29 }
 0xd57   : > { %v4539_v26 = vpop.eup %4538 }
 0xd58   : > { %v2575_v27 = vmul.f32 %v4539_v26, %v2568_v20  ;;  %v4541_v30 = vpop.eup %4540  ;;  %v2894_v35 = vpop.xlane.xlu0 %2893 }
 0xd59   : > { %4544 = vrcp.f32 %v2894_v35 }
 0xd5a   : > { %v2576_v28 = vpack.c.bf16 %v2575_v27, %v2575_v27 }
 0xd5b   : > { %v4543_v38 = vpop.eup %4542 }
 0xd5c   : > { %2577 = vst.msk [vmem:[#allocation6] sm:$0xf] %vm1914_vm5, %v2576_v28 }
 0xd63   : > { %v4545_v47 = vpop.eup %4544 }
 0xd8f   : > { %v2689_v31 = vpop.f32.mrb[36].mxu0 }
 0xd90   : > { %v2696_v32 = vmul.f32 %v4541_v30, %v2689_v31  ;;  %v4035_v33 = vpop.f32.mrb[37].mxu0 }
 0xd91   : > { %v2692_v34 = vpop.f32.mrb[38].mxu0  ;;  %v3832_v33 = vld [vmem:[#allocation53] ss:$0 sm:$0xff] }
 0xd92   : > { %v3842_v36 = vpack.c.bf16 %v2696_v32, %v2696_v32  ;;  %v4036_v37 = vpop.f32.mrb[39].mxu0 }
 0xd94   : > { %2701 = vrot.lane.b32.xlu0 %v3842_v36, %s5647_s12 }
 0xd97   : > { %v2815_v39 = vpop.f32.mrb[40].mxu0 }
 0xd98   : > { %v2822_v41 = vmul.f32 %v4543_v38, %v2815_v39  ;;  %v4047_v42 = vpop.f32.mrb[41].mxu0 }
 0xd99   : > { %v2818_v43 = vpop.f32.mrb[42].mxu0 }
 0xd9a   : > { %v3843_v45 = vpack.c.bf16 %v2822_v41, %v2822_v41  ;;  %v4048_v46 = vpop.f32.mrb[43].mxu0 }
 0xd9c   : > { %2827 = vrot.lane.b32.xlu1 %v3843_v45, %s5648_s4 }
 0xd9f   : > { %v2941_v48 = vpop.f32.mrb[44].mxu0 }
 0xda0   : > { %v2948_v49 = vmul.f32 %v4545_v47, %v2941_v48  ;;  %v4059_v50 = vpop.f32.mrb[45].mxu0  ;;  %v3833_v48 = vld [vmem:[#allocation45] ss:$0 sm:$0xff] }
 0xda1   : > { %v2944_v51 = vpop.f32.mrb[46].mxu0  ;;  %v3834_v50 = vld [vmem:[#allocation47] ss:$0 sm:$0xff] }
 0xda2   : > { %v3844_v52 = vpack.c.bf16 %v2948_v49, %v2948_v49  ;;  %v4060_v53 = vpop.f32.mrb[47].mxu0 }
 0xda4   : > { %2953 = vrot.lane.b32.xlu1 %v3844_v52, %s5649_s2 }
 0xe06   : > { %v2702_v54 = vpop.permute.xlu0 %2701 }
 0xe07   : > { %2704 = vst.msk [vmem:[#allocation6] sm:$0xf] %vm2042_vm6, %v2702_v54 }
 0xe0e   : > { %v2828_v55 = vpop.permute.xlu1 %2827 }
 0xe0f   : > { %2830 = vst.msk [vmem:[#allocation6] sm:$0xf] %vm2169_vm7, %v2828_v55 }
 0xe16   : > { %v2954_v56 = vpop.permute.xlu1 %2953 }
 0xe17   : > { %2956 = vst.msk [vmem:[#allocation6] sm:$0xf] %vm2296_vm8, %v2954_v56 }
 0xe1e   : > { %v2957_v11 = vld [vmem:[#allocation6] sm:$0xf] }
 0xe1f   : > { %4066 = vmatmul.mubr.msk.bf16.vlgmr.msra.gmra.mrb[44].mxu1 %vm1491_vm1, %v2957_v11 }
 0xe20   : > { %4085 = vmatprep.mubr.msk.bf16.mxu1 %vm5643_vm0, %v5642_v0  ;;  %4078 = vmatpush3.bf16.msra.mxu1 %v4508_v10 }
 0xe21   : > { %4079 = vmatprep.subr.bf16.mxu1 %v5642_v0 }
 0xe24   : > { %4080 = vmatpush3.bf16.msra.mxu1 %v4509_v12 }
 0xe25   : > { %4081 = vmatprep.subr.bf16.mxu1 %v5642_v0 }
 0xe28   : > { %4082 = vmatpush3.bf16.msra.mxu1 %v4510_v22 }
 0xe29   : > { %4083 = vmatprep.subr.bf16.mxu1 %v5642_v0 }
 0xe2c   : > { %4084 = vmatpush3.bf16.msra.mxu1 %v4511_v23 }
 0xef2   : > { %v3018_v58 = vpop.f32.mrb[44].mxu1 }
 0xef3   : > { %v3019_v59 = vadd.f32 %v3817_v57, %v3018_v58  ;;  %v4067_v60 = vpop.f32.mrb[45].mxu1 }
 0xef4   : > { %v3021_v61 = vpop.f32.mrb[46].mxu1 }
 0xef5   : > { %v4068_v62 = vpop.f32.mrb[47].mxu1  ;;  %v3024_v63 = vadd.f32 %v3019_v59, %v6543_v3 }
 0xef7   : > { %v3025_v1 = vsel %vm1491_vm1, %v3024_v63, 0.0 }
 0xef8   : > { %3026 = vadd.xlane.f32.xlu0 %v3025_v1 }
 0xf85   : > { %v3027_v2 = vpop.xlane.xlu0 %3026 }
 0xf86   : > { %v3028_v4 = vmul.f32 0.03125, %v3027_v2 }
 0xf88   : > { %v3029_v5 = vsub.f32 %v3024_v63, %v3028_v4 }
 0xf8a   : > { %v3030_v6 = vmul.f32 %v3029_v5, %v3029_v5 }
 0xf8c   : > { %v3031_v7 = vsel %vm1491_vm1, %v3030_v6, 0.0 }
 0xf8d   : > { %3032 = vadd.xlane.f32.xlu1 %v3031_v7 }
0x101a   : > { %v3033_v3 = vpop.xlane.xlu1 %3032 }
0x101b   : > { %v3034_v13 = vmul.f32 0.03125, %v3033_v3 }
0x101d   : > { %v3035_v14 = vadd.f32 1e-05, %v3034_v13 }
0x101f   : > { %4546 = vrsqrt.f32 %v3035_v14 }
0x1029   : > { %v4547_v15 = vpop.eup %4546 }
0x102a   : > { %v3037_v17 = vmul.f32 %v4547_v15, %v3029_v5 }
0x102c   : > { %v3045_v19 = vmul.f32 %v3821_v16, %v3037_v17 }
0x102e   : > { %v3053_v20 = vadd.f32 %v3822_v18, %v3045_v19 }
0x1030   : > { %v3054_v21 = vpack.c.bf16 %v3053_v20, %v3053_v20 }
0x1032   : > { %4074 = vmatmul.mubr.msk.bf16.vlgmr.msra.gmra.mrb[48].mxu0 %vm1491_vm1, %v3054_v21 }
0x1105   : > { %v3115_v25 = vpop.f32.mrb[48].mxu0 }
0x1106   : > { %v3116_v26 = vadd.f32 %v3823_v24, %v3115_v25  ;;  %v4075_v27 = vpop.f32.mrb[49].mxu0 }
0x1107   : > { %v3118_v28 = vpop.f32.mrb[50].mxu0 }
0x1108   : > { %v3121_v29 = vmax.f32 %v3116_v26, 0.0  ;;  %v4076_v30 = vpop.f32.mrb[51].mxu0 }
0x110a   : > { %v3122_v31 = vpack.c.bf16 %v3121_v29, %v3121_v29 }
0x110c   : > { %4086 = vmatmul.mubr.msk.bf16.vlgmr.msra.gmra.mrb[48].mxu1 %vm3155_vm9, %v3122_v31 }
0x11df   : > { %v3193_v32 = vpop.f32.mrb[48].mxu1 }
0x11e0   : > { %v3199_v34 = vadd.f32 %v3193_v32, %v3053_v20  ;;  %v4087_v35 = vpop.f32.mrb[49].mxu1 }
0x11e1   : > { %v3196_v36 = vpop.f32.mrb[50].mxu1 }
0x11e2   : > { %v4088_v37 = vpop.f32.mrb[51].mxu1  ;;  %v3207_v38 = vadd.f32 %v3832_v33, %v3199_v34 }
0x11e4   : > { %v3208_v0 = vsel %vm1491_vm1, %v3207_v38, 0.0 }
0x11e5   : > { %3209 = vadd.xlane.f32.xlu0 %v3208_v0 }
0x1272   : > { %v3210_v39 = vpop.xlane.xlu0 %3209 }
0x1273   : > { %v3211_v40 = vmul.f32 0.03125, %v3210_v39 }
0x1275   : > { %v3212_v41 = vsub.f32 %v3207_v38, %v3211_v40 }
0x1277   : > { %v3213_v42 = vmul.f32 %v3212_v41, %v3212_v41 }
0x1279   : > { %v3214_v43 = vsel %vm1491_vm1, %v3213_v42, 0.0 }
0x127a   : > { %3215 = vadd.xlane.f32.xlu0 %v3214_v43 }
0x1307   : > { %v3216_v44 = vpop.xlane.xlu0 %3215 }
0x1308   : > { %v3217_v45 = vmul.f32 0.03125, %v3216_v44 }
0x130a   : > { %v3218_v46 = vadd.f32 1e-05, %v3217_v45 }
0x130c   : > { %4548 = vrsqrt.f32 %v3218_v46 }
0x1316   : > { %v4549_v47 = vpop.eup %4548 }
0x1317   : > { %v3220_v49 = vmul.f32 %v4549_v47, %v3212_v41 }
0x1319   : > { %v3228_v51 = vmul.f32 %v3833_v48, %v3220_v49 }
0x131b   : > { %v3236_v52 = vadd.f32 %v3834_v50, %v3228_v51 }
0x131d   : > { %3237 = vst.msk [vmem:[%s1456_s11] sm:$0xff] %vm1491_vm1, %v3236_v52 }
0x131e   : > { %5439 = shalt.err (!%p5436_p10)
}
0x131f   : > { %s5440_s7 = scalar_lea.hbm %s6630_s26, 128  ;;  %s5444_s25 = scalar_lea.hbm %s6851_s24, 256 }
0x1320   : > { %p5441_p6 = scmp.ne.s32.totalorder %s6630_s26, %s5440_s7  ;;  %p5445_p13 = scmp.lt.u32.totalorder %s6630_s26, %s6851_s24 }
0x1321   : > { %p5446_p4 = scmp.lt.u32.totalorder %s5444_s25, %s5440_s7  ;;  %p5448_p0 = scmp.lt.u32.totalorder %s5440_s7, %s6630_s26 }
0x1322   : > { %p5442_p12 = pnand %p5441_p6, %p6852_p9 }
0x1323   : > { %p5447_p8 = por %p5446_p4, %p5445_p13 }
0x1324   : > { %p5443_p11 = pneg %p5442_p12 }
0x1325   : > { %p5449_p5 = por %p5448_p0, %p5447_p8 }
0x1327   : > { %p5450_p3 = pnand %p5449_p5, %p5443_p11 }
0x1329   : > { %5453 = shalt.err (!%p5450_p3)
}
0x132a   : > { %4205 = dma.vmem_to_hbm [thread:$0]  (%p6852_p9), %s6632_s15, 128, %s6630_s26, %s3239_s21  }
0x132b PF: > { %s3265_s20 = sand.u32 1, %s5556_s0   ;;  %p6853_p2 = scmp.ne.s32.totalorder %s6793_s3, 0 }
0x132c   : > { %p6854_p1 = scmp.ge.s32.totalorder %s5576_s1, 2  ;;  %s3266_s12 = scalar_lea.sflag [#allocation9], %s3265_s20 }
0x132e   : > { %p4303_p7 = pnand %p6854_p1, %p6853_p2 }
0x1330   : > { %5551 = dma.done.wait (!%p4303_p7), %s3266_s12, 128  }
0x1331   : > { %5553 = vsyncadd (!%p4303_p7), %s3266_s12, 4294967168  ;;  %s95_s1 = sadd.s32 1, %s5576_s1   ;;  %s6855_s17 = sld [smem:[#allocation108_spill]] }
0x1332   : > { %p92_p10 = scmp.ge.s32.totalorder %s95_s1, 4   ;;  %s6856_s4 = sld [smem:[#allocation107_spill]] }
0x1333   : > { %s6857_s0 = smov %s5560_s22  ;;  %s6858_s22 = smov %s5564_s23 }
0x1334   : > { %s6860_s26 = smov %s5572_s28  ;;  %94 = sbr.rel (!%p92_p10) target bundleno = 89 (0x59), region = 368 }
0x1337   : > { %s6859_s23 = smov %s6855_s17 }
0x1338   : > { %s6861_s28 = smov %s6856_s4 }
0x133b   :  { %3271 = vsyncpa [#allocation8], 1 }
0x133c   :  { %3273 = vsyncpa [#allocation8 + $0x1], 1 }
0x133d   :  { %3274 = vsyncpa [#allocation11], 1 }
0x133e   :  { %3276 = vsyncpa [#allocation11 + $0x1], 1 }
0x133f   :  { %3277 = vsyncpa [#allocation14], 1 }
0x1340   :  { %3278 = vsyncpa [#allocation19], 1 }
0x1341   :  { %3279 = vsyncpa [#allocation22], 1 }
0x1342   :  { %3280 = vsyncpa [#allocation25], 1 }
0x1343   :  { %3281 = vsyncpa [#allocation28], 1 }
0x1344   :  { %3282 = vsyncpa [#allocation31], 1 }
0x1345   :  { %3283 = vsyncpa [#allocation34], 1 }
0x1346   :  { %3284 = vsyncpa [#allocation37], 1 }
0x1347   :  { %3285 = vsyncpa [#allocation40], 1 }
0x1348   :  { %3286 = vsyncpa [#allocation43], 1 }
0x1349   :  { %3287 = vsyncpa [#allocation46], 1 }
0x134a   :  { %3288 = vsyncpa [#allocation49], 1 }
0x134b   :  { %3289 = vsyncpa [#allocation52], 1 }
0x134c   :  { %3290 = vsyncpa [#allocation9], 1 }
0x134d   :  { %3292 = vsyncpa [#allocation9 + $0x1], 1 }

</bundles_post_ra>
